<compile_context>
chip_gen: v7x
topology: tpu7x:2x2x1
jax: 0.10.0
libtpu: 0.0.40
codegen_flags: <defaults>
</compile_context>

<pallas_src>
import jax
import jax.numpy as jnp
from jax.experimental import pallas as pl
from jax.experimental.pallas import tpu as pltpu

INPUT = 64       # nn.LSTM input_size
HIDDEN = 100     # nn.LSTM hidden_size (2 layers)
HP = 128         # lane-padded hidden size
GP = 4 * HP      # padded gate width (512)
SEQ = 8          # demo sequence length
BATCH = 8        # demo batch (multiple of 8 sublanes)


def lstm_mlp_kernel(x_ref,
                    wih0_ref, whh0_ref, b0_ref,     # layer 0 (un-fused)
                    wih1_ref, whh1_ref, b1_ref,     # layer 1 (un-fused)
                    wl1_ref, bl1_ref,               # Linear(100->10) padded (128,128)
                    wl2_ref, bl2_ref,               # Linear(10->1) as a (1,128) row
                    out_ref,                        # (B, 128) lane-dense output slab
                    gates_ref, hseq_ref):           # VMEM scratch
    T, B, _ = x_ref.shape

    def sig(v):
        # sigmoid via tanh: one EUP op instead of exp + reciprocal.
        return 0.5 * jnp.tanh(0.5 * v) + 0.5

    def apply_gates(g, c):
        # PyTorch gate order [i | f | g | o], each 128-lane aligned.
        i = sig(g[:, 0 * HP:1 * HP])
        f = sig(g[:, 1 * HP:2 * HP])
        gg = jnp.tanh(g[:, 2 * HP:3 * HP])
        o = sig(g[:, 3 * HP:4 * HP])
        c_new = f * c + i * gg
        return o * jnp.tanh(c_new), c_new

    z = jnp.zeros((B, HP), jnp.float32)

    # ---------------- layer 0 ----------------
    # Hoisted input projection for all T*B rows (one big MXU matmul), bias folded in.
    x_flat = x_ref[...].reshape(T * B, HP)
    gates_ref[...] = (
        jnp.dot(x_flat, wih0_ref[...], preferred_element_type=jnp.float32)
        + b0_ref[...]).reshape(T, B, GP)

    h, c = z, z
    for t in range(T):  # serial recurrence: only K=128 h@W_hh inside the loop
        g = gates_ref[t] + jnp.dot(h, whh0_ref[...],
                                   preferred_element_type=jnp.float32)
        h, c = apply_gates(g, c)
        hseq_ref[t] = h  # post-cell h0 of timestep t feeds layer 1 at timestep t

    # ---------------- layer 1 ----------------
    # Batched input projection of the full h0 sequence (reuses the gates scratch).
    h0_all = hseq_ref[...].reshape(T * B, HP)
    gates_ref[...] = (
        jnp.dot(h0_all, wih1_ref[...], preferred_element_type=jnp.float32)
        + b1_ref[...]).reshape(T, B, GP)

    h, c = z, z
    for t in range(T):
        g = gates_ref[t] + jnp.dot(h, whh1_ref[...],
                                   preferred_element_type=jnp.float32)
        h, c = apply_gates(g, c)

    # ---------------- MLP head (once, on the last hidden state) ----------------
    hid = jnp.maximum(
        jnp.dot(h, wl1_ref[...], preferred_element_type=jnp.float32) + bl1_ref[...],
        0.0)
    # Linear(10->1) as VPU multiply + lane reduction (no N=1 MXU push).
    y = jnp.sum(hid * wl2_ref[...], axis=-1, keepdims=True) + bl2_ref[...]
    # Lane-dense store; wrapper slices column 0.
    out_ref[...] = jnp.broadcast_to(y, (B, HP))


def _pad_gate_cols(w_t):
    """(K, 4*HIDDEN) -> (K, 4*HP): each PyTorch gate block placed at a
    128-lane-aligned column offset, zero-padded 100 -> 128."""
    k = w_t.shape[0]
    out = jnp.zeros((k, GP), jnp.float32)
    for g in range(4):
        out = out.at[:, g * HP:g * HP + HIDDEN].set(
            w_t[:, g * HIDDEN:(g + 1) * HIDDEN])
    return out


def pack_params(p):
    """Build padded (un-fused) kernel operands from raw PyTorch-layout params."""
    # layer 0
    wih0 = jnp.zeros((HP, GP), jnp.float32).at[:INPUT, :].set(
        _pad_gate_cols(p["wih0"].T))
    whh0 = jnp.zeros((HP, GP), jnp.float32).at[:HIDDEN, :].set(
        _pad_gate_cols(p["whh0"].T))
    b0 = _pad_gate_cols((p["bih0"] + p["bhh0"])[None, :])

    # layer 1
    wih1 = jnp.zeros((HP, GP), jnp.float32).at[:HIDDEN, :].set(
        _pad_gate_cols(p["wih1"].T))
    whh1 = jnp.zeros((HP, GP), jnp.float32).at[:HIDDEN, :].set(
        _pad_gate_cols(p["whh1"].T))
    b1 = _pad_gate_cols((p["bih1"] + p["bhh1"])[None, :])

    # head: padded rows/cols are exact zeros.
    wl1 = jnp.zeros((HP, HP), jnp.float32).at[:HIDDEN, :10].set(p["w_l1"].T)
    bl1 = jnp.zeros((1, HP), jnp.float32).at[0, :10].set(p["b_l1"])
    wl2 = jnp.zeros((1, HP), jnp.float32).at[0, :10].set(p["w_l2"][0])
    bl2 = p["b_l2"][None, :]  # (1, 1)

    return wih0, whh0, b0, wih1, whh1, b1, wl1, bl1, wl2, bl2


def binary_classification_forward(inputs, params):
    """inputs: (T, B, 64) float32 (time-major, like nn.LSTM) -> (B, 1) float32."""
    T, B, F = inputs.shape
    # zero-pad features 64 -> 128 so the hoisted x@W_ih0 matmul is lane-aligned.
    x_pad = jnp.zeros((T, B, HP), jnp.float32).at[:, :, :F].set(inputs)
    ops = pack_params(params)

    vmem = pl.BlockSpec(memory_space=pltpu.MemorySpace.VMEM)
    out = pl.pallas_call(
        lstm_mlp_kernel,
        out_shape=jax.ShapeDtypeStruct((B, HP), jnp.float32),
        in_specs=[vmem] * 11,
        out_specs=vmem,
        scratch_shapes=[
            pltpu.VMEM((T, B, GP), jnp.float32),   # precomputed gate inputs (reused per layer)
            pltpu.VMEM((T, B, HP), jnp.float32),   # layer-0 hidden sequence
        ],
    )(x_pad, *ops)
    return out[:, :1]


def init_params(key):
    """PyTorch-default uniform(-1/sqrt(fan), 1/sqrt(fan)) init, raw torch layout."""
    ks = jax.random.split(key, 12)
    kl = 1.0 / jnp.sqrt(HIDDEN)
    k2 = 1.0 / jnp.sqrt(10.0)

    def u(k, shape, bound):
        return jax.random.uniform(k, shape, jnp.float32, -bound, bound)

    return {
        "wih0": u(ks[0], (4 * HIDDEN, INPUT), kl),
        "whh0": u(ks[1], (4 * HIDDEN, HIDDEN), kl),
        "bih0": u(ks[2], (4 * HIDDEN,), kl),
        "bhh0": u(ks[3], (4 * HIDDEN,), kl),
        "wih1": u(ks[4], (4 * HIDDEN, HIDDEN), kl),
        "whh1": u(ks[5], (4 * HIDDEN, HIDDEN), kl),
        "bih1": u(ks[6], (4 * HIDDEN,), kl),
        "bhh1": u(ks[7], (4 * HIDDEN,), kl),
        "w_l1": u(ks[8], (10, HIDDEN), kl),
        "b_l1": u(ks[9], (10,), kl),
        "w_l2": u(ks[10], (1, 10), k2),
        "b_l2": u(ks[11], (1,), k2),
    }


def reference_forward(inputs, p):
    """Pure-JAX reference of the PyTorch forward (unpadded, full-f32 matmuls)."""
    B = inputs.shape[1]
    PH = jax.lax.Precision.HIGHEST

    def mm(a, b):
        return jnp.dot(a, b, precision=PH)

    def cell(x, h, c, wih, whh, bih, bhh):
        g = mm(x, wih.T) + mm(h, whh.T) + bih + bhh
        i = jax.nn.sigmoid(g[:, 0 * HIDDEN:1 * HIDDEN])
        f = jax.nn.sigmoid(g[:, 1 * HIDDEN:2 * HIDDEN])
        gg = jnp.tanh(g[:, 2 * HIDDEN:3 * HIDDEN])
        o = jax.nn.sigmoid(g[:, 3 * HIDDEN:4 * HIDDEN])
        c_new = f * c + i * gg
        return o * jnp.tanh(c_new), c_new

    def step(carry, x_t):
        h0, c0, h1, c1 = carry
        h0, c0 = cell(x_t, h0, c0, p["wih0"], p["whh0"], p["bih0"], p["bhh0"])
        h1, c1 = cell(h0, h1, c1, p["wih1"], p["whh1"], p["bih1"], p["bhh1"])
        return (h0, c0, h1, c1), None

    z = jnp.zeros((B, HIDDEN), jnp.float32)
    (_, _, h1, _), _ = jax.lax.scan(step, (z, z, z, z), inputs)
    y = jnp.maximum(mm(h1, p["w_l1"].T) + p["b_l1"], 0.0)
    return mm(y, p["w_l2"].T) + p["b_l2"]


if __name__ == "__main__":
    key = jax.random.PRNGKey(0)
    k_x, k_p = jax.random.split(key)
    inputs = jax.random.normal(k_x, (SEQ, BATCH, INPUT), jnp.float32)
    params = init_params(k_p)

    out = jax.block_until_ready(binary_classification_forward(inputs, params))
    ref = jax.block_until_ready(reference_forward(inputs, params))

    assert out.shape == (BATCH, 1)
    assert jnp.allclose(out, ref, atol=1e-4, rtol=1e-4), "mismatch vs reference"
    print("KERNEL_OK")
</pallas_src>

<mosaic_0001>
module attributes {stable_mosaic.version = 11 : i64} {
  func.func @lstm_mlp_kernel(%arg0: memref<8x8x128xf32, #tpu.memory_space<vmem>>, %arg1: memref<128x512xf32, #tpu.memory_space<vmem>>, %arg2: memref<128x512xf32, #tpu.memory_space<vmem>>, %arg3: memref<1x512xf32, #tpu.memory_space<vmem>>, %arg4: memref<128x512xf32, #tpu.memory_space<vmem>>, %arg5: memref<128x512xf32, #tpu.memory_space<vmem>>, %arg6: memref<1x512xf32, #tpu.memory_space<vmem>>, %arg7: memref<128x128xf32, #tpu.memory_space<vmem>>, %arg8: memref<1x128xf32, #tpu.memory_space<vmem>>, %arg9: memref<1x128xf32, #tpu.memory_space<vmem>>, %arg10: memref<1x1xf32, #tpu.memory_space<vmem>>, %arg11: memref<8x128xf32, #tpu.memory_space<vmem>>, %arg12: memref<8x8x512xf32, #tpu.memory_space<vmem>>, %arg13: memref<8x8x128xf32, #tpu.memory_space<vmem>>) attributes {dimension_semantics = [], scalar_prefetch = 0 : i64, scratch_operands = 2 : i64, tpu.core_type = #tpu.core_type<tc>} {
    %cst = arith.constant 0.000000e+00 : f32
    %0 = vector.broadcast %cst : f32 to vector<8x128xf32>
    %c0 = arith.constant 0 : index
    %c0_0 = arith.constant 0 : index
    %c0_1 = arith.constant 0 : index
    %1 = vector.load %arg0[%c0, %c0_0, %c0_1] : memref<8x8x128xf32, #tpu.memory_space<vmem>>, vector<8x8x128xf32>
    %2 = vector.shape_cast %1 : vector<8x8x128xf32> to vector<64x128xf32>
    %c0_2 = arith.constant 0 : index
    %c0_3 = arith.constant 0 : index
    %3 = vector.load %arg1[%c0_2, %c0_3] : memref<128x512xf32, #tpu.memory_space<vmem>>, vector<128x512xf32>
    %cst_4 = arith.constant dense<0.000000e+00> : vector<64x512xf32>
    %4 = tpu.matmul %2, %3, %cst_4 {dimension_numbers = #tpu.dot_dimension_numbers<[1], [0], [0], [1], [0, 0, 1, 1], [], []>} : vector<64x128xf32>, vector<128x512xf32>, vector<64x512xf32> -> vector<64x512xf32>
    %c0_5 = arith.constant 0 : index
    %c0_6 = arith.constant 0 : index
    %5 = vector.load %arg3[%c0_5, %c0_6] : memref<1x512xf32, #tpu.memory_space<vmem>>, vector<1x512xf32>
    %6 = vector.broadcast %5 : vector<1x512xf32> to vector<64x512xf32>
    %7 = arith.addf %4, %6 : vector<64x512xf32>
    %8 = vector.shape_cast %7 : vector<64x512xf32> to vector<8x8x512xf32>
    %c0_7 = arith.constant 0 : index
    %c0_8 = arith.constant 0 : index
    %c0_9 = arith.constant 0 : index
    %9 = vector.load %arg12[%c0_7, %c0_8, %c0_9] : memref<8x8x512xf32, #tpu.memory_space<vmem>>, vector<8x8x512xf32>
    tpu.vector_store %arg12[%c0_7, %c0_8, %c0_9], %8 {strides = array<i32>} : memref<8x8x512xf32, #tpu.memory_space<vmem>>, vector<8x8x512xf32>,
    %c0_10 = arith.constant 0 : index
    %c0_11 = arith.constant 0 : index
    %c0_12 = arith.constant 0 : index
    %10 = vector.load %arg12[%c0_10, %c0_11, %c0_12] : memref<8x8x512xf32, #tpu.memory_space<vmem>>, vector<1x8x512xf32>
    %11 = vector.shape_cast %10 : vector<1x8x512xf32> to vector<8x512xf32>
    %c0_13 = arith.constant 0 : index
    %c0_14 = arith.constant 0 : index
    %12 = vector.load %arg2[%c0_13, %c0_14] : memref<128x512xf32, #tpu.memory_space<vmem>>, vector<128x512xf32>
    %cst_15 = arith.constant dense<0.000000e+00> : vector<8x512xf32>
    %13 = tpu.matmul %0, %12, %cst_15 {dimension_numbers = #tpu.dot_dimension_numbers<[1], [0], [0], [1], [0, 0, 1, 1], [], []>} : vector<8x128xf32>, vector<128x512xf32>, vector<8x512xf32> -> vector<8x512xf32>
    %14 = arith.addf %11, %13 : vector<8x512xf32>
    %15 = vector.extract_strided_slice %14 {offsets = [0, 0], sizes = [8, 128], strides = [1, 1]} : vector<8x512xf32> to vector<8x128xf32>
    %cst_16 = arith.constant 5.000000e-01 : f32
    %16 = vector.broadcast %cst_16 : f32 to vector<8x128xf32>
    %17 = arith.mulf %16, %15 : vector<8x128xf32>
    %18 = math.tanh %17 : vector<8x128xf32>
    %cst_17 = arith.constant 5.000000e-01 : f32
    %19 = vector.broadcast %cst_17 : f32 to vector<8x128xf32>
    %20 = arith.mulf %19, %18 : vector<8x128xf32>
    %cst_18 = arith.constant 5.000000e-01 : f32
    %21 = vector.broadcast %cst_18 : f32 to vector<8x128xf32>
    %22 = arith.addf %20, %21 : vector<8x128xf32>
    %23 = vector.extract_strided_slice %14 {offsets = [0, 128], sizes = [8, 128], strides = [1, 1]} : vector<8x512xf32> to vector<8x128xf32>
    %cst_19 = arith.constant 5.000000e-01 : f32
    %24 = vector.broadcast %cst_19 : f32 to vector<8x128xf32>
    %25 = arith.mulf %24, %23 : vector<8x128xf32>
    %26 = math.tanh %25 : vector<8x128xf32>
    %cst_20 = arith.constant 5.000000e-01 : f32
    %27 = vector.broadcast %cst_20 : f32 to vector<8x128xf32>
    %28 = arith.mulf %27, %26 : vector<8x128xf32>
    %cst_21 = arith.constant 5.000000e-01 : f32
    %29 = vector.broadcast %cst_21 : f32 to vector<8x128xf32>
    %30 = arith.addf %28, %29 : vector<8x128xf32>
    %31 = vector.extract_strided_slice %14 {offsets = [0, 256], sizes = [8, 128], strides = [1, 1]} : vector<8x512xf32> to vector<8x128xf32>
    %32 = math.tanh %31 : vector<8x128xf32>
    %33 = vector.extract_strided_slice %14 {offsets = [0, 384], sizes = [8, 128], strides = [1, 1]} : vector<8x512xf32> to vector<8x128xf32>
    %cst_22 = arith.constant 5.000000e-01 : f32
    %34 = vector.broadcast %cst_22 : f32 to vector<8x128xf32>
    %35 = arith.mulf %34, %33 : vector<8x128xf32>
    %36 = math.tanh %35 : vector<8x128xf32>
    %cst_23 = arith.constant 5.000000e-01 : f32
    %37 = vector.broadcast %cst_23 : f32 to vector<8x128xf32>
    %38 = arith.mulf %37, %36 : vector<8x128xf32>
    %cst_24 = arith.constant 5.000000e-01 : f32
    %39 = vector.broadcast %cst_24 : f32 to vector<8x128xf32>
    %40 = arith.addf %38, %39 : vector<8x128xf32>
    %41 = arith.mulf %30, %0 : vector<8x128xf32>
    %42 = arith.mulf %22, %32 : vector<8x128xf32>
    %43 = arith.addf %41, %42 : vector<8x128xf32>
    %44 = math.tanh %43 : vector<8x128xf32>
    %45 = arith.mulf %40, %44 : vector<8x128xf32>
    %c0_25 = arith.constant 0 : index
    %c0_26 = arith.constant 0 : index
    %c0_27 = arith.constant 0 : index
    %46 = vector.load %arg13[%c0_25, %c0_26, %c0_27] : memref<8x8x128xf32, #tpu.memory_space<vmem>>, vector<1x8x128xf32>
    %47 = vector.shape_cast %46 : vector<1x8x128xf32> to vector<8x128xf32>
    %48 = vector.shape_cast %45 : vector<8x128xf32> to vector<1x8x128xf32>
    tpu.vector_store %arg13[%c0_25, %c0_26, %c0_27], %48 {strides = array<i32>} : memref<8x8x128xf32, #tpu.memory_space<vmem>>, vector<1x8x128xf32>,
    %c1 = arith.constant 1 : index
    %c0_28 = arith.constant 0 : index
    %c0_29 = arith.constant 0 : index
    %49 = vector.load %arg12[%c1, %c0_28, %c0_29] : memref<8x8x512xf32, #tpu.memory_space<vmem>>, vector<1x8x512xf32>
    %50 = vector.shape_cast %49 : vector<1x8x512xf32> to vector<8x512xf32>
    %c0_30 = arith.constant 0 : index
    %c0_31 = arith.constant 0 : index
    %51 = vector.load %arg2[%c0_30, %c0_31] : memref<128x512xf32, #tpu.memory_space<vmem>>, vector<128x512xf32>
    %cst_32 = arith.constant dense<0.000000e+00> : vector<8x512xf32>
    %52 = tpu.matmul %45, %51, %cst_32 {dimension_numbers = #tpu.dot_dimension_numbers<[1], [0], [0], [1], [0, 0, 1, 1], [], []>} : vector<8x128xf32>, vector<128x512xf32>, vector<8x512xf32> -> vector<8x512xf32>
    %53 = arith.addf %50, %52 : vector<8x512xf32>
    %54 = vector.extract_strided_slice %53 {offsets = [0, 0], sizes = [8, 128], strides = [1, 1]} : vector<8x512xf32> to vector<8x128xf32>
    %cst_33 = arith.constant 5.000000e-01 : f32
    %55 = vector.broadcast %cst_33 : f32 to vector<8x128xf32>
    %56 = arith.mulf %55, %54 : vector<8x128xf32>
    %57 = math.tanh %56 : vector<8x128xf32>
    %cst_34 = arith.constant 5.000000e-01 : f32
    %58 = vector.broadcast %cst_34 : f32 to vector<8x128xf32>
    %59 = arith.mulf %58, %57 : vector<8x128xf32>
    %cst_35 = arith.constant 5.000000e-01 : f32
    %60 = vector.broadcast %cst_35 : f32 to vector<8x128xf32>
    %61 = arith.addf %59, %60 : vector<8x128xf32>
    %62 = vector.extract_strided_slice %53 {offsets = [0, 128], sizes = [8, 128], strides = [1, 1]} : vector<8x512xf32> to vector<8x128xf32>
    %cst_36 = arith.constant 5.000000e-01 : f32
    %63 = vector.broadcast %cst_36 : f32 to vector<8x128xf32>
    %64 = arith.mulf %63, %62 : vector<8x128xf32>
    %65 = math.tanh %64 : vector<8x128xf32>
    %cst_37 = arith.constant 5.000000e-01 : f32
    %66 = vector.broadcast %cst_37 : f32 to vector<8x128xf32>
    %67 = arith.mulf %66, %65 : vector<8x128xf32>
    %cst_38 = arith.constant 5.000000e-01 : f32
    %68 = vector.broadcast %cst_38 : f32 to vector<8x128xf32>
    %69 = arith.addf %67, %68 : vector<8x128xf32>
    %70 = vector.extract_strided_slice %53 {offsets = [0, 256], sizes = [8, 128], strides = [1, 1]} : vector<8x512xf32> to vector<8x128xf32>
    %71 = math.tanh %70 : vector<8x128xf32>
    %72 = vector.extract_strided_slice %53 {offsets = [0, 384], sizes = [8, 128], strides = [1, 1]} : vector<8x512xf32> to vector<8x128xf32>
    %cst_39 = arith.constant 5.000000e-01 : f32
    %73 = vector.broadcast %cst_39 : f32 to vector<8x128xf32>
    %74 = arith.mulf %73, %72 : vector<8x128xf32>
    %75 = math.tanh %74 : vector<8x128xf32>
    %cst_40 = arith.constant 5.000000e-01 : f32
    %76 = vector.broadcast %cst_40 : f32 to vector<8x128xf32>
    %77 = arith.mulf %76, %75 : vector<8x128xf32>
    %cst_41 = arith.constant 5.000000e-01 : f32
    %78 = vector.broadcast %cst_41 : f32 to vector<8x128xf32>
    %79 = arith.addf %77, %78 : vector<8x128xf32>
    %80 = arith.mulf %69, %43 : vector<8x128xf32>
    %81 = arith.mulf %61, %71 : vector<8x128xf32>
    %82 = arith.addf %80, %81 : vector<8x128xf32>
    %83 = math.tanh %82 : vector<8x128xf32>
    %84 = arith.mulf %79, %83 : vector<8x128xf32>
    %c1_42 = arith.constant 1 : index
    %c0_43 = arith.constant 0 : index
    %c0_44 = arith.constant 0 : index
    %85 = vector.load %arg13[%c1_42, %c0_43, %c0_44] : memref<8x8x128xf32, #tpu.memory_space<vmem>>, vector<1x8x128xf32>
    %86 = vector.shape_cast %85 : vector<1x8x128xf32> to vector<8x128xf32>
    %87 = vector.shape_cast %84 : vector<8x128xf32> to vector<1x8x128xf32>
    tpu.vector_store %arg13[%c1_42, %c0_43, %c0_44], %87 {strides = array<i32>} : memref<8x8x128xf32, #tpu.memory_space<vmem>>, vector<1x8x128xf32>,
    %c2 = arith.constant 2 : index
    %c0_45 = arith.constant 0 : index
    %c0_46 = arith.constant 0 : index
    %88 = vector.load %arg12[%c2, %c0_45, %c0_46] : memref<8x8x512xf32, #tpu.memory_space<vmem>>, vector<1x8x512xf32>
    %89 = vector.shape_cast %88 : vector<1x8x512xf32> to vector<8x512xf32>
    %c0_47 = arith.constant 0 : index
    %c0_48 = arith.constant 0 : index
    %90 = vector.load %arg2[%c0_47, %c0_48] : memref<128x512xf32, #tpu.memory_space<vmem>>, vector<128x512xf32>
    %cst_49 = arith.constant dense<0.000000e+00> : vector<8x512xf32>
    %91 = tpu.matmul %84, %90, %cst_49 {dimension_numbers = #tpu.dot_dimension_numbers<[1], [0], [0], [1], [0, 0, 1, 1], [], []>} : vector<8x128xf32>, vector<128x512xf32>, vector<8x512xf32> -> vector<8x512xf32>
    %92 = arith.addf %89, %91 : vector<8x512xf32>
    %93 = vector.extract_strided_slice %92 {offsets = [0, 0], sizes = [8, 128], strides = [1, 1]} : vector<8x512xf32> to vector<8x128xf32>
    %cst_50 = arith.constant 5.000000e-01 : f32
    %94 = vector.broadcast %cst_50 : f32 to vector<8x128xf32>
    %95 = arith.mulf %94, %93 : vector<8x128xf32>
    %96 = math.tanh %95 : vector<8x128xf32>
    %cst_51 = arith.constant 5.000000e-01 : f32
    %97 = vector.broadcast %cst_51 : f32 to vector<8x128xf32>
    %98 = arith.mulf %97, %96 : vector<8x128xf32>
    %cst_52 = arith.constant 5.000000e-01 : f32
    %99 = vector.broadcast %cst_52 : f32 to vector<8x128xf32>
    %100 = arith.addf %98, %99 : vector<8x128xf32>
    %101 = vector.extract_strided_slice %92 {offsets = [0, 128], sizes = [8, 128], strides = [1, 1]} : vector<8x512xf32> to vector<8x128xf32>
    %cst_53 = arith.constant 5.000000e-01 : f32
    %102 = vector.broadcast %cst_53 : f32 to vector<8x128xf32>
    %103 = arith.mulf %102, %101 : vector<8x128xf32>
    %104 = math.tanh %103 : vector<8x128xf32>
    %cst_54 = arith.constant 5.000000e-01 : f32
    %105 = vector.broadcast %cst_54 : f32 to vector<8x128xf32>
    %106 = arith.mulf %105, %104 : vector<8x128xf32>
    %cst_55 = arith.constant 5.000000e-01 : f32
    %107 = vector.broadcast %cst_55 : f32 to vector<8x128xf32>
    %108 = arith.addf %106, %107 : vector<8x128xf32>
    %109 = vector.extract_strided_slice %92 {offsets = [0, 256], sizes = [8, 128], strides = [1, 1]} : vector<8x512xf32> to vector<8x128xf32>
    %110 = math.tanh %109 : vector<8x128xf32>
    %111 = vector.extract_strided_slice %92 {offsets = [0, 384], sizes = [8, 128], strides = [1, 1]} : vector<8x512xf32> to vector<8x128xf32>
    %cst_56 = arith.constant 5.000000e-01 : f32
    %112 = vector.broadcast %cst_56 : f32 to vector<8x128xf32>
    %113 = arith.mulf %112, %111 : vector<8x128xf32>
    %114 = math.tanh %113 : vector<8x128xf32>
    %cst_57 = arith.constant 5.000000e-01 : f32
    %115 = vector.broadcast %cst_57 : f32 to vector<8x128xf32>
    %116 = arith.mulf %115, %114 : vector<8x128xf32>
    %cst_58 = arith.constant 5.000000e-01 : f32
    %117 = vector.broadcast %cst_58 : f32 to vector<8x128xf32>
    %118 = arith.addf %116, %117 : vector<8x128xf32>
    %119 = arith.mulf %108, %82 : vector<8x128xf32>
    %120 = arith.mulf %100, %110 : vector<8x128xf32>
    %121 = arith.addf %119, %120 : vector<8x128xf32>
    %122 = math.tanh %121 : vector<8x128xf32>
    %123 = arith.mulf %118, %122 : vector<8x128xf32>
    %c2_59 = arith.constant 2 : index
    %c0_60 = arith.constant 0 : index
    %c0_61 = arith.constant 0 : index
    %124 = vector.load %arg13[%c2_59, %c0_60, %c0_61] : memref<8x8x128xf32, #tpu.memory_space<vmem>>, vector<1x8x128xf32>
    %125 = vector.shape_cast %124 : vector<1x8x128xf32> to vector<8x128xf32>
    %126 = vector.shape_cast %123 : vector<8x128xf32> to vector<1x8x128xf32>
    tpu.vector_store %arg13[%c2_59, %c0_60, %c0_61], %126 {strides = array<i32>} : memref<8x8x128xf32, #tpu.memory_space<vmem>>, vector<1x8x128xf32>,
    %c3 = arith.constant 3 : index
    %c0_62 = arith.constant 0 : index
    %c0_63 = arith.constant 0 : index
    %127 = vector.load %arg12[%c3, %c0_62, %c0_63] : memref<8x8x512xf32, #tpu.memory_space<vmem>>, vector<1x8x512xf32>
    %128 = vector.shape_cast %127 : vector<1x8x512xf32> to vector<8x512xf32>
    %c0_64 = arith.constant 0 : index
    %c0_65 = arith.constant 0 : index
    %129 = vector.load %arg2[%c0_64, %c0_65] : memref<128x512xf32, #tpu.memory_space<vmem>>, vector<128x512xf32>
    %cst_66 = arith.constant dense<0.000000e+00> : vector<8x512xf32>
    %130 = tpu.matmul %123, %129, %cst_66 {dimension_numbers = #tpu.dot_dimension_numbers<[1], [0], [0], [1], [0, 0, 1, 1], [], []>} : vector<8x128xf32>, vector<128x512xf32>, vector<8x512xf32> -> vector<8x512xf32>
    %131 = arith.addf %128, %130 : vector<8x512xf32>
    %132 = vector.extract_strided_slice %131 {offsets = [0, 0], sizes = [8, 128], strides = [1, 1]} : vector<8x512xf32> to vector<8x128xf32>
    %cst_67 = arith.constant 5.000000e-01 : f32
    %133 = vector.broadcast %cst_67 : f32 to vector<8x128xf32>
    %134 = arith.mulf %133, %132 : vector<8x128xf32>
    %135 = math.tanh %134 : vector<8x128xf32>
    %cst_68 = arith.constant 5.000000e-01 : f32
    %136 = vector.broadcast %cst_68 : f32 to vector<8x128xf32>
    %137 = arith.mulf %136, %135 : vector<8x128xf32>
    %cst_69 = arith.constant 5.000000e-01 : f32
    %138 = vector.broadcast %cst_69 : f32 to vector<8x128xf32>
    %139 = arith.addf %137, %138 : vector<8x128xf32>
    %140 = vector.extract_strided_slice %131 {offsets = [0, 128], sizes = [8, 128], strides = [1, 1]} : vector<8x512xf32> to vector<8x128xf32>
    %cst_70 = arith.constant 5.000000e-01 : f32
    %141 = vector.broadcast %cst_70 : f32 to vector<8x128xf32>
    %142 = arith.mulf %141, %140 : vector<8x128xf32>
    %143 = math.tanh %142 : vector<8x128xf32>
    %cst_71 = arith.constant 5.000000e-01 : f32
    %144 = vector.broadcast %cst_71 : f32 to vector<8x128xf32>
    %145 = arith.mulf %144, %143 : vector<8x128xf32>
    %cst_72 = arith.constant 5.000000e-01 : f32
    %146 = vector.broadcast %cst_72 : f32 to vector<8x128xf32>
    %147 = arith.addf %145, %146 : vector<8x128xf32>
    %148 = vector.extract_strided_slice %131 {offsets = [0, 256], sizes = [8, 128], strides = [1, 1]} : vector<8x512xf32> to vector<8x128xf32>
    %149 = math.tanh %148 : vector<8x128xf32>
    %150 = vector.extract_strided_slice %131 {offsets = [0, 384], sizes = [8, 128], strides = [1, 1]} : vector<8x512xf32> to vector<8x128xf32>
    %cst_73 = arith.constant 5.000000e-01 : f32
    %151 = vector.broadcast %cst_73 : f32 to vector<8x128xf32>
    %152 = arith.mulf %151, %150 : vector<8x128xf32>
    %153 = math.tanh %152 : vector<8x128xf32>
    %cst_74 = arith.constant 5.000000e-01 : f32
    %154 = vector.broadcast %cst_74 : f32 to vector<8x128xf32>
    %155 = arith.mulf %154, %153 : vector<8x128xf32>
    %cst_75 = arith.constant 5.000000e-01 : f32
    %156 = vector.broadcast %cst_75 : f32 to vector<8x128xf32>
    %157 = arith.addf %155, %156 : vector<8x128xf32>
    %158 = arith.mulf %147, %121 : vector<8x128xf32>
    %159 = arith.mulf %139, %149 : vector<8x128xf32>
    %160 = arith.addf %158, %159 : vector<8x128xf32>
    %161 = math.tanh %160 : vector<8x128xf32>
    %162 = arith.mulf %157, %161 : vector<8x128xf32>
    %c3_76 = arith.constant 3 : index
    %c0_77 = arith.constant 0 : index
    %c0_78 = arith.constant 0 : index
    %163 = vector.load %arg13[%c3_76, %c0_77, %c0_78] : memref<8x8x128xf32, #tpu.memory_space<vmem>>, vector<1x8x128xf32>
    %164 = vector.shape_cast %163 : vector<1x8x128xf32> to vector<8x128xf32>
    %165 = vector.shape_cast %162 : vector<8x128xf32> to vector<1x8x128xf32>
    tpu.vector_store %arg13[%c3_76, %c0_77, %c0_78], %165 {strides = array<i32>} : memref<8x8x128xf32, #tpu.memory_space<vmem>>, vector<1x8x128xf32>,
    %c4 = arith.constant 4 : index
    %c0_79 = arith.constant 0 : index
    %c0_80 = arith.constant 0 : index
    %166 = vector.load %arg12[%c4, %c0_79, %c0_80] : memref<8x8x512xf32, #tpu.memory_space<vmem>>, vector<1x8x512xf32>
    %167 = vector.shape_cast %166 : vector<1x8x512xf32> to vector<8x512xf32>
    %c0_81 = arith.constant 0 : index
    %c0_82 = arith.constant 0 : index
    %168 = vector.load %arg2[%c0_81, %c0_82] : memref<128x512xf32, #tpu.memory_space<vmem>>, vector<128x512xf32>
    %cst_83 = arith.constant dense<0.000000e+00> : vector<8x512xf32>
    %169 = tpu.matmul %162, %168, %cst_83 {dimension_numbers = #tpu.dot_dimension_numbers<[1], [0], [0], [1], [0, 0, 1, 1], [], []>} : vector<8x128xf32>, vector<128x512xf32>, vector<8x512xf32> -> vector<8x512xf32>
    %170 = arith.addf %167, %169 : vector<8x512xf32>
    %171 = vector.extract_strided_slice %170 {offsets = [0, 0], sizes = [8, 128], strides = [1, 1]} : vector<8x512xf32> to vector<8x128xf32>
    %cst_84 = arith.constant 5.000000e-01 : f32
    %172 = vector.broadcast %cst_84 : f32 to vector<8x128xf32>
    %173 = arith.mulf %172, %171 : vector<8x128xf32>
    %174 = math.tanh %173 : vector<8x128xf32>
    %cst_85 = arith.constant 5.000000e-01 : f32
    %175 = vector.broadcast %cst_85 : f32 to vector<8x128xf32>
    %176 = arith.mulf %175, %174 : vector<8x128xf32>
    %cst_86 = arith.constant 5.000000e-01 : f32
    %177 = vector.broadcast %cst_86 : f32 to vector<8x128xf32>
    %178 = arith.addf %176, %177 : vector<8x128xf32>
    %179 = vector.extract_strided_slice %170 {offsets = [0, 128], sizes = [8, 128], strides = [1, 1]} : vector<8x512xf32> to vector<8x128xf32>
    %cst_87 = arith.constant 5.000000e-01 : f32
    %180 = vector.broadcast %cst_87 : f32 to vector<8x128xf32>
    %181 = arith.mulf %180, %179 : vector<8x128xf32>
    %182 = math.tanh %181 : vector<8x128xf32>
    %cst_88 = arith.constant 5.000000e-01 : f32
    %183 = vector.broadcast %cst_88 : f32 to vector<8x128xf32>
    %184 = arith.mulf %183, %182 : vector<8x128xf32>
    %cst_89 = arith.constant 5.000000e-01 : f32
    %185 = vector.broadcast %cst_89 : f32 to vector<8x128xf32>
    %186 = arith.addf %184, %185 : vector<8x128xf32>
    %187 = vector.extract_strided_slice %170 {offsets = [0, 256], sizes = [8, 128], strides = [1, 1]} : vector<8x512xf32> to vector<8x128xf32>
    %188 = math.tanh %187 : vector<8x128xf32>
    %189 = vector.extract_strided_slice %170 {offsets = [0, 384], sizes = [8, 128], strides = [1, 1]} : vector<8x512xf32> to vector<8x128xf32>
    %cst_90 = arith.constant 5.000000e-01 : f32
    %190 = vector.broadcast %cst_90 : f32 to vector<8x128xf32>
    %191 = arith.mulf %190, %189 : vector<8x128xf32>
    %192 = math.tanh %191 : vector<8x128xf32>
    %cst_91 = arith.constant 5.000000e-01 : f32
    %193 = vector.broadcast %cst_91 : f32 to vector<8x128xf32>
    %194 = arith.mulf %193, %192 : vector<8x128xf32>
    %cst_92 = arith.constant 5.000000e-01 : f32
    %195 = vector.broadcast %cst_92 : f32 to vector<8x128xf32>
    %196 = arith.addf %194, %195 : vector<8x128xf32>
    %197 = arith.mulf %186, %160 : vector<8x128xf32>
    %198 = arith.mulf %178, %188 : vector<8x128xf32>
    %199 = arith.addf %197, %198 : vector<8x128xf32>
    %200 = math.tanh %199 : vector<8x128xf32>
    %201 = arith.mulf %196, %200 : vector<8x128xf32>
    %c4_93 = arith.constant 4 : index
    %c0_94 = arith.constant 0 : index
    %c0_95 = arith.constant 0 : index
    %202 = vector.load %arg13[%c4_93, %c0_94, %c0_95] : memref<8x8x128xf32, #tpu.memory_space<vmem>>, vector<1x8x128xf32>
    %203 = vector.shape_cast %202 : vector<1x8x128xf32> to vector<8x128xf32>
    %204 = vector.shape_cast %201 : vector<8x128xf32> to vector<1x8x128xf32>
    tpu.vector_store %arg13[%c4_93, %c0_94, %c0_95], %204 {strides = array<i32>} : memref<8x8x128xf32, #tpu.memory_space<vmem>>, vector<1x8x128xf32>,
    %c5 = arith.constant 5 : index
    %c0_96 = arith.constant 0 : index
    %c0_97 = arith.constant 0 : index
    %205 = vector.load %arg12[%c5, %c0_96, %c0_97] : memref<8x8x512xf32, #tpu.memory_space<vmem>>, vector<1x8x512xf32>
    %206 = vector.shape_cast %205 : vector<1x8x512xf32> to vector<8x512xf32>
    %c0_98 = arith.constant 0 : index
    %c0_99 = arith.constant 0 : index
    %207 = vector.load %arg2[%c0_98, %c0_99] : memref<128x512xf32, #tpu.memory_space<vmem>>, vector<128x512xf32>
    %cst_100 = arith.constant dense<0.000000e+00> : vector<8x512xf32>
    %208 = tpu.matmul %201, %207, %cst_100 {dimension_numbers = #tpu.dot_dimension_numbers<[1], [0], [0], [1], [0, 0, 1, 1], [], []>} : vector<8x128xf32>, vector<128x512xf32>, vector<8x512xf32> -> vector<8x512xf32>
    %209 = arith.addf %206, %208 : vector<8x512xf32>
    %210 = vector.extract_strided_slice %209 {offsets = [0, 0], sizes = [8, 128], strides = [1, 1]} : vector<8x512xf32> to vector<8x128xf32>
    %cst_101 = arith.constant 5.000000e-01 : f32
    %211 = vector.broadcast %cst_101 : f32 to vector<8x128xf32>
    %212 = arith.mulf %211, %210 : vector<8x128xf32>
    %213 = math.tanh %212 : vector<8x128xf32>
    %cst_102 = arith.constant 5.000000e-01 : f32
    %214 = vector.broadcast %cst_102 : f32 to vector<8x128xf32>
    %215 = arith.mulf %214, %213 : vector<8x128xf32>
    %cst_103 = arith.constant 5.000000e-01 : f32
    %216 = vector.broadcast %cst_103 : f32 to vector<8x128xf32>
    %217 = arith.addf %215, %216 : vector<8x128xf32>
    %218 = vector.extract_strided_slice %209 {offsets = [0, 128], sizes = [8, 128], strides = [1, 1]} : vector<8x512xf32> to vector<8x128xf32>
    %cst_104 = arith.constant 5.000000e-01 : f32
    %219 = vector.broadcast %cst_104 : f32 to vector<8x128xf32>
    %220 = arith.mulf %219, %218 : vector<8x128xf32>
    %221 = math.tanh %220 : vector<8x128xf32>
    %cst_105 = arith.constant 5.000000e-01 : f32
    %222 = vector.broadcast %cst_105 : f32 to vector<8x128xf32>
    %223 = arith.mulf %222, %221 : vector<8x128xf32>
    %cst_106 = arith.constant 5.000000e-01 : f32
    %224 = vector.broadcast %cst_106 : f32 to vector<8x128xf32>
    %225 = arith.addf %223, %224 : vector<8x128xf32>
    %226 = vector.extract_strided_slice %209 {offsets = [0, 256], sizes = [8, 128], strides = [1, 1]} : vector<8x512xf32> to vector<8x128xf32>
    %227 = math.tanh %226 : vector<8x128xf32>
    %228 = vector.extract_strided_slice %209 {offsets = [0, 384], sizes = [8, 128], strides = [1, 1]} : vector<8x512xf32> to vector<8x128xf32>
    %cst_107 = arith.constant 5.000000e-01 : f32
    %229 = vector.broadcast %cst_107 : f32 to vector<8x128xf32>
    %230 = arith.mulf %229, %228 : vector<8x128xf32>
    %231 = math.tanh %230 : vector<8x128xf32>
    %cst_108 = arith.constant 5.000000e-01 : f32
    %232 = vector.broadcast %cst_108 : f32 to vector<8x128xf32>
    %233 = arith.mulf %232, %231 : vector<8x128xf32>
    %cst_109 = arith.constant 5.000000e-01 : f32
    %234 = vector.broadcast %cst_109 : f32 to vector<8x128xf32>
    %235 = arith.addf %233, %234 : vector<8x128xf32>
    %236 = arith.mulf %225, %199 : vector<8x128xf32>
    %237 = arith.mulf %217, %227 : vector<8x128xf32>
    %238 = arith.addf %236, %237 : vector<8x128xf32>
    %239 = math.tanh %238 : vector<8x128xf32>
    %240 = arith.mulf %235, %239 : vector<8x128xf32>
    %c5_110 = arith.constant 5 : index
    %c0_111 = arith.constant 0 : index
    %c0_112 = arith.constant 0 : index
    %241 = vector.load %arg13[%c5_110, %c0_111, %c0_112] : memref<8x8x128xf32, #tpu.memory_space<vmem>>, vector<1x8x128xf32>
    %242 = vector.shape_cast %241 : vector<1x8x128xf32> to vector<8x128xf32>
    %243 = vector.shape_cast %240 : vector<8x128xf32> to vector<1x8x128xf32>
    tpu.vector_store %arg13[%c5_110, %c0_111, %c0_112], %243 {strides = array<i32>} : memref<8x8x128xf32, #tpu.memory_space<vmem>>, vector<1x8x128xf32>,
    %c6 = arith.constant 6 : index
    %c0_113 = arith.constant 0 : index
    %c0_114 = arith.constant 0 : index
    %244 = vector.load %arg12[%c6, %c0_113, %c0_114] : memref<8x8x512xf32, #tpu.memory_space<vmem>>, vector<1x8x512xf32>
    %245 = vector.shape_cast %244 : vector<1x8x512xf32> to vector<8x512xf32>
    %c0_115 = arith.constant 0 : index
    %c0_116 = arith.constant 0 : index
    %246 = vector.load %arg2[%c0_115, %c0_116] : memref<128x512xf32, #tpu.memory_space<vmem>>, vector<128x512xf32>
    %cst_117 = arith.constant dense<0.000000e+00> : vector<8x512xf32>
    %247 = tpu.matmul %240, %246, %cst_117 {dimension_numbers = #tpu.dot_dimension_numbers<[1], [0], [0], [1], [0, 0, 1, 1], [], []>} : vector<8x128xf32>, vector<128x512xf32>, vector<8x512xf32> -> vector<8x512xf32>
    %248 = arith.addf %245, %247 : vector<8x512xf32>
    %249 = vector.extract_strided_slice %248 {offsets = [0, 0], sizes = [8, 128], strides = [1, 1]} : vector<8x512xf32> to vector<8x128xf32>
    %cst_118 = arith.constant 5.000000e-01 : f32
    %250 = vector.broadcast %cst_118 : f32 to vector<8x128xf32>
    %251 = arith.mulf %250, %249 : vector<8x128xf32>
    %252 = math.tanh %251 : vector<8x128xf32>
    %cst_119 = arith.constant 5.000000e-01 : f32
    %253 = vector.broadcast %cst_119 : f32 to vector<8x128xf32>
    %254 = arith.mulf %253, %252 : vector<8x128xf32>
    %cst_120 = arith.constant 5.000000e-01 : f32
    %255 = vector.broadcast %cst_120 : f32 to vector<8x128xf32>
    %256 = arith.addf %254, %255 : vector<8x128xf32>
    %257 = vector.extract_strided_slice %248 {offsets = [0, 128], sizes = [8, 128], strides = [1, 1]} : vector<8x512xf32> to vector<8x128xf32>
    %cst_121 = arith.constant 5.000000e-01 : f32
    %258 = vector.broadcast %cst_121 : f32 to vector<8x128xf32>
    %259 = arith.mulf %258, %257 : vector<8x128xf32>
    %260 = math.tanh %259 : vector<8x128xf32>
    %cst_122 = arith.constant 5.000000e-01 : f32
    %261 = vector.broadcast %cst_122 : f32 to vector<8x128xf32>
    %262 = arith.mulf %261, %260 : vector<8x128xf32>
    %cst_123 = arith.constant 5.000000e-01 : f32
    %263 = vector.broadcast %cst_123 : f32 to vector<8x128xf32>
    %264 = arith.addf %262, %263 : vector<8x128xf32>
    %265 = vector.extract_strided_slice %248 {offsets = [0, 256], sizes = [8, 128], strides = [1, 1]} : vector<8x512xf32> to vector<8x128xf32>
    %266 = math.tanh %265 : vector<8x128xf32>
    %267 = vector.extract_strided_slice %248 {offsets = [0, 384], sizes = [8, 128], strides = [1, 1]} : vector<8x512xf32> to vector<8x128xf32>
    %cst_124 = arith.constant 5.000000e-01 : f32
    %268 = vector.broadcast %cst_124 : f32 to vector<8x128xf32>
    %269 = arith.mulf %268, %267 : vector<8x128xf32>
    %270 = math.tanh %269 : vector<8x128xf32>
    %cst_125 = arith.constant 5.000000e-01 : f32
    %271 = vector.broadcast %cst_125 : f32 to vector<8x128xf32>
    %272 = arith.mulf %271, %270 : vector<8x128xf32>
    %cst_126 = arith.constant 5.000000e-01 : f32
    %273 = vector.broadcast %cst_126 : f32 to vector<8x128xf32>
    %274 = arith.addf %272, %273 : vector<8x128xf32>
    %275 = arith.mulf %264, %238 : vector<8x128xf32>
    %276 = arith.mulf %256, %266 : vector<8x128xf32>
    %277 = arith.addf %275, %276 : vector<8x128xf32>
    %278 = math.tanh %277 : vector<8x128xf32>
    %279 = arith.mulf %274, %278 : vector<8x128xf32>
    %c6_127 = arith.constant 6 : index
    %c0_128 = arith.constant 0 : index
    %c0_129 = arith.constant 0 : index
    %280 = vector.load %arg13[%c6_127, %c0_128, %c0_129] : memref<8x8x128xf32, #tpu.memory_space<vmem>>, vector<1x8x128xf32>
    %281 = vector.shape_cast %280 : vector<1x8x128xf32> to vector<8x128xf32>
    %282 = vector.shape_cast %279 : vector<8x128xf32> to vector<1x8x128xf32>
    tpu.vector_store %arg13[%c6_127, %c0_128, %c0_129], %282 {strides = array<i32>} : memref<8x8x128xf32, #tpu.memory_space<vmem>>, vector<1x8x128xf32>,
    %c7 = arith.constant 7 : index
    %c0_130 = arith.constant 0 : index
    %c0_131 = arith.constant 0 : index
    %283 = vector.load %arg12[%c7, %c0_130, %c0_131] : memref<8x8x512xf32, #tpu.memory_space<vmem>>, vector<1x8x512xf32>
    %284 = vector.shape_cast %283 : vector<1x8x512xf32> to vector<8x512xf32>
    %c0_132 = arith.constant 0 : index
    %c0_133 = arith.constant 0 : index
    %285 = vector.load %arg2[%c0_132, %c0_133] : memref<128x512xf32, #tpu.memory_space<vmem>>, vector<128x512xf32>
    %cst_134 = arith.constant dense<0.000000e+00> : vector<8x512xf32>
    %286 = tpu.matmul %279, %285, %cst_134 {dimension_numbers = #tpu.dot_dimension_numbers<[1], [0], [0], [1], [0, 0, 1, 1], [], []>} : vector<8x128xf32>, vector<128x512xf32>, vector<8x512xf32> -> vector<8x512xf32>
    %287 = arith.addf %284, %286 : vector<8x512xf32>
    %288 = vector.extract_strided_slice %287 {offsets = [0, 0], sizes = [8, 128], strides = [1, 1]} : vector<8x512xf32> to vector<8x128xf32>
    %cst_135 = arith.constant 5.000000e-01 : f32
    %289 = vector.broadcast %cst_135 : f32 to vector<8x128xf32>
    %290 = arith.mulf %289, %288 : vector<8x128xf32>
    %291 = math.tanh %290 : vector<8x128xf32>
    %cst_136 = arith.constant 5.000000e-01 : f32
    %292 = vector.broadcast %cst_136 : f32 to vector<8x128xf32>
    %293 = arith.mulf %292, %291 : vector<8x128xf32>
    %cst_137 = arith.constant 5.000000e-01 : f32
    %294 = vector.broadcast %cst_137 : f32 to vector<8x128xf32>
    %295 = arith.addf %293, %294 : vector<8x128xf32>
    %296 = vector.extract_strided_slice %287 {offsets = [0, 128], sizes = [8, 128], strides = [1, 1]} : vector<8x512xf32> to vector<8x128xf32>
    %cst_138 = arith.constant 5.000000e-01 : f32
    %297 = vector.broadcast %cst_138 : f32 to vector<8x128xf32>
    %298 = arith.mulf %297, %296 : vector<8x128xf32>
    %299 = math.tanh %298 : vector<8x128xf32>
    %cst_139 = arith.constant 5.000000e-01 : f32
    %300 = vector.broadcast %cst_139 : f32 to vector<8x128xf32>
    %301 = arith.mulf %300, %299 : vector<8x128xf32>
    %cst_140 = arith.constant 5.000000e-01 : f32
    %302 = vector.broadcast %cst_140 : f32 to vector<8x128xf32>
    %303 = arith.addf %301, %302 : vector<8x128xf32>
    %304 = vector.extract_strided_slice %287 {offsets = [0, 256], sizes = [8, 128], strides = [1, 1]} : vector<8x512xf32> to vector<8x128xf32>
    %305 = math.tanh %304 : vector<8x128xf32>
    %306 = vector.extract_strided_slice %287 {offsets = [0, 384], sizes = [8, 128], strides = [1, 1]} : vector<8x512xf32> to vector<8x128xf32>
    %cst_141 = arith.constant 5.000000e-01 : f32
    %307 = vector.broadcast %cst_141 : f32 to vector<8x128xf32>
    %308 = arith.mulf %307, %306 : vector<8x128xf32>
    %309 = math.tanh %308 : vector<8x128xf32>
    %cst_142 = arith.constant 5.000000e-01 : f32
    %310 = vector.broadcast %cst_142 : f32 to vector<8x128xf32>
    %311 = arith.mulf %310, %309 : vector<8x128xf32>
    %cst_143 = arith.constant 5.000000e-01 : f32
    %312 = vector.broadcast %cst_143 : f32 to vector<8x128xf32>
    %313 = arith.addf %311, %312 : vector<8x128xf32>
    %314 = arith.mulf %303, %277 : vector<8x128xf32>
    %315 = arith.mulf %295, %305 : vector<8x128xf32>
    %316 = arith.addf %314, %315 : vector<8x128xf32>
    %317 = math.tanh %316 : vector<8x128xf32>
    %318 = arith.mulf %313, %317 : vector<8x128xf32>
    %c7_144 = arith.constant 7 : index
    %c0_145 = arith.constant 0 : index
    %c0_146 = arith.constant 0 : index
    %319 = vector.load %arg13[%c7_144, %c0_145, %c0_146] : memref<8x8x128xf32, #tpu.memory_space<vmem>>, vector<1x8x128xf32>
    %320 = vector.shape_cast %319 : vector<1x8x128xf32> to vector<8x128xf32>
    %321 = vector.shape_cast %318 : vector<8x128xf32> to vector<1x8x128xf32>
    tpu.vector_store %arg13[%c7_144, %c0_145, %c0_146], %321 {strides = array<i32>} : memref<8x8x128xf32, #tpu.memory_space<vmem>>, vector<1x8x128xf32>,
    %c0_147 = arith.constant 0 : index
    %c0_148 = arith.constant 0 : index
    %c0_149 = arith.constant 0 : index
    %322 = vector.load %arg13[%c0_147, %c0_148, %c0_149] : memref<8x8x128xf32, #tpu.memory_space<vmem>>, vector<8x8x128xf32>
    %323 = vector.shape_cast %322 : vector<8x8x128xf32> to vector<64x128xf32>
    %c0_150 = arith.constant 0 : index
    %c0_151 = arith.constant 0 : index
    %324 = vector.load %arg4[%c0_150, %c0_151] : memref<128x512xf32, #tpu.memory_space<vmem>>, vector<128x512xf32>
    %cst_152 = arith.constant dense<0.000000e+00> : vector<64x512xf32>
    %325 = tpu.matmul %323, %324, %cst_152 {dimension_numbers = #tpu.dot_dimension_numbers<[1], [0], [0], [1], [0, 0, 1, 1], [], []>} : vector<64x128xf32>, vector<128x512xf32>, vector<64x512xf32> -> vector<64x512xf32>
    %c0_153 = arith.constant 0 : index
    %c0_154 = arith.constant 0 : index
    %326 = vector.load %arg6[%c0_153, %c0_154] : memref<1x512xf32, #tpu.memory_space<vmem>>, vector<1x512xf32>
    %327 = vector.broadcast %326 : vector<1x512xf32> to vector<64x512xf32>
    %328 = arith.addf %325, %327 : vector<64x512xf32>
    %329 = vector.shape_cast %328 : vector<64x512xf32> to vector<8x8x512xf32>
    %c0_155 = arith.constant 0 : index
    %c0_156 = arith.constant 0 : index
    %c0_157 = arith.constant 0 : index
    %330 = vector.load %arg12[%c0_155, %c0_156, %c0_157] : memref<8x8x512xf32, #tpu.memory_space<vmem>>, vector<8x8x512xf32>
    tpu.vector_store %arg12[%c0_155, %c0_156, %c0_157], %329 {strides = array<i32>} : memref<8x8x512xf32, #tpu.memory_space<vmem>>, vector<8x8x512xf32>,
    %c0_158 = arith.constant 0 : index
    %c0_159 = arith.constant 0 : index
    %c0_160 = arith.constant 0 : index
    %331 = vector.load %arg12[%c0_158, %c0_159, %c0_160] : memref<8x8x512xf32, #tpu.memory_space<vmem>>, vector<1x8x512xf32>
    %332 = vector.shape_cast %331 : vector<1x8x512xf32> to vector<8x512xf32>
    %c0_161 = arith.constant 0 : index
    %c0_162 = arith.constant 0 : index
    %333 = vector.load %arg5[%c0_161, %c0_162] : memref<128x512xf32, #tpu.memory_space<vmem>>, vector<128x512xf32>
    %cst_163 = arith.constant dense<0.000000e+00> : vector<8x512xf32>
    %334 = tpu.matmul %0, %333, %cst_163 {dimension_numbers = #tpu.dot_dimension_numbers<[1], [0], [0], [1], [0, 0, 1, 1], [], []>} : vector<8x128xf32>, vector<128x512xf32>, vector<8x512xf32> -> vector<8x512xf32>
    %335 = arith.addf %332, %334 : vector<8x512xf32>
    %336 = vector.extract_strided_slice %335 {offsets = [0, 0], sizes = [8, 128], strides = [1, 1]} : vector<8x512xf32> to vector<8x128xf32>
    %cst_164 = arith.constant 5.000000e-01 : f32
    %337 = vector.broadcast %cst_164 : f32 to vector<8x128xf32>
    %338 = arith.mulf %337, %336 : vector<8x128xf32>
    %339 = math.tanh %338 : vector<8x128xf32>
    %cst_165 = arith.constant 5.000000e-01 : f32
    %340 = vector.broadcast %cst_165 : f32 to vector<8x128xf32>
    %341 = arith.mulf %340, %339 : vector<8x128xf32>
    %cst_166 = arith.constant 5.000000e-01 : f32
    %342 = vector.broadcast %cst_166 : f32 to vector<8x128xf32>
    %343 = arith.addf %341, %342 : vector<8x128xf32>
    %344 = vector.extract_strided_slice %335 {offsets = [0, 128], sizes = [8, 128], strides = [1, 1]} : vector<8x512xf32> to vector<8x128xf32>
    %cst_167 = arith.constant 5.000000e-01 : f32
    %345 = vector.broadcast %cst_167 : f32 to vector<8x128xf32>
    %346 = arith.mulf %345, %344 : vector<8x128xf32>
    %347 = math.tanh %346 : vector<8x128xf32>
    %cst_168 = arith.constant 5.000000e-01 : f32
    %348 = vector.broadcast %cst_168 : f32 to vector<8x128xf32>
    %349 = arith.mulf %348, %347 : vector<8x128xf32>
    %cst_169 = arith.constant 5.000000e-01 : f32
    %350 = vector.broadcast %cst_169 : f32 to vector<8x128xf32>
    %351 = arith.addf %349, %350 : vector<8x128xf32>
    %352 = vector.extract_strided_slice %335 {offsets = [0, 256], sizes = [8, 128], strides = [1, 1]} : vector<8x512xf32> to vector<8x128xf32>
    %353 = math.tanh %352 : vector<8x128xf32>
    %354 = vector.extract_strided_slice %335 {offsets = [0, 384], sizes = [8, 128], strides = [1, 1]} : vector<8x512xf32> to vector<8x128xf32>
    %cst_170 = arith.constant 5.000000e-01 : f32
    %355 = vector.broadcast %cst_170 : f32 to vector<8x128xf32>
    %356 = arith.mulf %355, %354 : vector<8x128xf32>
    %357 = math.tanh %356 : vector<8x128xf32>
    %cst_171 = arith.constant 5.000000e-01 : f32
    %358 = vector.broadcast %cst_171 : f32 to vector<8x128xf32>
    %359 = arith.mulf %358, %357 : vector<8x128xf32>
    %cst_172 = arith.constant 5.000000e-01 : f32
    %360 = vector.broadcast %cst_172 : f32 to vector<8x128xf32>
    %361 = arith.addf %359, %360 : vector<8x128xf32>
    %362 = arith.mulf %351, %0 : vector<8x128xf32>
    %363 = arith.mulf %343, %353 : vector<8x128xf32>
    %364 = arith.addf %362, %363 : vector<8x128xf32>
    %365 = math.tanh %364 : vector<8x128xf32>
    %366 = arith.mulf %361, %365 : vector<8x128xf32>
    %c1_173 = arith.constant 1 : index
    %c0_174 = arith.constant 0 : index
    %c0_175 = arith.constant 0 : index
    %367 = vector.load %arg12[%c1_173, %c0_174, %c0_175] : memref<8x8x512xf32, #tpu.memory_space<vmem>>, vector<1x8x512xf32>
    %368 = vector.shape_cast %367 : vector<1x8x512xf32> to vector<8x512xf32>
    %c0_176 = arith.constant 0 : index
    %c0_177 = arith.constant 0 : index
    %369 = vector.load %arg5[%c0_176, %c0_177] : memref<128x512xf32, #tpu.memory_space<vmem>>, vector<128x512xf32>
    %cst_178 = arith.constant dense<0.000000e+00> : vector<8x512xf32>
    %370 = tpu.matmul %366, %369, %cst_178 {dimension_numbers = #tpu.dot_dimension_numbers<[1], [0], [0], [1], [0, 0, 1, 1], [], []>} : vector<8x128xf32>, vector<128x512xf32>, vector<8x512xf32> -> vector<8x512xf32>
    %371 = arith.addf %368, %370 : vector<8x512xf32>
    %372 = vector.extract_strided_slice %371 {offsets = [0, 0], sizes = [8, 128], strides = [1, 1]} : vector<8x512xf32> to vector<8x128xf32>
    %cst_179 = arith.constant 5.000000e-01 : f32
    %373 = vector.broadcast %cst_179 : f32 to vector<8x128xf32>
    %374 = arith.mulf %373, %372 : vector<8x128xf32>
    %375 = math.tanh %374 : vector<8x128xf32>
    %cst_180 = arith.constant 5.000000e-01 : f32
    %376 = vector.broadcast %cst_180 : f32 to vector<8x128xf32>
    %377 = arith.mulf %376, %375 : vector<8x128xf32>
    %cst_181 = arith.constant 5.000000e-01 : f32
    %378 = vector.broadcast %cst_181 : f32 to vector<8x128xf32>
    %379 = arith.addf %377, %378 : vector<8x128xf32>
    %380 = vector.extract_strided_slice %371 {offsets = [0, 128], sizes = [8, 128], strides = [1, 1]} : vector<8x512xf32> to vector<8x128xf32>
    %cst_182 = arith.constant 5.000000e-01 : f32
    %381 = vector.broadcast %cst_182 : f32 to vector<8x128xf32>
    %382 = arith.mulf %381, %380 : vector<8x128xf32>
    %383 = math.tanh %382 : vector<8x128xf32>
    %cst_183 = arith.constant 5.000000e-01 : f32
    %384 = vector.broadcast %cst_183 : f32 to vector<8x128xf32>
    %385 = arith.mulf %384, %383 : vector<8x128xf32>
    %cst_184 = arith.constant 5.000000e-01 : f32
    %386 = vector.broadcast %cst_184 : f32 to vector<8x128xf32>
    %387 = arith.addf %385, %386 : vector<8x128xf32>
    %388 = vector.extract_strided_slice %371 {offsets = [0, 256], sizes = [8, 128], strides = [1, 1]} : vector<8x512xf32> to vector<8x128xf32>
    %389 = math.tanh %388 : vector<8x128xf32>
    %390 = vector.extract_strided_slice %371 {offsets = [0, 384], sizes = [8, 128], strides = [1, 1]} : vector<8x512xf32> to vector<8x128xf32>
    %cst_185 = arith.constant 5.000000e-01 : f32
    %391 = vector.broadcast %cst_185 : f32 to vector<8x128xf32>
    %392 = arith.mulf %391, %390 : vector<8x128xf32>
    %393 = math.tanh %392 : vector<8x128xf32>
    %cst_186 = arith.constant 5.000000e-01 : f32
    %394 = vector.broadcast %cst_186 : f32 to vector<8x128xf32>
    %395 = arith.mulf %394, %393 : vector<8x128xf32>
    %cst_187 = arith.constant 5.000000e-01 : f32
    %396 = vector.broadcast %cst_187 : f32 to vector<8x128xf32>
    %397 = arith.addf %395, %396 : vector<8x128xf32>
    %398 = arith.mulf %387, %364 : vector<8x128xf32>
    %399 = arith.mulf %379, %389 : vector<8x128xf32>
    %400 = arith.addf %398, %399 : vector<8x128xf32>
    %401 = math.tanh %400 : vector<8x128xf32>
    %402 = arith.mulf %397, %401 : vector<8x128xf32>
    %c2_188 = arith.constant 2 : index
    %c0_189 = arith.constant 0 : index
    %c0_190 = arith.constant 0 : index
    %403 = vector.load %arg12[%c2_188, %c0_189, %c0_190] : memref<8x8x512xf32, #tpu.memory_space<vmem>>, vector<1x8x512xf32>
    %404 = vector.shape_cast %403 : vector<1x8x512xf32> to vector<8x512xf32>
    %c0_191 = arith.constant 0 : index
    %c0_192 = arith.constant 0 : index
    %405 = vector.load %arg5[%c0_191, %c0_192] : memref<128x512xf32, #tpu.memory_space<vmem>>, vector<128x512xf32>
    %cst_193 = arith.constant dense<0.000000e+00> : vector<8x512xf32>
    %406 = tpu.matmul %402, %405, %cst_193 {dimension_numbers = #tpu.dot_dimension_numbers<[1], [0], [0], [1], [0, 0, 1, 1], [], []>} : vector<8x128xf32>, vector<128x512xf32>, vector<8x512xf32> -> vector<8x512xf32>
    %407 = arith.addf %404, %406 : vector<8x512xf32>
    %408 = vector.extract_strided_slice %407 {offsets = [0, 0], sizes = [8, 128], strides = [1, 1]} : vector<8x512xf32> to vector<8x128xf32>
    %cst_194 = arith.constant 5.000000e-01 : f32
    %409 = vector.broadcast %cst_194 : f32 to vector<8x128xf32>
    %410 = arith.mulf %409, %408 : vector<8x128xf32>
    %411 = math.tanh %410 : vector<8x128xf32>
    %cst_195 = arith.constant 5.000000e-01 : f32
    %412 = vector.broadcast %cst_195 : f32 to vector<8x128xf32>
    %413 = arith.mulf %412, %411 : vector<8x128xf32>
    %cst_196 = arith.constant 5.000000e-01 : f32
    %414 = vector.broadcast %cst_196 : f32 to vector<8x128xf32>
    %415 = arith.addf %413, %414 : vector<8x128xf32>
    %416 = vector.extract_strided_slice %407 {offsets = [0, 128], sizes = [8, 128], strides = [1, 1]} : vector<8x512xf32> to vector<8x128xf32>
    %cst_197 = arith.constant 5.000000e-01 : f32
    %417 = vector.broadcast %cst_197 : f32 to vector<8x128xf32>
    %418 = arith.mulf %417, %416 : vector<8x128xf32>
    %419 = math.tanh %418 : vector<8x128xf32>
    %cst_198 = arith.constant 5.000000e-01 : f32
    %420 = vector.broadcast %cst_198 : f32 to vector<8x128xf32>
    %421 = arith.mulf %420, %419 : vector<8x128xf32>
    %cst_199 = arith.constant 5.000000e-01 : f32
    %422 = vector.broadcast %cst_199 : f32 to vector<8x128xf32>
    %423 = arith.addf %421, %422 : vector<8x128xf32>
    %424 = vector.extract_strided_slice %407 {offsets = [0, 256], sizes = [8, 128], strides = [1, 1]} : vector<8x512xf32> to vector<8x128xf32>
    %425 = math.tanh %424 : vector<8x128xf32>
    %426 = vector.extract_strided_slice %407 {offsets = [0, 384], sizes = [8, 128], strides = [1, 1]} : vector<8x512xf32> to vector<8x128xf32>
    %cst_200 = arith.constant 5.000000e-01 : f32
    %427 = vector.broadcast %cst_200 : f32 to vector<8x128xf32>
    %428 = arith.mulf %427, %426 : vector<8x128xf32>
    %429 = math.tanh %428 : vector<8x128xf32>
    %cst_201 = arith.constant 5.000000e-01 : f32
    %430 = vector.broadcast %cst_201 : f32 to vector<8x128xf32>
    %431 = arith.mulf %430, %429 : vector<8x128xf32>
    %cst_202 = arith.constant 5.000000e-01 : f32
    %432 = vector.broadcast %cst_202 : f32 to vector<8x128xf32>
    %433 = arith.addf %431, %432 : vector<8x128xf32>
    %434 = arith.mulf %423, %400 : vector<8x128xf32>
    %435 = arith.mulf %415, %425 : vector<8x128xf32>
    %436 = arith.addf %434, %435 : vector<8x128xf32>
    %437 = math.tanh %436 : vector<8x128xf32>
    %438 = arith.mulf %433, %437 : vector<8x128xf32>
    %c3_203 = arith.constant 3 : index
    %c0_204 = arith.constant 0 : index
    %c0_205 = arith.constant 0 : index
    %439 = vector.load %arg12[%c3_203, %c0_204, %c0_205] : memref<8x8x512xf32, #tpu.memory_space<vmem>>, vector<1x8x512xf32>
    %440 = vector.shape_cast %439 : vector<1x8x512xf32> to vector<8x512xf32>
    %c0_206 = arith.constant 0 : index
    %c0_207 = arith.constant 0 : index
    %441 = vector.load %arg5[%c0_206, %c0_207] : memref<128x512xf32, #tpu.memory_space<vmem>>, vector<128x512xf32>
    %cst_208 = arith.constant dense<0.000000e+00> : vector<8x512xf32>
    %442 = tpu.matmul %438, %441, %cst_208 {dimension_numbers = #tpu.dot_dimension_numbers<[1], [0], [0], [1], [0, 0, 1, 1], [], []>} : vector<8x128xf32>, vector<128x512xf32>, vector<8x512xf32> -> vector<8x512xf32>
    %443 = arith.addf %440, %442 : vector<8x512xf32>
    %444 = vector.extract_strided_slice %443 {offsets = [0, 0], sizes = [8, 128], strides = [1, 1]} : vector<8x512xf32> to vector<8x128xf32>
    %cst_209 = arith.constant 5.000000e-01 : f32
    %445 = vector.broadcast %cst_209 : f32 to vector<8x128xf32>
    %446 = arith.mulf %445, %444 : vector<8x128xf32>
    %447 = math.tanh %446 : vector<8x128xf32>
    %cst_210 = arith.constant 5.000000e-01 : f32
    %448 = vector.broadcast %cst_210 : f32 to vector<8x128xf32>
    %449 = arith.mulf %448, %447 : vector<8x128xf32>
    %cst_211 = arith.constant 5.000000e-01 : f32
    %450 = vector.broadcast %cst_211 : f32 to vector<8x128xf32>
    %451 = arith.addf %449, %450 : vector<8x128xf32>
    %452 = vector.extract_strided_slice %443 {offsets = [0, 128], sizes = [8, 128], strides = [1, 1]} : vector<8x512xf32> to vector<8x128xf32>
    %cst_212 = arith.constant 5.000000e-01 : f32
    %453 = vector.broadcast %cst_212 : f32 to vector<8x128xf32>
    %454 = arith.mulf %453, %452 : vector<8x128xf32>
    %455 = math.tanh %454 : vector<8x128xf32>
    %cst_213 = arith.constant 5.000000e-01 : f32
    %456 = vector.broadcast %cst_213 : f32 to vector<8x128xf32>
    %457 = arith.mulf %456, %455 : vector<8x128xf32>
    %cst_214 = arith.constant 5.000000e-01 : f32
    %458 = vector.broadcast %cst_214 : f32 to vector<8x128xf32>
    %459 = arith.addf %457, %458 : vector<8x128xf32>
    %460 = vector.extract_strided_slice %443 {offsets = [0, 256], sizes = [8, 128], strides = [1, 1]} : vector<8x512xf32> to vector<8x128xf32>
    %461 = math.tanh %460 : vector<8x128xf32>
    %462 = vector.extract_strided_slice %443 {offsets = [0, 384], sizes = [8, 128], strides = [1, 1]} : vector<8x512xf32> to vector<8x128xf32>
    %cst_215 = arith.constant 5.000000e-01 : f32
    %463 = vector.broadcast %cst_215 : f32 to vector<8x128xf32>
    %464 = arith.mulf %463, %462 : vector<8x128xf32>
    %465 = math.tanh %464 : vector<8x128xf32>
    %cst_216 = arith.constant 5.000000e-01 : f32
    %466 = vector.broadcast %cst_216 : f32 to vector<8x128xf32>
    %467 = arith.mulf %466, %465 : vector<8x128xf32>
    %cst_217 = arith.constant 5.000000e-01 : f32
    %468 = vector.broadcast %cst_217 : f32 to vector<8x128xf32>
    %469 = arith.addf %467, %468 : vector<8x128xf32>
    %470 = arith.mulf %459, %436 : vector<8x128xf32>
    %471 = arith.mulf %451, %461 : vector<8x128xf32>
    %472 = arith.addf %470, %471 : vector<8x128xf32>
    %473 = math.tanh %472 : vector<8x128xf32>
    %474 = arith.mulf %469, %473 : vector<8x128xf32>
    %c4_218 = arith.constant 4 : index
    %c0_219 = arith.constant 0 : index
    %c0_220 = arith.constant 0 : index
    %475 = vector.load %arg12[%c4_218, %c0_219, %c0_220] : memref<8x8x512xf32, #tpu.memory_space<vmem>>, vector<1x8x512xf32>
    %476 = vector.shape_cast %475 : vector<1x8x512xf32> to vector<8x512xf32>
    %c0_221 = arith.constant 0 : index
    %c0_222 = arith.constant 0 : index
    %477 = vector.load %arg5[%c0_221, %c0_222] : memref<128x512xf32, #tpu.memory_space<vmem>>, vector<128x512xf32>
    %cst_223 = arith.constant dense<0.000000e+00> : vector<8x512xf32>
    %478 = tpu.matmul %474, %477, %cst_223 {dimension_numbers = #tpu.dot_dimension_numbers<[1], [0], [0], [1], [0, 0, 1, 1], [], []>} : vector<8x128xf32>, vector<128x512xf32>, vector<8x512xf32> -> vector<8x512xf32>
    %479 = arith.addf %476, %478 : vector<8x512xf32>
    %480 = vector.extract_strided_slice %479 {offsets = [0, 0], sizes = [8, 128], strides = [1, 1]} : vector<8x512xf32> to vector<8x128xf32>
    %cst_224 = arith.constant 5.000000e-01 : f32
    %481 = vector.broadcast %cst_224 : f32 to vector<8x128xf32>
    %482 = arith.mulf %481, %480 : vector<8x128xf32>
    %483 = math.tanh %482 : vector<8x128xf32>
    %cst_225 = arith.constant 5.000000e-01 : f32
    %484 = vector.broadcast %cst_225 : f32 to vector<8x128xf32>
    %485 = arith.mulf %484, %483 : vector<8x128xf32>
    %cst_226 = arith.constant 5.000000e-01 : f32
    %486 = vector.broadcast %cst_226 : f32 to vector<8x128xf32>
    %487 = arith.addf %485, %486 : vector<8x128xf32>
    %488 = vector.extract_strided_slice %479 {offsets = [0, 128], sizes = [8, 128], strides = [1, 1]} : vector<8x512xf32> to vector<8x128xf32>
    %cst_227 = arith.constant 5.000000e-01 : f32
    %489 = vector.broadcast %cst_227 : f32 to vector<8x128xf32>
    %490 = arith.mulf %489, %488 : vector<8x128xf32>
    %491 = math.tanh %490 : vector<8x128xf32>
    %cst_228 = arith.constant 5.000000e-01 : f32
    %492 = vector.broadcast %cst_228 : f32 to vector<8x128xf32>
    %493 = arith.mulf %492, %491 : vector<8x128xf32>
    %cst_229 = arith.constant 5.000000e-01 : f32
    %494 = vector.broadcast %cst_229 : f32 to vector<8x128xf32>
    %495 = arith.addf %493, %494 : vector<8x128xf32>
    %496 = vector.extract_strided_slice %479 {offsets = [0, 256], sizes = [8, 128], strides = [1, 1]} : vector<8x512xf32> to vector<8x128xf32>
    %497 = math.tanh %496 : vector<8x128xf32>
    %498 = vector.extract_strided_slice %479 {offsets = [0, 384], sizes = [8, 128], strides = [1, 1]} : vector<8x512xf32> to vector<8x128xf32>
    %cst_230 = arith.constant 5.000000e-01 : f32
    %499 = vector.broadcast %cst_230 : f32 to vector<8x128xf32>
    %500 = arith.mulf %499, %498 : vector<8x128xf32>
    %501 = math.tanh %500 : vector<8x128xf32>
    %cst_231 = arith.constant 5.000000e-01 : f32
    %502 = vector.broadcast %cst_231 : f32 to vector<8x128xf32>
    %503 = arith.mulf %502, %501 : vector<8x128xf32>
    %cst_232 = arith.constant 5.000000e-01 : f32
    %504 = vector.broadcast %cst_232 : f32 to vector<8x128xf32>
    %505 = arith.addf %503, %504 : vector<8x128xf32>
    %506 = arith.mulf %495, %472 : vector<8x128xf32>
    %507 = arith.mulf %487, %497 : vector<8x128xf32>
    %508 = arith.addf %506, %507 : vector<8x128xf32>
    %509 = math.tanh %508 : vector<8x128xf32>
    %510 = arith.mulf %505, %509 : vector<8x128xf32>
    %c5_233 = arith.constant 5 : index
    %c0_234 = arith.constant 0 : index
    %c0_235 = arith.constant 0 : index
    %511 = vector.load %arg12[%c5_233, %c0_234, %c0_235] : memref<8x8x512xf32, #tpu.memory_space<vmem>>, vector<1x8x512xf32>
    %512 = vector.shape_cast %511 : vector<1x8x512xf32> to vector<8x512xf32>
    %c0_236 = arith.constant 0 : index
    %c0_237 = arith.constant 0 : index
    %513 = vector.load %arg5[%c0_236, %c0_237] : memref<128x512xf32, #tpu.memory_space<vmem>>, vector<128x512xf32>
    %cst_238 = arith.constant dense<0.000000e+00> : vector<8x512xf32>
    %514 = tpu.matmul %510, %513, %cst_238 {dimension_numbers = #tpu.dot_dimension_numbers<[1], [0], [0], [1], [0, 0, 1, 1], [], []>} : vector<8x128xf32>, vector<128x512xf32>, vector<8x512xf32> -> vector<8x512xf32>
    %515 = arith.addf %512, %514 : vector<8x512xf32>
    %516 = vector.extract_strided_slice %515 {offsets = [0, 0], sizes = [8, 128], strides = [1, 1]} : vector<8x512xf32> to vector<8x128xf32>
    %cst_239 = arith.constant 5.000000e-01 : f32
    %517 = vector.broadcast %cst_239 : f32 to vector<8x128xf32>
    %518 = arith.mulf %517, %516 : vector<8x128xf32>
    %519 = math.tanh %518 : vector<8x128xf32>
    %cst_240 = arith.constant 5.000000e-01 : f32
    %520 = vector.broadcast %cst_240 : f32 to vector<8x128xf32>
    %521 = arith.mulf %520, %519 : vector<8x128xf32>
    %cst_241 = arith.constant 5.000000e-01 : f32
    %522 = vector.broadcast %cst_241 : f32 to vector<8x128xf32>
    %523 = arith.addf %521, %522 : vector<8x128xf32>
    %524 = vector.extract_strided_slice %515 {offsets = [0, 128], sizes = [8, 128], strides = [1, 1]} : vector<8x512xf32> to vector<8x128xf32>
    %cst_242 = arith.constant 5.000000e-01 : f32
    %525 = vector.broadcast %cst_242 : f32 to vector<8x128xf32>
    %526 = arith.mulf %525, %524 : vector<8x128xf32>
    %527 = math.tanh %526 : vector<8x128xf32>
    %cst_243 = arith.constant 5.000000e-01 : f32
    %528 = vector.broadcast %cst_243 : f32 to vector<8x128xf32>
    %529 = arith.mulf %528, %527 : vector<8x128xf32>
    %cst_244 = arith.constant 5.000000e-01 : f32
    %530 = vector.broadcast %cst_244 : f32 to vector<8x128xf32>
    %531 = arith.addf %529, %530 : vector<8x128xf32>
    %532 = vector.extract_strided_slice %515 {offsets = [0, 256], sizes = [8, 128], strides = [1, 1]} : vector<8x512xf32> to vector<8x128xf32>
    %533 = math.tanh %532 : vector<8x128xf32>
    %534 = vector.extract_strided_slice %515 {offsets = [0, 384], sizes = [8, 128], strides = [1, 1]} : vector<8x512xf32> to vector<8x128xf32>
    %cst_245 = arith.constant 5.000000e-01 : f32
    %535 = vector.broadcast %cst_245 : f32 to vector<8x128xf32>
    %536 = arith.mulf %535, %534 : vector<8x128xf32>
    %537 = math.tanh %536 : vector<8x128xf32>
    %cst_246 = arith.constant 5.000000e-01 : f32
    %538 = vector.broadcast %cst_246 : f32 to vector<8x128xf32>
    %539 = arith.mulf %538, %537 : vector<8x128xf32>
    %cst_247 = arith.constant 5.000000e-01 : f32
    %540 = vector.broadcast %cst_247 : f32 to vector<8x128xf32>
    %541 = arith.addf %539, %540 : vector<8x128xf32>
    %542 = arith.mulf %531, %508 : vector<8x128xf32>
    %543 = arith.mulf %523, %533 : vector<8x128xf32>
    %544 = arith.addf %542, %543 : vector<8x128xf32>
    %545 = math.tanh %544 : vector<8x128xf32>
    %546 = arith.mulf %541, %545 : vector<8x128xf32>
    %c6_248 = arith.constant 6 : index
    %c0_249 = arith.constant 0 : index
    %c0_250 = arith.constant 0 : index
    %547 = vector.load %arg12[%c6_248, %c0_249, %c0_250] : memref<8x8x512xf32, #tpu.memory_space<vmem>>, vector<1x8x512xf32>
    %548 = vector.shape_cast %547 : vector<1x8x512xf32> to vector<8x512xf32>
    %c0_251 = arith.constant 0 : index
    %c0_252 = arith.constant 0 : index
    %549 = vector.load %arg5[%c0_251, %c0_252] : memref<128x512xf32, #tpu.memory_space<vmem>>, vector<128x512xf32>
    %cst_253 = arith.constant dense<0.000000e+00> : vector<8x512xf32>
    %550 = tpu.matmul %546, %549, %cst_253 {dimension_numbers = #tpu.dot_dimension_numbers<[1], [0], [0], [1], [0, 0, 1, 1], [], []>} : vector<8x128xf32>, vector<128x512xf32>, vector<8x512xf32> -> vector<8x512xf32>
    %551 = arith.addf %548, %550 : vector<8x512xf32>
    %552 = vector.extract_strided_slice %551 {offsets = [0, 0], sizes = [8, 128], strides = [1, 1]} : vector<8x512xf32> to vector<8x128xf32>
    %cst_254 = arith.constant 5.000000e-01 : f32
    %553 = vector.broadcast %cst_254 : f32 to vector<8x128xf32>
    %554 = arith.mulf %553, %552 : vector<8x128xf32>
    %555 = math.tanh %554 : vector<8x128xf32>
    %cst_255 = arith.constant 5.000000e-01 : f32
    %556 = vector.broadcast %cst_255 : f32 to vector<8x128xf32>
    %557 = arith.mulf %556, %555 : vector<8x128xf32>
    %cst_256 = arith.constant 5.000000e-01 : f32
    %558 = vector.broadcast %cst_256 : f32 to vector<8x128xf32>
    %559 = arith.addf %557, %558 : vector<8x128xf32>
    %560 = vector.extract_strided_slice %551 {offsets = [0, 128], sizes = [8, 128], strides = [1, 1]} : vector<8x512xf32> to vector<8x128xf32>
    %cst_257 = arith.constant 5.000000e-01 : f32
    %561 = vector.broadcast %cst_257 : f32 to vector<8x128xf32>
    %562 = arith.mulf %561, %560 : vector<8x128xf32>
    %563 = math.tanh %562 : vector<8x128xf32>
    %cst_258 = arith.constant 5.000000e-01 : f32
    %564 = vector.broadcast %cst_258 : f32 to vector<8x128xf32>
    %565 = arith.mulf %564, %563 : vector<8x128xf32>
    %cst_259 = arith.constant 5.000000e-01 : f32
    %566 = vector.broadcast %cst_259 : f32 to vector<8x128xf32>
    %567 = arith.addf %565, %566 : vector<8x128xf32>
    %568 = vector.extract_strided_slice %551 {offsets = [0, 256], sizes = [8, 128], strides = [1, 1]} : vector<8x512xf32> to vector<8x128xf32>
    %569 = math.tanh %568 : vector<8x128xf32>
    %570 = vector.extract_strided_slice %551 {offsets = [0, 384], sizes = [8, 128], strides = [1, 1]} : vector<8x512xf32> to vector<8x128xf32>
    %cst_260 = arith.constant 5.000000e-01 : f32
    %571 = vector.broadcast %cst_260 : f32 to vector<8x128xf32>
    %572 = arith.mulf %571, %570 : vector<8x128xf32>
    %573 = math.tanh %572 : vector<8x128xf32>
    %cst_261 = arith.constant 5.000000e-01 : f32
    %574 = vector.broadcast %cst_261 : f32 to vector<8x128xf32>
    %575 = arith.mulf %574, %573 : vector<8x128xf32>
    %cst_262 = arith.constant 5.000000e-01 : f32
    %576 = vector.broadcast %cst_262 : f32 to vector<8x128xf32>
    %577 = arith.addf %575, %576 : vector<8x128xf32>
    %578 = arith.mulf %567, %544 : vector<8x128xf32>
    %579 = arith.mulf %559, %569 : vector<8x128xf32>
    %580 = arith.addf %578, %579 : vector<8x128xf32>
    %581 = math.tanh %580 : vector<8x128xf32>
    %582 = arith.mulf %577, %581 : vector<8x128xf32>
    %c7_263 = arith.constant 7 : index
    %c0_264 = arith.constant 0 : index
    %c0_265 = arith.constant 0 : index
    %583 = vector.load %arg12[%c7_263, %c0_264, %c0_265] : memref<8x8x512xf32, #tpu.memory_space<vmem>>, vector<1x8x512xf32>
    %584 = vector.shape_cast %583 : vector<1x8x512xf32> to vector<8x512xf32>
    %c0_266 = arith.constant 0 : index
    %c0_267 = arith.constant 0 : index
    %585 = vector.load %arg5[%c0_266, %c0_267] : memref<128x512xf32, #tpu.memory_space<vmem>>, vector<128x512xf32>
    %cst_268 = arith.constant dense<0.000000e+00> : vector<8x512xf32>
    %586 = tpu.matmul %582, %585, %cst_268 {dimension_numbers = #tpu.dot_dimension_numbers<[1], [0], [0], [1], [0, 0, 1, 1], [], []>} : vector<8x128xf32>, vector<128x512xf32>, vector<8x512xf32> -> vector<8x512xf32>
    %587 = arith.addf %584, %586 : vector<8x512xf32>
    %588 = vector.extract_strided_slice %587 {offsets = [0, 0], sizes = [8, 128], strides = [1, 1]} : vector<8x512xf32> to vector<8x128xf32>
    %cst_269 = arith.constant 5.000000e-01 : f32
    %589 = vector.broadcast %cst_269 : f32 to vector<8x128xf32>
    %590 = arith.mulf %589, %588 : vector<8x128xf32>
    %591 = math.tanh %590 : vector<8x128xf32>
    %cst_270 = arith.constant 5.000000e-01 : f32
    %592 = vector.broadcast %cst_270 : f32 to vector<8x128xf32>
    %593 = arith.mulf %592, %591 : vector<8x128xf32>
    %cst_271 = arith.constant 5.000000e-01 : f32
    %594 = vector.broadcast %cst_271 : f32 to vector<8x128xf32>
    %595 = arith.addf %593, %594 : vector<8x128xf32>
    %596 = vector.extract_strided_slice %587 {offsets = [0, 128], sizes = [8, 128], strides = [1, 1]} : vector<8x512xf32> to vector<8x128xf32>
    %cst_272 = arith.constant 5.000000e-01 : f32
    %597 = vector.broadcast %cst_272 : f32 to vector<8x128xf32>
    %598 = arith.mulf %597, %596 : vector<8x128xf32>
    %599 = math.tanh %598 : vector<8x128xf32>
    %cst_273 = arith.constant 5.000000e-01 : f32
    %600 = vector.broadcast %cst_273 : f32 to vector<8x128xf32>
    %601 = arith.mulf %600, %599 : vector<8x128xf32>
    %cst_274 = arith.constant 5.000000e-01 : f32
    %602 = vector.broadcast %cst_274 : f32 to vector<8x128xf32>
    %603 = arith.addf %601, %602 : vector<8x128xf32>
    %604 = vector.extract_strided_slice %587 {offsets = [0, 256], sizes = [8, 128], strides = [1, 1]} : vector<8x512xf32> to vector<8x128xf32>
    %605 = math.tanh %604 : vector<8x128xf32>
    %606 = vector.extract_strided_slice %587 {offsets = [0, 384], sizes = [8, 128], strides = [1, 1]} : vector<8x512xf32> to vector<8x128xf32>
    %cst_275 = arith.constant 5.000000e-01 : f32
    %607 = vector.broadcast %cst_275 : f32 to vector<8x128xf32>
    %608 = arith.mulf %607, %606 : vector<8x128xf32>
    %609 = math.tanh %608 : vector<8x128xf32>
    %cst_276 = arith.constant 5.000000e-01 : f32
    %610 = vector.broadcast %cst_276 : f32 to vector<8x128xf32>
    %611 = arith.mulf %610, %609 : vector<8x128xf32>
    %cst_277 = arith.constant 5.000000e-01 : f32
    %612 = vector.broadcast %cst_277 : f32 to vector<8x128xf32>
    %613 = arith.addf %611, %612 : vector<8x128xf32>
    %614 = arith.mulf %603, %580 : vector<8x128xf32>
    %615 = arith.mulf %595, %605 : vector<8x128xf32>
    %616 = arith.addf %614, %615 : vector<8x128xf32>
    %617 = math.tanh %616 : vector<8x128xf32>
    %618 = arith.mulf %613, %617 : vector<8x128xf32>
    %c0_278 = arith.constant 0 : index
    %c0_279 = arith.constant 0 : index
    %619 = vector.load %arg7[%c0_278, %c0_279] : memref<128x128xf32, #tpu.memory_space<vmem>>, vector<128x128xf32>
    %cst_280 = arith.constant dense<0.000000e+00> : vector<8x128xf32>
    %620 = tpu.matmul %618, %619, %cst_280 {dimension_numbers = #tpu.dot_dimension_numbers<[1], [0], [0], [1], [0, 0, 1, 1], [], []>} : vector<8x128xf32>, vector<128x128xf32>, vector<8x128xf32> -> vector<8x128xf32>
    %c0_281 = arith.constant 0 : index
    %c0_282 = arith.constant 0 : index
    %621 = vector.load %arg8[%c0_281, %c0_282] : memref<1x128xf32, #tpu.memory_space<vmem>>, vector<1x128xf32>
    %622 = vector.broadcast %621 : vector<1x128xf32> to vector<8x128xf32>
    %623 = arith.addf %620, %622 : vector<8x128xf32>
    %cst_283 = arith.constant 0.000000e+00 : f32
    %624 = vector.broadcast %cst_283 : f32 to vector<8x128xf32>
    %625 = arith.maximumf %623, %624 : vector<8x128xf32>
    %c0_284 = arith.constant 0 : index
    %c0_285 = arith.constant 0 : index
    %626 = vector.load %arg9[%c0_284, %c0_285] : memref<1x128xf32, #tpu.memory_space<vmem>>, vector<1x128xf32>
    %627 = vector.broadcast %626 : vector<1x128xf32> to vector<8x128xf32>
    %628 = arith.mulf %625, %627 : vector<8x128xf32>
    %cst_286 = arith.constant dense<0.000000e+00> : vector<8xf32>
    %629 = vector.multi_reduction <add>, %628, %cst_286 [1] : vector<8x128xf32> to vector<8xf32>
    %630 = vector.shape_cast %629 : vector<8xf32> to vector<8x1xf32>
    %c0_287 = arith.constant 0 : index
    %c0_288 = arith.constant 0 : index
    %631 = vector.load %arg10[%c0_287, %c0_288] : memref<1x1xf32, #tpu.memory_space<vmem>>, vector<1x1xf32>
    %632 = vector.broadcast %631 : vector<1x1xf32> to vector<8x1xf32>
    %633 = arith.addf %630, %632 : vector<8x1xf32>
    %634 = vector.shape_cast %633 : vector<8x1xf32> to vector<8x1xf32>
    %635 = vector.broadcast %634 : vector<8x1xf32> to vector<8x128xf32>
    %c0_289 = arith.constant 0 : index
    %c0_290 = arith.constant 0 : index
    %636 = vector.load %arg11[%c0_289, %c0_290] : memref<8x128xf32, #tpu.memory_space<vmem>>, vector<8x128xf32>
    tpu.vector_store %arg11[%c0_289, %c0_290], %635 {strides = array<i32>} : memref<8x128xf32, #tpu.memory_space<vmem>>, vector<8x128xf32>,
    return
  }
}

</mosaic_0001>

<bundles_post_ra>
// kernel: tpu_custom_call.1
= control target key start
LH: loop header
LB: loop body
LE: loop exit
PB: predicated region body
PF: predicated region fallthrough
CT: control target
= control target key end

     0   :  { %s7105_s0 = inlined_call_operand.hbm [shape: f32[8,8,128], index: 0, kind: input, shape index: {}]   ;;  %s7106_s1 = inlined_call_operand.hbm [shape: f32[128,512], index: 1, kind: input, shape index: {}]   ;;  %s7107_s2 = inlined_call_operand.hbm [shape: f32[128,512], index: 2, kind: input, shape index: {}]   ;;  %s7108_s3 = inlined_call_operand.vmem [shape: f32[1,512], index: 3, kind: input, shape index: {}]   ;;  %s7109_s4 = inlined_call_operand.hbm [shape: f32[128,512], index: 4, kind: input, shape index: {}]   ;;  %s7110_s5 = inlined_call_operand.hbm [shape: f32[128,512], index: 5, kind: input, shape index: {}]   ;;  %s7111_s6 = inlined_call_operand.vmem [shape: f32[1,512], index: 6, kind: input, shape index: {}]   ;;  %s7112_s7 = inlined_call_operand.hbm [shape: f32[128,128], index: 7, kind: input, shape index: {}]   ;;  %s7113_s8 = inlined_call_operand.vmem [shape: f32[1,128], index: 8, kind: input, shape index: {}]   ;;  %s7114_s9 = inlined_call_operand.vmem [shape: f32[1,128], index: 9, kind: input, shape index: {}]   ;;  %s7115_s10 = inlined_call_operand.<no memory space> [shape: f32[1,1], index: 10, kind: input, shape index: {}]   ;;  %s7116_s11 = inlined_call_operand.hbm [shape: f32[8,128], index: 11, kind: output, shape index: {}]  }
   0x1   :  { %v16_v0 = vstv %s7115_s10 }
   0x2   :  { %17 = vst [vmem:[#allocation4] sm:$0x1] %v16_v0 }
   0x3   :  { %18 = vsyncpa [#allocation6], 0 }
   0x4   :  { %19 = vsyncpa [#allocation9], 0 }
   0x5   :  { %20 = vsyncpa [#allocation12], 0 }
   0x6   :  { %21 = vsyncpa [#allocation15], 0 }
   0x7   :  { %22 = vsyncpa [#allocation7], 0  ;;  %s5948_s19 = smov [#allocation8]   ;;  %s5784_s23 = scalar_lea.hbm %s7106_s1, 8192 }
   0x8   :  { %s40_s20 = sshll.u32 %s5948_s19, 4  ;;  %p5785_p0 = scmp.ne.s32.totalorder %s7106_s1, %s5784_s23  ;;  %s41_s20 = int_to_ptr.vmem [resolvable:$true] %s40_s20 }
   0x9   :  { %p5788_p1 = scmp.lt.u32.totalorder %s5784_s23, %s7106_s1 }
   0xb   :  { %p5790_p2 = pnand %p5788_p1, %p5785_p0 }
   0xd   :  { %5793 = shalt.err (!%p5790_p2)
}
   0xe   :  { %s5794_s10 = scalar_lea.vmem %s41_s20, 8192  ;;  %p5799_p4 = scmp.lt.s32.totalorder %s41_s20, %s41_s20 }
   0xf   :  { %p5795_p3 = scmp.ne.s32.totalorder %s41_s20, %s5794_s10  ;;  %p5800_p5 = scmp.lt.s32.totalorder %s5794_s10, %s5794_s10 }
  0x11   :  { %p5801_p6 = por %p5800_p5, %p5799_p4 }
  0x13   :  { %p5802_p7 = pnand %p5801_p6, %p5795_p3 }
  0x15   :  { %5805 = shalt.err (!%p5802_p7)
}
  0x16   :  { %s5949_s28 = smov 512   ;;  %s5950_s29 = smov 32  }
  0x17   :  { %46 = dma.hbm_to_vmem [thread:$0]  %s7106_s1, 8192, %s41_s20, [#allocation9], %s5949_s28, %s5949_s28, %s5950_s29  }
  0x18   :  { %s5951_s13 = smov [#allocation11]   ;;  %s5952_s15 = smov [#allocation5]  }
  0x19   :  { %s66_s14 = sshll.u32 %s5951_s13, 4  ;;  %s28_s16 = sshll.u32 %s5952_s15, 4  ;;  %s67_s14 = int_to_ptr.vmem [resolvable:$true] %s66_s14  ;;  %s29_s16 = int_to_ptr.vmem [resolvable:$true] %s28_s16 }
  0x1a   :  { %s5806_s19 = scalar_lea.hbm %s7109_s4, 8192 }
  0x1b   :  { %p5807_p8 = scmp.ne.s32.totalorder %s7109_s4, %s5806_s19  ;;  %p5810_p9 = scmp.lt.u32.totalorder %s5806_s19, %s7109_s4 }
  0x1d   :  { %p5812_p10 = pnand %p5810_p9, %p5807_p8 }
  0x1f   :  { %5815 = shalt.err (!%p5812_p10)
}
  0x20   :  { %s5816_s1 = scalar_lea.vmem %s67_s14, 8192  ;;  %p5821_p12 = scmp.lt.s32.totalorder %s67_s14, %s67_s14 }
  0x21   :  { %p5817_p11 = scmp.ne.s32.totalorder %s67_s14, %s5816_s1  ;;  %p5822_p13 = scmp.lt.s32.totalorder %s5816_s1, %s5816_s1 }
  0x23   :  { %p5823_p0 = por %p5822_p13, %p5821_p12 }
  0x25   :  { %p5824_p1 = pnand %p5823_p0, %p5817_p11 }
  0x27   :  { %5827 = shalt.err (!%p5824_p1)
}
  0x28   :  { %72 = dma.hbm_to_vmem [thread:$0]  %s7109_s4, 8192, %s67_s14, [#allocation12], %s5949_s28, %s5949_s28, %s5950_s29  }
  0x29   :  { %s5828_s10 = scalar_lea.hbm %s7105_s0, 1024 }
  0x2a   :  { %p5829_p2 = scmp.ne.s32.totalorder %s7105_s0, %s5828_s10  ;;  %p5832_p3 = scmp.lt.u32.totalorder %s5828_s10, %s7105_s0 }
  0x2c   :  { %p5834_p4 = pnand %p5832_p3, %p5829_p2 }
  0x2e   :  { %5837 = shalt.err (!%p5834_p4)
}
  0x2f   :  { %s5838_s17 = scalar_lea.vmem %s29_s16, 1024  ;;  %p5843_p6 = scmp.lt.s32.totalorder %s29_s16, %s29_s16 }
  0x30   :  { %p5839_p5 = scmp.ne.s32.totalorder %s29_s16, %s5838_s17  ;;  %p5844_p7 = scmp.lt.s32.totalorder %s5838_s17, %s5838_s17 }
  0x32   :  { %p5845_p8 = por %p5844_p7, %p5843_p6 }
  0x34   :  { %p5846_p9 = pnand %p5845_p8, %p5839_p5 }
  0x36   :  { %5849 = shalt.err (!%p5846_p9)
}
  0x37   :  { %s5953_s4 = smov 128   ;;  %s5954_s14 = smov 8  }
  0x38   :  { %34 = dma.hbm_to_vmem [thread:$0]  %s7105_s0, 1024, %s29_s16, [#allocation6], %s5953_s4, %s5953_s4, %s5954_s14  }
  0x39   :  { %s5955_s21 = smov [#allocation10]   ;;  %s5956_s23 = smov [#allocation13]  }
  0x3a   :  { %s52_s22 = sshll.u32 %s5955_s21, 4  ;;  %s78_s24 = sshll.u32 %s5956_s23, 4  ;;  %s53_s22 = int_to_ptr.vmem [resolvable:$true] %s52_s22  ;;  %s79_s24 = int_to_ptr.vmem [resolvable:$true] %s78_s24 }
  0x3b   :  { %s5850_s25 = scalar_lea.hbm %s7107_s2, 8192 }
  0x3c   :  { %p5851_p10 = scmp.ne.s32.totalorder %s7107_s2, %s5850_s25  ;;  %p5854_p11 = scmp.lt.u32.totalorder %s5850_s25, %s7107_s2 }
  0x3e   :  { %p5856_p12 = pnand %p5854_p11, %p5851_p10 }
  0x40   :  { %5859 = shalt.err (!%p5856_p12)
}
  0x41   :  { %s5860_s0 = scalar_lea.vmem %s53_s22, 8192  ;;  %p5865_p0 = scmp.lt.s32.totalorder %s53_s22, %s53_s22 }
  0x42   :  { %p5861_p13 = scmp.ne.s32.totalorder %s53_s22, %s5860_s0  ;;  %p5866_p1 = scmp.lt.s32.totalorder %s5860_s0, %s5860_s0 }
  0x44   :  { %p5867_p2 = por %p5866_p1, %p5865_p0 }
  0x46   :  { %p5868_p3 = pnand %p5867_p2, %p5861_p13 }
  0x48   :  { %5871 = shalt.err (!%p5868_p3)
}
  0x49   :  { %58 = dma.hbm_to_vmem [thread:$0]  %s7107_s2, 8192, %s53_s22, [#allocation9], %s5949_s28, %s5949_s28, %s5950_s29  }
  0x4a   :  { %s5872_s17 = scalar_lea.hbm %s7110_s5, 8192 }
  0x4b   :  { %p5873_p4 = scmp.ne.s32.totalorder %s7110_s5, %s5872_s17  ;;  %p5876_p5 = scmp.lt.u32.totalorder %s5872_s17, %s7110_s5 }
  0x4d   :  { %p5878_p6 = pnand %p5876_p5, %p5873_p4 }
  0x4f   :  { %5881 = shalt.err (!%p5878_p6)
}
  0x50   :  { %s5882_s1 = scalar_lea.vmem %s79_s24, 8192  ;;  %p5887_p8 = scmp.lt.s32.totalorder %s79_s24, %s79_s24 }
  0x51   :  { %p5883_p7 = scmp.ne.s32.totalorder %s79_s24, %s5882_s1  ;;  %p5888_p9 = scmp.lt.s32.totalorder %s5882_s1, %s5882_s1 }
  0x53   :  { %p5889_p10 = por %p5888_p9, %p5887_p8 }
  0x55   :  { %p5890_p11 = pnand %p5889_p10, %p5883_p7 }
  0x57   :  { %5893 = shalt.err (!%p5890_p11)
}
  0x58   :  { %84 = dma.hbm_to_vmem [thread:$0]  %s7110_s5, 8192, %s79_s24, [#allocation12], %s5949_s28, %s5949_s28, %s5950_s29  }
  0x59   :  { %s5957_s20 = smov [#allocation14]   ;;  %s5894_s10 = scalar_lea.hbm %s7112_s7, 2048 }
  0x5a   :  { %s92_s25 = sshll.u32 %s5957_s20, 4  ;;  %p5895_p12 = scmp.ne.s32.totalorder %s7112_s7, %s5894_s10  ;;  %s93_s25 = int_to_ptr.vmem [resolvable:$true] %s92_s25 }
  0x5b   :  { %p5898_p13 = scmp.lt.u32.totalorder %s5894_s10, %s7112_s7 }
  0x5d   :  { %p5900_p0 = pnand %p5898_p13, %p5895_p12 }
  0x5f   :  { %5903 = shalt.err (!%p5900_p0)
}
  0x60   :  { %s5904_s13 = scalar_lea.vmem %s93_s25, 2048  ;;  %p5909_p2 = scmp.lt.s32.totalorder %s93_s25, %s93_s25 }
  0x61   :  { %p5905_p1 = scmp.ne.s32.totalorder %s93_s25, %s5904_s13  ;;  %p5910_p3 = scmp.lt.s32.totalorder %s5904_s13, %s5904_s13 }
  0x63   :  { %p5911_p4 = por %p5910_p3, %p5909_p2 }
  0x65   :  { %p5912_p5 = pnand %p5911_p4, %p5905_p1 }
  0x67   :  { %5915 = shalt.err (!%p5912_p5)
}
  0x68   :  { %98 = dma.hbm_to_vmem [thread:$0]  %s7112_s7, 2048, %s93_s25, [#allocation15], %s5953_s4, %s5953_s4, %s5954_s14  }
  0x69   :  { %5938 = dma.done.wait [#allocation6], 1024  }
  0x6a   :  { %5939 = vsyncadd [#allocation6], 4294966272 }
  0x6b   :  { %5940 = dma.done.wait [#allocation9], 16384  }
  0x6c   :  { %5941 = vsyncadd [#allocation9], 4294950912 }
  0x6d   :  { %5942 = dma.done.wait [#allocation12], 16384  }
  0x6e   :  { %5943 = vsyncadd [#allocation12], 4294950912 }
  0x6f   :  { %5944 = dma.done.wait [#allocation15], 2048  }
  0x70   :  { %5945 = vsyncadd [#allocation15], 4294965248  ;;  %v5958_v1 = vmov 0.0   ;;  %v132_v2 = vld [vmem:[#allocation8 + $0x8] sm:$0xff]  ;;  %v134_v4 = vld [vmem:[#allocation8 + $0x18] sm:$0xff]  ;;  %vm5960_vm0 = vmmov 0  }
  0x71   :  { %281 = vmatprep.mubr.f32.mxu0 %v5958_v1  ;;  %394 = vmatprep.mubr.f32.mxu1 %v5958_v1  ;;  %v136_v3 = vld [vmem:[#allocation8 + $0x28] sm:$0xff]  ;;  %v138_v6 = vld [vmem:[#allocation8 + $0x38] sm:$0xff]  ;;  %v131_v7 = vld [vmem:[#allocation8] sm:$0xff]  ;;  %s5962_s17 = smov [#allocation16]  }
  0x72   :  { %v4304_v5 = vpack.c.bf16 %v136_v3, %v132_v2  ;;  %v135_v8 = vld [vmem:[#allocation8 + $0x20] sm:$0xff]  ;;  %v4336_v9 = vpack.c.bf16 %v138_v6, %v134_v4  ;;  %v133_v11 = vld [vmem:[#allocation8 + $0x10] sm:$0xff]  ;;  %v140_v13 = vld [vmem:[#allocation8 + $0x48] sm:$0xff]  ;;  %s4237_s18 = sshll.u32 %s5962_s17, 4  ;;  %s4238_s18 = int_to_ptr.vmem [resolvable:$true] %s4237_s18 }
  0x73   :  { %v4306_v10 = vpack.c.bf16 %v135_v8, %v131_v7  ;;  %v137_v12 = vld [vmem:[#allocation8 + $0x30] sm:$0xff]  ;;  %v144_v15 = vld [vmem:[#allocation8 + $0x68] sm:$0xff]  ;;  %v142_v16 = vld [vmem:[#allocation8 + $0x58] sm:$0xff]  ;;  %p5921_p7 = scmp.lt.s32.totalorder %s4238_s18, %s4238_s18 }
  0x74   :  { %4305 = vmatprep.subr.bf16.mxu0 %v4304_v5  ;;  %v4338_v14 = vpack.c.bf16 %v137_v12, %v133_v11  ;;  %v146_v17 = vld [vmem:[#allocation8 + $0x78] sm:$0xff]  ;;  %4337 = vmatprep.subr.bf16.mxu1 %v4336_v9  ;;  %v4308_v18 = vpack.c.bf16 %v144_v15, %v140_v13  ;;  %v139_v20 = vld [vmem:[#allocation8 + $0x40] sm:$0xff]  ;;  %v141_v22 = vld [vmem:[#allocation8 + $0x50] sm:$0xff] }
  0x75   :  { %4307 = vmatpush1.bf16.msra.mxu0 %v4306_v10  ;;  %v4340_v19 = vpack.c.bf16 %v146_v17, %v142_v16  ;;  %v143_v21 = vld [vmem:[#allocation8 + $0x60] sm:$0xff]  ;;  %v145_v24 = vld [vmem:[#allocation8 + $0x70] sm:$0xff]  ;;  %v148_v25 = vld [vmem:[#allocation8 + $0x88] sm:$0xff] }
  0x76   :  { %4339 = vmatpush1.bf16.msra.mxu1 %v4338_v14  ;;  %v4310_v23 = vpack.c.bf16 %v143_v21, %v139_v20  ;;  %v152_v26 = vld [vmem:[#allocation8 + $0xa8] sm:$0xff]  ;;  %4309 = vmatprep.subr.bf16.mxu0 %v4308_v18  ;;  %v4342_v27 = vpack.c.bf16 %v145_v24, %v141_v22  ;;  %v150_v29 = vld [vmem:[#allocation8 + $0x98] sm:$0xff]  ;;  %v147_v31 = vld [vmem:[#allocation8 + $0x80] sm:$0xff] }
  0x77   :  { %4341 = vmatprep.subr.bf16.mxu1 %v4340_v19  ;;  %v4312_v28 = vpack.c.bf16 %v152_v26, %v148_v25  ;;  %v154_v30 = vld [vmem:[#allocation8 + $0xb8] sm:$0xff]  ;;  %v151_v33 = vld [vmem:[#allocation8 + $0xa0] sm:$0xff]  ;;  %v149_v34 = vld [vmem:[#allocation8 + $0x90] sm:$0xff] }
  0x78   :  { %v4344_v32 = vpack.c.bf16 %v154_v30, %v150_v29  ;;  %v153_v35 = vld [vmem:[#allocation8 + $0xb0] sm:$0xff]  ;;  %v4314_v36 = vpack.c.bf16 %v151_v33, %v147_v31  ;;  %v156_v37 = vld [vmem:[#allocation8 + $0xc8] sm:$0xff]  ;;  %v158_v39 = vld [vmem:[#allocation8 + $0xd8] sm:$0xff] }
  0x79   :  { %4311 = vmatpush1.bf16.msra.mxu0 %v4310_v23  ;;  %v160_v38 = vld [vmem:[#allocation8 + $0xe8] sm:$0xff]  ;;  %v4346_v40 = vpack.c.bf16 %v153_v35, %v149_v34  ;;  %v162_v42 = vld [vmem:[#allocation8 + $0xf8] sm:$0xff]  ;;  %v155_v43 = vld [vmem:[#allocation8 + $0xc0] sm:$0xff] }
  0x7a   :  { %4343 = vmatpush1.bf16.msra.mxu1 %v4342_v27  ;;  %4313 = vmatprep.subr.bf16.mxu0 %v4312_v28  ;;  %v4316_v41 = vpack.c.bf16 %v160_v38, %v156_v37  ;;  %v159_v44 = vld [vmem:[#allocation8 + $0xe0] sm:$0xff]  ;;  %v4348_v45 = vpack.c.bf16 %v162_v42, %v158_v39  ;;  %v157_v46 = vld [vmem:[#allocation8 + $0xd0] sm:$0xff]  ;;  %v164_v48 = vld [vmem:[#allocation8 + $0x108] sm:$0xff] }
  0x7b   :  { %4345 = vmatprep.subr.bf16.mxu1 %v4344_v32  ;;  %v161_v47 = vld [vmem:[#allocation8 + $0xf0] sm:$0xff]  ;;  %v168_v49 = vld [vmem:[#allocation8 + $0x128] sm:$0xff]  ;;  %v166_v50 = vld [vmem:[#allocation8 + $0x118] sm:$0xff]  ;;  %v4318_v52 = vpack.c.bf16 %v159_v44, %v155_v43 }
  0x7c   :  { %v170_v51 = vld [vmem:[#allocation8 + $0x138] sm:$0xff]  ;;  %v4350_v53 = vpack.c.bf16 %v161_v47, %v157_v46  ;;  %v4320_v54 = vpack.c.bf16 %v168_v49, %v164_v48  ;;  %v163_v55 = vld [vmem:[#allocation8 + $0x100] sm:$0xff]  ;;  %v165_v57 = vld [vmem:[#allocation8 + $0x110] sm:$0xff] }
  0x7d   :  { %4315 = vmatpush1.bf16.msra.mxu0 %v4314_v36  ;;  %v167_v56 = vld [vmem:[#allocation8 + $0x120] sm:$0xff]  ;;  %v4352_v58 = vpack.c.bf16 %v170_v51, %v166_v50  ;;  %v169_v59 = vld [vmem:[#allocation8 + $0x130] sm:$0xff]  ;;  %v172_v60 = vld [vmem:[#allocation8 + $0x148] sm:$0xff] }
  0x7e   :  { %4347 = vmatpush1.bf16.msra.mxu1 %v4346_v40  ;;  %4317 = vmatprep.subr.bf16.mxu0 %v4316_v41  ;;  %v176_v61 = vld [vmem:[#allocation8 + $0x168] sm:$0xff]  ;;  %v174_v62 = vld [vmem:[#allocation8 + $0x158] sm:$0xff]  ;;  %v4322_v0 = vpack.c.bf16 %v167_v56, %v163_v55  ;;  %v4354_v2 = vpack.c.bf16 %v169_v59, %v165_v57  ;;  %v171_v4 = vld [vmem:[#allocation8 + $0x140] sm:$0xff] }
  0x7f   :  { %4349 = vmatprep.subr.bf16.mxu1 %v4348_v45  ;;  %v178_v63 = vld [vmem:[#allocation8 + $0x178] sm:$0xff]  ;;  %v4324_v3 = vpack.c.bf16 %v176_v61, %v172_v60  ;;  %v175_v5 = vld [vmem:[#allocation8 + $0x160] sm:$0xff]  ;;  %v173_v6 = vld [vmem:[#allocation8 + $0x150] sm:$0xff] }
  0x80   :  { %v4356_v7 = vpack.c.bf16 %v178_v63, %v174_v62  ;;  %v177_v8 = vld [vmem:[#allocation8 + $0x170] sm:$0xff]  ;;  %v180_v9 = vld [vmem:[#allocation8 + $0x188] sm:$0xff]  ;;  %v182_v11 = vld [vmem:[#allocation8 + $0x198] sm:$0xff]  ;;  %v4326_v13 = vpack.c.bf16 %v175_v5, %v171_v4 }
  0x81   :  { %4319 = vmatpush1.bf16.msra.mxu0 %v4318_v52  ;;  %v184_v10 = vld [vmem:[#allocation8 + $0x1a8] sm:$0xff]  ;;  %v186_v12 = vld [vmem:[#allocation8 + $0x1b8] sm:$0xff]  ;;  %v4358_v14 = vpack.c.bf16 %v177_v8, %v173_v6  ;;  %v179_v16 = vld [vmem:[#allocation8 + $0x180] sm:$0xff] }
  0x82   :  { %4351 = vmatpush1.bf16.msra.mxu1 %v4350_v53  ;;  %4321 = vmatprep.subr.bf16.mxu0 %v4320_v54  ;;  %v4328_v15 = vpack.c.bf16 %v184_v10, %v180_v9  ;;  %v183_v17 = vld [vmem:[#allocation8 + $0x1a0] sm:$0xff]  ;;  %v181_v18 = vld [vmem:[#allocation8 + $0x190] sm:$0xff]  ;;  %v4360_v19 = vpack.c.bf16 %v186_v12, %v182_v11  ;;  %v188_v21 = vld [vmem:[#allocation8 + $0x1c8] sm:$0xff] }
  0x83   :  { %4353 = vmatprep.subr.bf16.mxu1 %v4352_v58  ;;  %v185_v20 = vld [vmem:[#allocation8 + $0x1b0] sm:$0xff]  ;;  %v192_v22 = vld [vmem:[#allocation8 + $0x1e8] sm:$0xff]  ;;  %v190_v23 = vld [vmem:[#allocation8 + $0x1d8] sm:$0xff]  ;;  %v4330_v25 = vpack.c.bf16 %v183_v17, %v179_v16 }
  0x84   :  { %v194_v24 = vld [vmem:[#allocation8 + $0x1f8] sm:$0xff]  ;;  %v4362_v26 = vpack.c.bf16 %v185_v20, %v181_v18  ;;  %v4332_v27 = vpack.c.bf16 %v192_v22, %v188_v21  ;;  %v187_v28 = vld [vmem:[#allocation8 + $0x1c0] sm:$0xff]  ;;  %v189_v30 = vld [vmem:[#allocation8 + $0x1d0] sm:$0xff] }
  0x85   :  { %4323 = vmatpush1.bf16.msra.mxu0 %v4322_v0  ;;  %v191_v29 = vld [vmem:[#allocation8 + $0x1e0] sm:$0xff]  ;;  %v4364_v31 = vpack.c.bf16 %v194_v24, %v190_v23  ;;  %v193_v32 = vld [vmem:[#allocation8 + $0x1f0] sm:$0xff]  ;;  %v480_v33 = vld [vmem:[#allocation10 + $0x8] sm:$0xff] }
  0x86   :  { %4355 = vmatpush1.bf16.msra.mxu1 %v4354_v2  ;;  %4325 = vmatprep.subr.bf16.mxu0 %v4324_v3  ;;  %v484_v34 = vld [vmem:[#allocation10 + $0x28] sm:$0xff]  ;;  %v482_v35 = vld [vmem:[#allocation10 + $0x18] sm:$0xff]  ;;  %v4334_v37 = vpack.c.bf16 %v191_v29, %v187_v28  ;;  %v4366_v38 = vpack.c.bf16 %v193_v32, %v189_v30  ;;  %v479_v40 = vld [vmem:[#allocation10] sm:$0xff] }
  0x87   :  { %4357 = vmatprep.subr.bf16.mxu1 %v4356_v7  ;;  %v486_v36 = vld [vmem:[#allocation10 + $0x38] sm:$0xff]  ;;  %v6118_v39 = vpack.c.bf16 %v484_v34, %v480_v33  ;;  %v483_v41 = vld [vmem:[#allocation10 + $0x20] sm:$0xff]  ;;  %v481_v43 = vld [vmem:[#allocation10 + $0x10] sm:$0xff] }
  0x88   :  { %v6120_v42 = vpack.c.bf16 %v486_v36, %v482_v35  ;;  %v485_v44 = vld [vmem:[#allocation10 + $0x30] sm:$0xff]  ;;  %v488_v45 = vld [vmem:[#allocation10 + $0x48] sm:$0xff]  ;;  %v123_v47 = vld [vmem:[#allocation5] sm:$0xff]  ;;  %v6122_v48 = vpack.c.bf16 %v483_v41, %v479_v40 }
  0x89   :  { %4327 = vmatpush1.bf16.msra.mxu0 %v4326_v13  ;;  %v492_v46 = vld [vmem:[#allocation10 + $0x68] sm:$0xff]  ;;  %v490_v49 = vld [vmem:[#allocation10 + $0x58] sm:$0xff]  ;;  %v6125_v51 = vpack.c.bf16 %v485_v44, %v481_v43  ;;  %v487_v52 = vld [vmem:[#allocation10 + $0x40] sm:$0xff] }
  0x8a   :  { %4359 = vmatpush1.bf16.msra.mxu1 %v4358_v14  ;;  %4329 = vmatprep.subr.bf16.mxu0 %v4328_v15  ;;  %v494_v50 = vld [vmem:[#allocation10 + $0x78] sm:$0xff]  ;;  %v491_v53 = vld [vmem:[#allocation10 + $0x60] sm:$0xff]  ;;  %v6128_v54 = vpack.c.bf16 %v492_v46, %v488_v45  ;;  %v489_v55 = vld [vmem:[#allocation10 + $0x50] sm:$0xff] }
  0x8b   :  { %4361 = vmatprep.subr.bf16.mxu1 %v4360_v19  ;;  %v493_v56 = vld [vmem:[#allocation10 + $0x70] sm:$0xff]  ;;  %v6130_v57 = vpack.c.bf16 %v494_v50, %v490_v49  ;;  %v496_v58 = vld [vmem:[#allocation10 + $0x88] sm:$0xff]  ;;  %v6133_v61 = vpack.c.bf16 %v491_v53, %v487_v52  ;;  %v498_v62 = vld [vmem:[#allocation10 + $0x98] sm:$0xff] }
  0x8c   :  { %v500_v59 = vld [vmem:[#allocation10 + $0xa8] sm:$0xff]  ;;  %v502_v63 = vld [vmem:[#allocation10 + $0xb8] sm:$0xff]  ;;  %v6137_v0 = vpack.c.bf16 %v493_v56, %v489_v55  ;;  %v495_v2 = vld [vmem:[#allocation10 + $0x80] sm:$0xff] }
  0x8d   :  { %4331 = vmatpush1.bf16.msra.mxu0 %v4330_v25  ;;  %v124_v60 = vld [vmem:[#allocation5 + $0x8] sm:$0xff]  ;;  %v499_v3 = vld [vmem:[#allocation10 + $0xa0] sm:$0xff]  ;;  %v6141_v4 = vpack.c.bf16 %v500_v59, %v496_v58  ;;  %v497_v5 = vld [vmem:[#allocation10 + $0x90] sm:$0xff]  ;;  %v6144_v7 = vpack.c.bf16 %v502_v63, %v498_v62 }
  0x8e   :  { %4363 = vmatpush1.bf16.msra.mxu1 %v4362_v26  ;;  %4333 = vmatprep.subr.bf16.mxu0 %v4332_v27  ;;  %v501_v6 = vld [vmem:[#allocation10 + $0xb0] sm:$0xff]  ;;  %v504_v8 = vld [vmem:[#allocation10 + $0xc8] sm:$0xff]  ;;  %v6147_v11 = vpack.c.bf16 %v499_v3, %v495_v2  ;;  %v506_v12 = vld [vmem:[#allocation10 + $0xd8] sm:$0xff] }
  0x8f   :  { %4365 = vmatprep.subr.bf16.mxu1 %v4364_v31  ;;  %v508_v9 = vld [vmem:[#allocation10 + $0xe8] sm:$0xff]  ;;  %v125_v10 = vld [vmem:[#allocation5 + $0x10] sm:$0xff]  ;;  %v510_v13 = vld [vmem:[#allocation10 + $0xf8] sm:$0xff]  ;;  %v6151_v14 = vpack.c.bf16 %v501_v6, %v497_v5 }
  0x90   :  { %v503_v15 = vld [vmem:[#allocation10 + $0xc0] sm:$0xff]  ;;  %v6155_v17 = vpack.c.bf16 %v508_v9, %v504_v8  ;;  %v505_v18 = vld [vmem:[#allocation10 + $0xd0] sm:$0xff]  ;;  %v6158_v20 = vpack.c.bf16 %v510_v13, %v506_v12  ;;  %v512_v21 = vld [vmem:[#allocation10 + $0x108] sm:$0xff] }
  0x91   :  { %4335 = vmatpush1.bf16.msra.mxu0 %v4334_v37  ;;  %v507_v16 = vld [vmem:[#allocation10 + $0xe0] sm:$0xff]  ;;  %v509_v19 = vld [vmem:[#allocation10 + $0xf0] sm:$0xff]  ;;  %v516_v22 = vld [vmem:[#allocation10 + $0x128] sm:$0xff] }
  0x92   :  { %4367 = vmatpush1.bf16.msra.mxu1 %v4366_v38  ;;  %4369 = vmatprep.subr.bf16.mxu0 %v6118_v39  ;;  %v126_v23 = vld [vmem:[#allocation5 + $0x18] sm:$0xff]  ;;  %v6161_v24 = vpack.c.bf16 %v507_v16, %v503_v15  ;;  %v6165_v27 = vpack.c.bf16 %v509_v19, %v505_v18  ;;  %v511_v28 = vld [vmem:[#allocation10 + $0x100] sm:$0xff]  ;;  %v6169_v30 = vpack.c.bf16 %v516_v22, %v512_v21  ;;  %v513_v31 = vld [vmem:[#allocation10 + $0x110] sm:$0xff] }
  0x93   :  { %4401 = vmatprep.subr.bf16.mxu1 %v6120_v42  ;;  %v514_v25 = vld [vmem:[#allocation10 + $0x118] sm:$0xff]  ;;  %v515_v29 = vld [vmem:[#allocation10 + $0x120] sm:$0xff]  ;;  %v517_v32 = vld [vmem:[#allocation10 + $0x130] sm:$0xff] }
  0x94   :  { %282 = vmatmul.mubr.f32.vlgmr.msra.gmra.mrb[0].mxu0 %v123_v47  ;;  %v518_v26 = vld [vmem:[#allocation10 + $0x138] sm:$0xff]  ;;  %v520_v34 = vld [vmem:[#allocation10 + $0x148] sm:$0xff]  ;;  %v127_v36 = vld [vmem:[#allocation5 + $0x20] sm:$0xff]  ;;  %v6175_v37 = vpack.c.bf16 %v515_v29, %v511_v28  ;;  %v6179_v41 = vpack.c.bf16 %v517_v32, %v513_v31  ;;  %v197_v29 = vlaneseq }
  0x95   :  { %395 = vmatmul.mubr.f32.vlgmr.msra.gmra.mrb[0].mxu1 %v123_v47  ;;  %4371 = vmatpush1.bf16.msra.mxu0 %v6122_v48  ;;  %v6172_v33 = vpack.c.bf16 %v518_v26, %v514_v25  ;;  %v524_v35 = vld [vmem:[#allocation10 + $0x168] sm:$0xff]  ;;  %v522_v38 = vld [vmem:[#allocation10 + $0x158] sm:$0xff]  ;;  %v519_v43 = vld [vmem:[#allocation10 + $0x140] sm:$0xff] }
  0x96   :  { %4403 = vmatpush1.bf16.msra.mxu1 %v6125_v51  ;;  %287 = vmatprep.mubr.f32.mxu0 %v5958_v1  ;;  %v526_v40 = vld [vmem:[#allocation10 + $0x178] sm:$0xff]  ;;  %v523_v44 = vld [vmem:[#allocation10 + $0x160] sm:$0xff]  ;;  %v6183_v45 = vpack.c.bf16 %v524_v35, %v520_v34  ;;  %v521_v46 = vld [vmem:[#allocation10 + $0x150] sm:$0xff]  ;;  %v6268_v31 = vshrl.u32 %v197_v29, 7 }
  0x97   :  { %400 = vmatprep.mubr.f32.mxu1 %v5958_v1  ;;  %4373 = vmatprep.subr.bf16.mxu0 %v6128_v54  ;;  %v525_v47 = vld [vmem:[#allocation10 + $0x170] sm:$0xff]  ;;  %v6186_v49 = vpack.c.bf16 %v526_v40, %v522_v38  ;;  %v528_v50 = vld [vmem:[#allocation10 + $0x188] sm:$0xff]  ;;  %v6189_v55 = vpack.c.bf16 %v523_v44, %v519_v43  ;;  %v530_v56 = vld [vmem:[#allocation10 + $0x198] sm:$0xff] }
  0x98   :  { %288 = vmatmul.mubr.f32.gmra.mrb[2].mxu0 %v124_v60  ;;  %4405 = vmatprep.subr.bf16.mxu1 %v6130_v57  ;;  %v532_v52 = vld [vmem:[#allocation10 + $0x1a8] sm:$0xff]  ;;  %v534_v58 = vld [vmem:[#allocation10 + $0x1b8] sm:$0xff]  ;;  %v6193_v59 = vpack.c.bf16 %v525_v47, %v521_v46  ;;  %v531_v62 = vld [vmem:[#allocation10 + $0x1a0] sm:$0xff]  ;;  %v199_v32 = vsub.s32 0, %v6268_v31  ;;  %v203_v35 = vsub.s32 1, %v6268_v31  ;;  %v207_v38 = vsub.s32 2, %v6268_v31 }
  0x99   :  { %401 = vmatmul.mubr.f32.gmra.mrb[2].mxu1 %v124_v60  ;;  %4375 = vmatpush1.bf16.msra.mxu0 %v6133_v61  ;;  %v128_v53 = vld [vmem:[#allocation5 + $0x28] sm:$0xff]  ;;  %v527_v60 = vld [vmem:[#allocation10 + $0x180] sm:$0xff]  ;;  %v6197_v63 = vpack.c.bf16 %v532_v52, %v528_v50  ;;  %v529_v2 = vld [vmem:[#allocation10 + $0x190] sm:$0xff]  ;;  %v6200_v5 = vpack.c.bf16 %v534_v58, %v530_v56  ;;  %v211_v47 = vsub.s32 3, %v6268_v31 }
  0x9a   :  { %4407 = vmatpush1.bf16.msra.mxu1 %v6137_v0  ;;  %293 = vmatprep.mubr.f32.mxu0 %v5958_v1  ;;  %v533_v3 = vld [vmem:[#allocation10 + $0x1b0] sm:$0xff]  ;;  %v536_v6 = vld [vmem:[#allocation10 + $0x1c8] sm:$0xff]  ;;  %v538_v12 = vld [vmem:[#allocation10 + $0x1d8] sm:$0xff] }
  0x9b   :  { %406 = vmatprep.mubr.f32.mxu1 %v5958_v1  ;;  %4377 = vmatprep.subr.bf16.mxu0 %v6141_v4  ;;  %v540_v8 = vld [vmem:[#allocation10 + $0x1e8] sm:$0xff]  ;;  %v129_v9 = vld [vmem:[#allocation5 + $0x30] sm:$0xff]  ;;  %v542_v13 = vld [vmem:[#allocation10 + $0x1f8] sm:$0xff]  ;;  %v6207_v15 = vpack.c.bf16 %v533_v3, %v529_v2 }
  0x9c   :  { %294 = vmatmul.mubr.f32.gmra.mrb[4].mxu0 %v125_v10  ;;  %4409 = vmatprep.subr.bf16.mxu1 %v6144_v7  ;;  %v535_v16 = vld [vmem:[#allocation10 + $0x1c0] sm:$0xff]  ;;  %v6211_v19 = vpack.c.bf16 %v540_v8, %v536_v6  ;;  %v537_v21 = vld [vmem:[#allocation10 + $0x1d0] sm:$0xff]  ;;  %v130_v25 = vld [vmem:[#allocation5 + $0x38] sm:$0xff] }
  0x9d   :  { %407 = vmatmul.mubr.f32.gmra.mrb[4].mxu1 %v125_v10  ;;  %4379 = vmatpush1.bf16.msra.mxu0 %v6147_v11  ;;  %v6203_v10 = vpack.c.bf16 %v531_v62, %v527_v60  ;;  %v539_v18 = vld [vmem:[#allocation10 + $0x1e0] sm:$0xff]  ;;  %v541_v22 = vld [vmem:[#allocation10 + $0x1f0] sm:$0xff] }
  0x9e   :  { %4411 = vmatpush1.bf16.msra.mxu1 %v6151_v14  ;;  %299 = vmatprep.mubr.f32.mxu0 %v5958_v1  ;;  %v6217_v26 = vpack.c.bf16 %v539_v18, %v535_v16  ;;  %v6221_v28 = vpack.c.bf16 %v541_v22, %v537_v21  ;;  %v195_v34 = vld [vmem:[%s7108_s3] sm:$0xf] }
  0x9f   :  { %412 = vmatprep.mubr.f32.mxu1 %v5958_v1  ;;  %4381 = vmatprep.subr.bf16.mxu0 %v6155_v17  ;;  %v6287_v43 = vrot.slane %v195_v34, %v207_v38  ;;  %v6294_v60 = vrot.slane %v195_v34, %v211_v47 }
  0xa0   :  { %300 = vmatmul.mubr.f32.gmra.mrb[6].mxu0 %v126_v23  ;;  %4413 = vmatprep.subr.bf16.mxu1 %v6158_v20 }
  0xa1   :  { %413 = vmatmul.mubr.f32.gmra.mrb[6].mxu1 %v126_v23  ;;  %4383 = vmatpush1.bf16.msra.mxu0 %v6161_v24  ;;  %v6214_v23 = vpack.c.bf16 %v542_v13, %v538_v12 }
  0xa2   :  { %4415 = vmatpush1.bf16.msra.mxu1 %v6165_v27  ;;  %305 = vmatprep.mubr.f32.mxu0 %v5958_v1 }
  0xa3   :  { %418 = vmatprep.mubr.f32.mxu1 %v5958_v1  ;;  %4385 = vmatprep.subr.bf16.mxu0 %v6169_v30 }
  0xa4   :  { %306 = vmatmul.mubr.f32.gmra.mrb[8].mxu0 %v127_v36  ;;  %4417 = vmatprep.subr.bf16.mxu1 %v6172_v33 }
  0xa5   :  { %419 = vmatmul.mubr.f32.gmra.mrb[8].mxu1 %v127_v36  ;;  %4387 = vmatpush1.bf16.msra.mxu0 %v6175_v37  ;;  %v6277_v36 = vrot.slane %v195_v34, %v199_v32 }
  0xa6   :  { %4419 = vmatpush1.bf16.msra.mxu1 %v6179_v41  ;;  %311 = vmatprep.mubr.f32.mxu0 %v5958_v1 }
  0xa7   :  { %424 = vmatprep.mubr.f32.mxu1 %v5958_v1  ;;  %4389 = vmatprep.subr.bf16.mxu0 %v6183_v45 }
  0xa8   :  { %312 = vmatmul.mubr.f32.gmra.mrb[10].mxu0 %v128_v53  ;;  %4421 = vmatprep.subr.bf16.mxu1 %v6186_v49 }
  0xa9   :  { %425 = vmatmul.mubr.f32.gmra.mrb[10].mxu1 %v128_v53  ;;  %4391 = vmatpush1.bf16.msra.mxu0 %v6189_v55 }
  0xaa   :  { %4423 = vmatpush1.bf16.msra.mxu1 %v6193_v59  ;;  %317 = vmatprep.mubr.f32.mxu0 %v5958_v1 }
  0xab   :  { %430 = vmatprep.mubr.f32.mxu1 %v5958_v1  ;;  %4393 = vmatprep.subr.bf16.mxu0 %v6197_v63 }
  0xac   :  { %318 = vmatmul.mubr.f32.gmra.mrb[12].mxu0 %v129_v9  ;;  %4425 = vmatprep.subr.bf16.mxu1 %v6200_v5 }
  0xad   :  { %431 = vmatmul.mubr.f32.gmra.mrb[12].mxu1 %v129_v9  ;;  %4395 = vmatpush1.bf16.msra.mxu0 %v6203_v10 }
  0xae   :  { %4427 = vmatpush1.bf16.msra.mxu1 %v6207_v15  ;;  %323 = vmatprep.mubr.f32.mxu0 %v5958_v1 }
  0xaf   :  { %436 = vmatprep.mubr.f32.mxu1 %v5958_v1  ;;  %4397 = vmatprep.subr.bf16.mxu0 %v6211_v19 }
  0xb0   :  { %324 = vmatmul.mubr.f32.gmra.mrb[14].mxu0 %v130_v25  ;;  %4429 = vmatprep.subr.bf16.mxu1 %v6214_v23 }
  0xb1   :  { %437 = vmatmul.mubr.f32.gmra.mrb[14].mxu1 %v130_v25  ;;  %4399 = vmatpush1.bf16.msra.mxu0 %v6217_v26 }
  0xb2   :  { %4431 = vmatpush1.bf16.msra.mxu1 %v6221_v28  ;;  %607 = vmatprep.mubr.f32.mxu0 %v5958_v1 }
  0xb3   :  { %678 = vmatprep.mubr.f32.mxu1 %v5958_v1  ;;  %4433 = vmatprep.subr.bf16.mxu0 %v6118_v39 }
  0xb4   :  { %608 = vmatmul.mubr.f32.vlgmr.msra.gmra.mrb[0].mxu0 %v5958_v1  ;;  %4465 = vmatprep.subr.bf16.mxu1 %v6120_v42 }
  0xb5   :  { %679 = vmatmul.mubr.f32.vlgmr.msra.gmra.mrb[0].mxu1 %v5958_v1  ;;  %4435 = vmatpush1.bf16.msra.mxu0 %v6122_v48 }
  0xb6   :  { %4467 = vmatpush1.bf16.msra.mxu1 %v6125_v51  ;;  %4437 = vmatprep.subr.bf16.mxu0 %v6128_v54 }
  0xb7   :  { %4469 = vmatprep.subr.bf16.mxu1 %v6130_v57  ;;  %841 = vmatprep.mubr.f32.mxu0 %v5958_v1 }
  0xb8   :  { %912 = vmatprep.mubr.f32.mxu1 %v5958_v1 }
  0xb9   :  { %4439 = vmatpush1.bf16.msra.mxu0 %v6133_v61 }
  0xba   :  { %4471 = vmatpush1.bf16.msra.mxu1 %v6137_v0  ;;  %4441 = vmatprep.subr.bf16.mxu0 %v6141_v4 }
  0xbb   :  { %4473 = vmatprep.subr.bf16.mxu1 %v6144_v7 }
  0xbd   :  { %4443 = vmatpush1.bf16.msra.mxu0 %v6147_v11 }
  0xbe   :  { %4475 = vmatpush1.bf16.msra.mxu1 %v6151_v14  ;;  %4445 = vmatprep.subr.bf16.mxu0 %v6155_v17 }
  0xbf   :  { %4477 = vmatprep.subr.bf16.mxu1 %v6158_v20 }
  0xc1   :  { %4447 = vmatpush1.bf16.msra.mxu0 %v6161_v24 }
  0xc2   :  { %4479 = vmatpush1.bf16.msra.mxu1 %v6165_v27  ;;  %4449 = vmatprep.subr.bf16.mxu0 %v6169_v30 }
  0xc3   :  { %4481 = vmatprep.subr.bf16.mxu1 %v6172_v33 }
  0xc5   :  { %4451 = vmatpush1.bf16.msra.mxu0 %v6175_v37 }
  0xc6   :  { %4483 = vmatpush1.bf16.msra.mxu1 %v6179_v41  ;;  %4453 = vmatprep.subr.bf16.mxu0 %v6183_v45 }
  0xc7   :  { %4485 = vmatprep.subr.bf16.mxu1 %v6186_v49 }
  0xc9   :  { %4455 = vmatpush1.bf16.msra.mxu0 %v6189_v55 }
  0xca   :  { %4487 = vmatpush1.bf16.msra.mxu1 %v6193_v59  ;;  %4457 = vmatprep.subr.bf16.mxu0 %v6197_v63 }
  0xcb   :  { %4489 = vmatprep.subr.bf16.mxu1 %v6200_v5 }
  0xcd   :  { %4459 = vmatpush1.bf16.msra.mxu0 %v6203_v10 }
  0xce   :  { %4491 = vmatpush1.bf16.msra.mxu1 %v6207_v15  ;;  %4461 = vmatprep.subr.bf16.mxu0 %v6211_v19 }
  0xcf   :  { %4493 = vmatprep.subr.bf16.mxu1 %v6214_v23 }
  0xd1   :  { %4463 = vmatpush1.bf16.msra.mxu0 %v6217_v26 }
  0xd2   :  { %4495 = vmatpush1.bf16.msra.mxu1 %v6221_v28  ;;  %4497 = vmatprep.subr.bf16.mxu0 %v6118_v39  ;;  %v6282_v39 = vrot.slane %v195_v34, %v203_v35 }
  0xd3   :  { %4529 = vmatprep.subr.bf16.mxu1 %v6120_v42 }
 0x187   :  { %v609_v42 = vpop.f32.mrb[0].mxu0 }
 0x188   :  { %v5480_v40 = vadd.f32 %v609_v42, %v6277_v36  ;;  %v680_v44 = vpop.f32.mrb[0].mxu1  ;;  %v611_v46 = vpop.f32.mrb[1].mxu0 }
 0x189   :  { %v5481_v50 = vadd.f32 %v611_v46, %v6282_v39  ;;  %v682_v52 = vpop.f32.mrb[1].mxu1  ;;  %v5496_v58 = vadd.f32 %v680_v44, %v6287_v43 }
 0x18a   :  { %v689_v53 = vmul.f32 0.5, %v5480_v40  ;;  %v5497_v62 = vadd.f32 %v682_v52, %v6294_v60 }
 0x18b   :  { %v693_v56 = vmul.f32 0.5, %v5481_v50 }
 0x18c   :  { %5624 = vtanh.f32 %v689_v53  ;;  %v698_v2 = vmul.f32 0.5, %v5497_v62 }
 0x18d   :  { %5626 = vtanh.f32 %v693_v56 }
 0x18e   :  { %5628 = vtanh.f32 %v5496_v58 }
 0x18f   :  { %5630 = vtanh.f32 %v698_v2 }
 0x196   :  { %v5625_v3 = vpop.eup %5624 }
 0x197   :  { %v5627_v6 = vpop.eup %5626  ;;  %v691_v8 = vmul.f32 0.5, %v5625_v3 }
 0x198   :  { %v695_v9 = vmul.f32 0.5, %v5627_v6  ;;  %v5629_v13 = vpop.eup %5628 }
 0x199   :  { %v692_v12 = vadd.f32 0.5, %v691_v8  ;;  %v5631_v25 = vpop.eup %5630 }
 0x19a   :  { %v696_v16 = vadd.f32 0.5, %v695_v9  ;;  %v700_v29 = vmul.f32 0.5, %v5631_v25 }
 0x19b   :  { %v703_v18 = vmul.f32 %v5629_v13, %v692_v12 }
 0x19c   :  { %v702_v21 = vmul.f32 0.0, %v696_v16  ;;  %v701_v34 = vadd.f32 0.5, %v700_v29 }
 0x19e   :  { %v6297_v22 = vadd.f32 %v703_v18, %v702_v21 }
 0x1a0   :  { %5632 = vtanh.f32 %v6297_v22 }
 0x1aa   :  { %v5633_v42 = vpop.eup %5632 }
 0x1ab   :  { %v6300_v40 = vmul.f32 %v5633_v42, %v701_v34  ;;  %v1184_v34 = vld [vmem:[#allocation10 + $0x8] sm:$0xff]  ;;  %v1186_v42 = vld [vmem:[#allocation10 + $0x18] sm:$0xff] }
 0x1ad   :  { %842 = vmatmul.mubr.f32.vlgmr.msra.gmra.mrb[2].mxu0 %v6300_v40  ;;  %913 = vmatmul.mubr.f32.vlgmr.msra.gmra.mrb[2].mxu1 %v6300_v40 }
 0x1ae   :  { %4499 = vmatpush1.bf16.msra.mxu0 %v6122_v48  ;;  %4531 = vmatpush1.bf16.msra.mxu1 %v6125_v51 }
 0x1af   :  { %4501 = vmatprep.subr.bf16.mxu0 %v6128_v54  ;;  %4533 = vmatprep.subr.bf16.mxu1 %v6130_v57 }
 0x1b0   :  { %1076 = vmatprep.mubr.f32.mxu0 %v5958_v1  ;;  %1147 = vmatprep.mubr.f32.mxu1 %v5958_v1 }
 0x1b2   :  { %4503 = vmatpush1.bf16.msra.mxu0 %v6133_v61  ;;  %4535 = vmatpush1.bf16.msra.mxu1 %v6137_v0 }
 0x1b3   :  { %4505 = vmatprep.subr.bf16.mxu0 %v6141_v4  ;;  %4537 = vmatprep.subr.bf16.mxu1 %v6144_v7 }
 0x1b6   :  { %4507 = vmatpush1.bf16.msra.mxu0 %v6147_v11  ;;  %4539 = vmatpush1.bf16.msra.mxu1 %v6151_v14 }
 0x1b7   :  { %4509 = vmatprep.subr.bf16.mxu0 %v6155_v17  ;;  %4541 = vmatprep.subr.bf16.mxu1 %v6158_v20 }
 0x1ba   :  { %4511 = vmatpush1.bf16.msra.mxu0 %v6161_v24  ;;  %4543 = vmatpush1.bf16.msra.mxu1 %v6165_v27 }
 0x1bb   :  { %4513 = vmatprep.subr.bf16.mxu0 %v6169_v30  ;;  %4545 = vmatprep.subr.bf16.mxu1 %v6172_v33 }
 0x1be   :  { %4515 = vmatpush1.bf16.msra.mxu0 %v6175_v37  ;;  %4547 = vmatpush1.bf16.msra.mxu1 %v6179_v41 }
 0x1bf   :  { %4517 = vmatprep.subr.bf16.mxu0 %v6183_v45  ;;  %4549 = vmatprep.subr.bf16.mxu1 %v6186_v49 }
 0x1c2   :  { %4519 = vmatpush1.bf16.msra.mxu0 %v6189_v55  ;;  %4551 = vmatpush1.bf16.msra.mxu1 %v6193_v59 }
 0x1c3   :  { %4521 = vmatprep.subr.bf16.mxu0 %v6197_v63  ;;  %4553 = vmatprep.subr.bf16.mxu1 %v6200_v5 }
 0x1c6   :  { %4523 = vmatpush1.bf16.msra.mxu0 %v6203_v10  ;;  %4555 = vmatpush1.bf16.msra.mxu1 %v6207_v15 }
 0x1c7   :  { %4525 = vmatprep.subr.bf16.mxu0 %v6211_v19  ;;  %4557 = vmatprep.subr.bf16.mxu1 %v6214_v23 }
 0x1ca   :  { %4527 = vmatpush1.bf16.msra.mxu0 %v6217_v26  ;;  %4559 = vmatpush1.bf16.msra.mxu1 %v6221_v28 }
 0x280   :  { %v843_v48 = vpop.f32.mrb[2].mxu0  ;;  %v914_v51 = vpop.f32.mrb[2].mxu1 }
 0x281   :  { %v5482_v54 = vadd.f32 %v843_v48, %v6277_v36  ;;  %v845_v57 = vpop.f32.mrb[3].mxu0  ;;  %v916_v61 = vpop.f32.mrb[3].mxu1  ;;  %v5498_v50 = vadd.f32 %v914_v51, %v6287_v43  ;;  %v1190_v51 = vld [vmem:[#allocation10 + $0x38] sm:$0xff] }
 0x282   :  { %v5483_v0 = vadd.f32 %v845_v57, %v6282_v39  ;;  %v5499_v52 = vadd.f32 %v916_v61, %v6294_v60  ;;  %v1187_v57 = vld [vmem:[#allocation10 + $0x20] sm:$0xff]  ;;  %v6352_v61 = vpack.c.bf16 %v1190_v51, %v1186_v42  ;;  %v1441_v42 = vld [vmem:[#allocation10 + $0xb8] sm:$0xff] }
 0x283   :  { %v923_v44 = vmul.f32 0.5, %v5482_v54  ;;  %v1183_v54 = vld [vmem:[#allocation10] sm:$0xff] }
 0x284   :  { %v927_v46 = vmul.f32 0.5, %v5483_v0  ;;  %v932_v53 = vmul.f32 0.5, %v5499_v52  ;;  %v6354_v0 = vpack.c.bf16 %v1187_v57, %v1183_v54  ;;  %4593 = vmatprep.subr.bf16.mxu1 %v6352_v61  ;;  %v1192_v52 = vld [vmem:[#allocation10 + $0x48] sm:$0xff]  ;;  %v1434_v51 = vld [vmem:[#allocation10 + $0x80] sm:$0xff] }
 0x285   :  { %5634 = vtanh.f32 %v923_v44  ;;  %v1185_v44 = vld [vmem:[#allocation10 + $0x10] sm:$0xff]  ;;  %v1438_v54 = vld [vmem:[#allocation10 + $0xa0] sm:$0xff] }
 0x286   :  { %5636 = vtanh.f32 %v927_v46  ;;  %v1189_v46 = vld [vmem:[#allocation10 + $0x30] sm:$0xff] }
 0x287   :  { %5638 = vtanh.f32 %v5498_v50  ;;  %v6357_v50 = vpack.c.bf16 %v1189_v46, %v1185_v44  ;;  %v6424_v44 = vpack.c.bf16 %v1438_v54, %v1434_v51  ;;  %v1436_v46 = vld [vmem:[#allocation10 + $0x90] sm:$0xff] }
 0x288   :  { %5640 = vtanh.f32 %v932_v53  ;;  %v1196_v53 = vld [vmem:[#allocation10 + $0x68] sm:$0xff]  ;;  %v1464_v51 = vld [vmem:[#allocation10 + $0x170] sm:$0xff] }
 0x28f   :  { %v5635_v56 = vpop.eup %5634 }
 0x290   :  { %v5637_v58 = vpop.eup %5636  ;;  %v925_v62 = vmul.f32 0.5, %v5635_v56  ;;  %v1194_v56 = vld [vmem:[#allocation10 + $0x58] sm:$0xff] }
 0x291   :  { %v929_v2 = vmul.f32 0.5, %v5637_v58  ;;  %v5639_v6 = vpop.eup %5638  ;;  %v6362_v58 = vpack.c.bf16 %v1196_v53, %v1192_v52  ;;  %v1440_v52 = vld [vmem:[#allocation10 + $0xb0] sm:$0xff] }
 0x292   :  { %v926_v3 = vadd.f32 0.5, %v925_v62  ;;  %v5641_v16 = vpop.eup %5640  ;;  %v1198_v62 = vld [vmem:[#allocation10 + $0x78] sm:$0xff]  ;;  %v6427_v53 = vpack.c.bf16 %v1440_v52, %v1436_v46  ;;  %v1467_v46 = vld [vmem:[#allocation10 + $0x188] sm:$0xff] }
 0x293   :  { %v930_v8 = vadd.f32 0.5, %v929_v2  ;;  %v934_v18 = vmul.f32 0.5, %v5641_v16  ;;  %v1191_v2 = vld [vmem:[#allocation10 + $0x40] sm:$0xff]  ;;  %v1471_v52 = vld [vmem:[#allocation10 + $0x1a8] sm:$0xff] }
 0x294   :  { %v937_v9 = vmul.f32 %v5639_v6, %v926_v3  ;;  %v1195_v3 = vld [vmem:[#allocation10 + $0x60] sm:$0xff]  ;;  %v6364_v6 = vpack.c.bf16 %v1198_v62, %v1194_v56  ;;  %v1443_v56 = vld [vmem:[#allocation10 + $0xc8] sm:$0xff] }
 0x295   :  { %v936_v12 = vmul.f32 %v930_v8, %v6297_v22  ;;  %v935_v21 = vadd.f32 0.5, %v934_v18  ;;  %v1188_v22 = vld [vmem:[#allocation10 + $0x28] sm:$0xff]  ;;  %v6366_v8 = vpack.c.bf16 %v1195_v3, %v1191_v2  ;;  %v1445_v2 = vld [vmem:[#allocation10 + $0xd8] sm:$0xff] }
 0x296   :  { %v6350_v48 = vpack.c.bf16 %v1188_v22, %v1184_v34  ;;  %v1437_v34 = vld [vmem:[#allocation10 + $0x98] sm:$0xff]  ;;  %v1447_v62 = vld [vmem:[#allocation10 + $0xe8] sm:$0xff] }
 0x297   :  { %v6341_v13 = vadd.f32 %v937_v9, %v936_v12  ;;  %v1193_v9 = vld [vmem:[#allocation10 + $0x50] sm:$0xff]  ;;  %v6422_v57 = vpack.c.bf16 %v1441_v42, %v1437_v34  ;;  %v6432_v3 = vpack.c.bf16 %v1447_v62, %v1443_v56  ;;  %v1469_v56 = vld [vmem:[#allocation10 + $0x198] sm:$0xff]  ;;  %v6468_v62 = vpack.c.bf16 %v1471_v52, %v1467_v46 }
 0x298   :  { %4561 = vmatprep.subr.bf16.mxu0 %v6350_v48  ;;  %v1197_v12 = vld [vmem:[#allocation10 + $0x70] sm:$0xff] }
 0x299   :  { %5642 = vtanh.f32 %v6341_v13  ;;  %v6369_v16 = vpack.c.bf16 %v1197_v12, %v1193_v9  ;;  %v1449_v9 = vld [vmem:[#allocation10 + $0xf8] sm:$0xff]  ;;  %v1442_v12 = vld [vmem:[#allocation10 + $0xc0] sm:$0xff]  ;;  %v1460_v42 = vld [vmem:[#allocation10 + $0x150] sm:$0xff] }
 0x29a   :  { %v6463_v54 = vpack.c.bf16 %v1464_v51, %v1460_v42 }
 0x2a3   :  { %v5643_v25 = vpop.eup %5642 }
 0x2a4   :  { %v6344_v29 = vmul.f32 %v5643_v25, %v935_v21  ;;  %v1439_v25 = vld [vmem:[#allocation10 + $0xa8] sm:$0xff] }
 0x2a6   :  { %1077 = vmatmul.mubr.f32.vlgmr.msra.gmra.mrb[4].mxu0 %v6344_v29  ;;  %1148 = vmatmul.mubr.f32.vlgmr.msra.gmra.mrb[4].mxu1 %v6344_v29 }
 0x2a7   :  { %1311 = vmatprep.mubr.f32.mxu0 %v5958_v1  ;;  %1382 = vmatprep.mubr.f32.mxu1 %v5958_v1 }
 0x2a8   :  { %4563 = vmatpush1.bf16.msra.mxu0 %v6354_v0  ;;  %4595 = vmatpush1.bf16.msra.mxu1 %v6357_v50 }
 0x2a9   :  { %4565 = vmatprep.subr.bf16.mxu0 %v6362_v58  ;;  %4597 = vmatprep.subr.bf16.mxu1 %v6364_v6 }
 0x2ac   :  { %4567 = vmatpush1.bf16.msra.mxu0 %v6366_v8  ;;  %4599 = vmatpush1.bf16.msra.mxu1 %v6369_v16 }
 0x2ad   :  { %4569 = vmatprep.subr.bf16.mxu0 %v6141_v4  ;;  %4601 = vmatprep.subr.bf16.mxu1 %v6144_v7 }
 0x2b0   :  { %4571 = vmatpush1.bf16.msra.mxu0 %v6147_v11  ;;  %4603 = vmatpush1.bf16.msra.mxu1 %v6151_v14 }
 0x2b1   :  { %4573 = vmatprep.subr.bf16.mxu0 %v6155_v17  ;;  %4605 = vmatprep.subr.bf16.mxu1 %v6158_v20 }
 0x2b4   :  { %4575 = vmatpush1.bf16.msra.mxu0 %v6161_v24  ;;  %4607 = vmatpush1.bf16.msra.mxu1 %v6165_v27 }
 0x2b5   :  { %4577 = vmatprep.subr.bf16.mxu0 %v6169_v30  ;;  %4609 = vmatprep.subr.bf16.mxu1 %v6172_v33 }
 0x2b8   :  { %4579 = vmatpush1.bf16.msra.mxu0 %v6175_v37  ;;  %4611 = vmatpush1.bf16.msra.mxu1 %v6179_v41 }
 0x2b9   :  { %4581 = vmatprep.subr.bf16.mxu0 %v6183_v45  ;;  %4613 = vmatprep.subr.bf16.mxu1 %v6186_v49 }
 0x2bc   :  { %4583 = vmatpush1.bf16.msra.mxu0 %v6189_v55  ;;  %4615 = vmatpush1.bf16.msra.mxu1 %v6193_v59 }
 0x2bd   :  { %4585 = vmatprep.subr.bf16.mxu0 %v6197_v63  ;;  %4617 = vmatprep.subr.bf16.mxu1 %v6200_v5 }
 0x2c0   :  { %4587 = vmatpush1.bf16.msra.mxu0 %v6203_v10  ;;  %4619 = vmatpush1.bf16.msra.mxu1 %v6207_v15 }
 0x2c1   :  { %4589 = vmatprep.subr.bf16.mxu0 %v6211_v19  ;;  %4621 = vmatprep.subr.bf16.mxu1 %v6214_v23 }
 0x2c4   :  { %4591 = vmatpush1.bf16.msra.mxu0 %v6217_v26  ;;  %4623 = vmatpush1.bf16.msra.mxu1 %v6221_v28 }
 0x2c5   :  { %4625 = vmatprep.subr.bf16.mxu0 %v6350_v48  ;;  %4657 = vmatprep.subr.bf16.mxu1 %v6352_v61 }
 0x379   :  { %v1078_v4 = vpop.f32.mrb[4].mxu0  ;;  %v1149_v7 = vpop.f32.mrb[4].mxu1 }
 0x37a   :  { %v5484_v11 = vadd.f32 %v1078_v4, %v6277_v36  ;;  %v1080_v14 = vpop.f32.mrb[5].mxu0  ;;  %v1151_v17 = vpop.f32.mrb[5].mxu1  ;;  %v5500_v30 = vadd.f32 %v1149_v7, %v6287_v43  ;;  %v1446_v4 = vld [vmem:[#allocation10 + $0xe0] sm:$0xff]  ;;  %v6434_v7 = vpack.c.bf16 %v1449_v9, %v1445_v2  ;;  %v1473_v2 = vld [vmem:[#allocation10 + $0x1b8] sm:$0xff] }
 0x37b   :  { %v5485_v20 = vadd.f32 %v1080_v14, %v6282_v39  ;;  %v5501_v33 = vadd.f32 %v1151_v17, %v6294_v60  ;;  %v1444_v14 = vld [vmem:[#allocation10 + $0xd0] sm:$0xff]  ;;  %v1466_v9 = vld [vmem:[#allocation10 + $0x180] sm:$0xff] }
 0x37c   :  { %v1158_v24 = vmul.f32 0.5, %v5484_v11  ;;  %v6436_v11 = vpack.c.bf16 %v1446_v4, %v1442_v12  ;;  %v1448_v17 = vld [vmem:[#allocation10 + $0xf0] sm:$0xff]  ;;  %v1470_v12 = vld [vmem:[#allocation10 + $0x1a0] sm:$0xff]  ;;  %v6470_v4 = vpack.c.bf16 %v1473_v2, %v1469_v56 }
 0x37d   :  { %v1162_v27 = vmul.f32 0.5, %v5485_v20  ;;  %v1167_v37 = vmul.f32 0.5, %v5501_v33  ;;  %v6439_v20 = vpack.c.bf16 %v1448_v17, %v1444_v14  ;;  %v6472_v14 = vpack.c.bf16 %v1470_v12, %v1466_v9  ;;  %v1468_v17 = vld [vmem:[#allocation10 + $0x190] sm:$0xff] }
 0x37e   :  { %5644 = vtanh.f32 %v1158_v24  ;;  %v1451_v24 = vld [vmem:[#allocation10 + $0x108] sm:$0xff] }
 0x37f   :  { %5646 = vtanh.f32 %v1162_v27  ;;  %v1455_v27 = vld [vmem:[#allocation10 + $0x128] sm:$0xff] }
 0x380   :  { %5648 = vtanh.f32 %v5500_v30  ;;  %v1453_v30 = vld [vmem:[#allocation10 + $0x118] sm:$0xff]  ;;  %v6444_v33 = vpack.c.bf16 %v1455_v27, %v1451_v24  ;;  %v1472_v24 = vld [vmem:[#allocation10 + $0x1b0] sm:$0xff] }
 0x381   :  { %5650 = vtanh.f32 %v1167_v37  ;;  %v1457_v37 = vld [vmem:[#allocation10 + $0x138] sm:$0xff]  ;;  %v6475_v27 = vpack.c.bf16 %v1472_v24, %v1468_v17 }
 0x388   :  { %v5645_v41 = vpop.eup %5644 }
 0x389   :  { %v5647_v45 = vpop.eup %5646  ;;  %v1160_v49 = vmul.f32 0.5, %v5645_v41  ;;  %v1450_v41 = vld [vmem:[#allocation10 + $0x100] sm:$0xff] }
 0x38a   :  { %v1164_v55 = vmul.f32 0.5, %v5647_v45  ;;  %v5649_v63 = vpop.eup %5648  ;;  %v1454_v45 = vld [vmem:[#allocation10 + $0x120] sm:$0xff] }
 0x38b   :  { %v1161_v59 = vadd.f32 0.5, %v1160_v49  ;;  %v5651_v23 = vpop.eup %5650  ;;  %v6446_v49 = vpack.c.bf16 %v1457_v37, %v1453_v30  ;;  %v1475_v30 = vld [vmem:[#allocation10 + $0x1c8] sm:$0xff] }
 0x38c   :  { %v1165_v5 = vadd.f32 0.5, %v1164_v55  ;;  %v1169_v26 = vmul.f32 0.5, %v5651_v23  ;;  %v6448_v55 = vpack.c.bf16 %v1454_v45, %v1450_v41  ;;  %v1461_v23 = vld [vmem:[#allocation10 + $0x158] sm:$0xff]  ;;  %v1479_v37 = vld [vmem:[#allocation10 + $0x1e8] sm:$0xff] }
 0x38d   :  { %v1172_v10 = vmul.f32 %v5649_v63, %v1161_v59  ;;  %v1452_v59 = vld [vmem:[#allocation10 + $0x110] sm:$0xff]  ;;  %v1477_v41 = vld [vmem:[#allocation10 + $0x1d8] sm:$0xff]  ;;  %v6480_v45 = vpack.c.bf16 %v1479_v37, %v1475_v30 }
 0x38e   :  { %v1171_v15 = vmul.f32 %v1165_v5, %v6341_v13  ;;  %v1170_v28 = vadd.f32 0.5, %v1169_v26  ;;  %v1435_v13 = vld [vmem:[#allocation10 + $0x88] sm:$0xff]  ;;  %v1456_v63 = vld [vmem:[#allocation10 + $0x130] sm:$0xff] }
 0x38f   :  { %v6420_v22 = vpack.c.bf16 %v1439_v25, %v1435_v13  ;;  %v6451_v5 = vpack.c.bf16 %v1456_v63, %v1452_v59  ;;  %v1462_v13 = vld [vmem:[#allocation10 + $0x160] sm:$0xff]  ;;  %v1481_v59 = vld [vmem:[#allocation10 + $0x1f8] sm:$0xff] }
 0x390   :  { %v6405_v19 = vadd.f32 %v1172_v10, %v1171_v15  ;;  %v1459_v10 = vld [vmem:[#allocation10 + $0x148] sm:$0xff]  ;;  %v1474_v63 = vld [vmem:[#allocation10 + $0x1c0] sm:$0xff] }
 0x391   :  { %v1463_v15 = vld [vmem:[#allocation10 + $0x168] sm:$0xff] }
 0x392   :  { %5652 = vtanh.f32 %v6405_v19  ;;  %v6456_v26 = vpack.c.bf16 %v1463_v15, %v1459_v10  ;;  %v1478_v10 = vld [vmem:[#allocation10 + $0x1e0] sm:$0xff]  ;;  %v6482_v15 = vpack.c.bf16 %v1481_v59, %v1477_v41 }
 0x39c   :  { %v5653_v18 = vpop.eup %5652 }
 0x39d   :  { %v6408_v21 = vmul.f32 %v5653_v18, %v1170_v28  ;;  %v1465_v28 = vld [vmem:[#allocation10 + $0x178] sm:$0xff]  ;;  %v1458_v18 = vld [vmem:[#allocation10 + $0x140] sm:$0xff] }
 0x39e   :  { %v6458_v25 = vpack.c.bf16 %v1465_v28, %v1461_v23  ;;  %v6460_v34 = vpack.c.bf16 %v1462_v13, %v1458_v18  ;;  %v6484_v23 = vpack.c.bf16 %v1478_v10, %v1474_v63  ;;  %v1476_v28 = vld [vmem:[#allocation10 + $0x1d0] sm:$0xff] }
 0x39f   :  { %1312 = vmatmul.mubr.f32.vlgmr.msra.gmra.mrb[6].mxu0 %v6408_v21  ;;  %1383 = vmatmul.mubr.f32.vlgmr.msra.gmra.mrb[6].mxu1 %v6408_v21  ;;  %v1480_v18 = vld [vmem:[#allocation10 + $0x1f0] sm:$0xff] }
 0x3a0   :  { %4627 = vmatpush1.bf16.msra.mxu0 %v6354_v0  ;;  %4659 = vmatpush1.bf16.msra.mxu1 %v6357_v50  ;;  %v6487_v13 = vpack.c.bf16 %v1480_v18, %v1476_v28 }
 0x3a1   :  { %4629 = vmatprep.subr.bf16.mxu0 %v6362_v58  ;;  %4661 = vmatprep.subr.bf16.mxu1 %v6364_v6 }
 0x3a2   :  { %1546 = vmatprep.mubr.f32.mxu0 %v5958_v1  ;;  %1617 = vmatprep.mubr.f32.mxu1 %v5958_v1 }
 0x3a4   :  { %4631 = vmatpush1.bf16.msra.mxu0 %v6366_v8  ;;  %4663 = vmatpush1.bf16.msra.mxu1 %v6369_v16 }
 0x3a5   :  { %4633 = vmatprep.subr.bf16.mxu0 %v6420_v22  ;;  %4665 = vmatprep.subr.bf16.mxu1 %v6422_v57 }
 0x3a8   :  { %4635 = vmatpush1.bf16.msra.mxu0 %v6424_v44  ;;  %4667 = vmatpush1.bf16.msra.mxu1 %v6427_v53 }
 0x3a9   :  { %4637 = vmatprep.subr.bf16.mxu0 %v6432_v3  ;;  %4669 = vmatprep.subr.bf16.mxu1 %v6434_v7 }
 0x3ac   :  { %4639 = vmatpush1.bf16.msra.mxu0 %v6436_v11  ;;  %4671 = vmatpush1.bf16.msra.mxu1 %v6439_v20 }
 0x3ad   :  { %4641 = vmatprep.subr.bf16.mxu0 %v6444_v33  ;;  %4673 = vmatprep.subr.bf16.mxu1 %v6446_v49 }
 0x3b0   :  { %4643 = vmatpush1.bf16.msra.mxu0 %v6448_v55  ;;  %4675 = vmatpush1.bf16.msra.mxu1 %v6451_v5 }
 0x3b1   :  { %4645 = vmatprep.subr.bf16.mxu0 %v6456_v26  ;;  %4677 = vmatprep.subr.bf16.mxu1 %v6458_v25 }
 0x3b4   :  { %4647 = vmatpush1.bf16.msra.mxu0 %v6460_v34  ;;  %4679 = vmatpush1.bf16.msra.mxu1 %v6463_v54 }
 0x3b5   :  { %4649 = vmatprep.subr.bf16.mxu0 %v6468_v62  ;;  %4681 = vmatprep.subr.bf16.mxu1 %v6470_v4 }
 0x3b8   :  { %4651 = vmatpush1.bf16.msra.mxu0 %v6472_v14  ;;  %4683 = vmatpush1.bf16.msra.mxu1 %v6475_v27 }
 0x3b9   :  { %4653 = vmatprep.subr.bf16.mxu0 %v6480_v45  ;;  %4685 = vmatprep.subr.bf16.mxu1 %v6482_v15 }
 0x3bc   :  { %4655 = vmatpush1.bf16.msra.mxu0 %v6484_v23  ;;  %4687 = vmatpush1.bf16.msra.mxu1 %v6487_v13 }
 0x3bd   :  { %4689 = vmatprep.subr.bf16.mxu0 %v6350_v48  ;;  %4721 = vmatprep.subr.bf16.mxu1 %v6352_v61 }
 0x472   :  { %v1313_v42 = vpop.f32.mrb[6].mxu0  ;;  %v1384_v51 = vpop.f32.mrb[6].mxu1 }
 0x473   :  { %v5486_v46 = vadd.f32 %v1313_v42, %v6277_v36  ;;  %v1315_v52 = vpop.f32.mrb[7].mxu0  ;;  %v1386_v56 = vpop.f32.mrb[7].mxu1  ;;  %v5502_v17 = vadd.f32 %v1384_v51, %v6287_v43 }
 0x474   :  { %v5487_v2 = vadd.f32 %v1315_v52, %v6282_v39  ;;  %v5503_v24 = vadd.f32 %v1386_v56, %v6294_v60 }
 0x475   :  { %v1393_v9 = vmul.f32 0.5, %v5486_v46 }
 0x476   :  { %v1397_v12 = vmul.f32 0.5, %v5487_v2  ;;  %v1402_v30 = vmul.f32 0.5, %v5503_v24 }
 0x477   :  { %5654 = vtanh.f32 %v1393_v9 }
 0x478   :  { %5656 = vtanh.f32 %v1397_v12 }
 0x479   :  { %5658 = vtanh.f32 %v5502_v17 }
 0x47a   :  { %5660 = vtanh.f32 %v1402_v30 }
 0x481   :  { %v5655_v37 = vpop.eup %5654 }
 0x482   :  { %v5657_v41 = vpop.eup %5656  ;;  %v1395_v59 = vmul.f32 0.5, %v5655_v37 }
 0x483   :  { %v1399_v63 = vmul.f32 0.5, %v5657_v41  ;;  %v5659_v28 = vpop.eup %5658 }
 0x484   :  { %v1396_v10 = vadd.f32 0.5, %v1395_v59  ;;  %v5661_v51 = vpop.eup %5660 }
 0x485   :  { %v1400_v18 = vadd.f32 0.5, %v1399_v63  ;;  %v1404_v2 = vmul.f32 0.5, %v5661_v51 }
 0x486   :  { %v1407_v42 = vmul.f32 %v5659_v28, %v1396_v10 }
 0x487   :  { %v1406_v46 = vmul.f32 %v1400_v18, %v6405_v19  ;;  %v1405_v9 = vadd.f32 0.5, %v1404_v2 }
 0x489   :  { %v6499_v52 = vadd.f32 %v1407_v42, %v1406_v46 }
 0x48b   :  { %5662 = vtanh.f32 %v6499_v52 }
 0x495   :  { %v5663_v56 = vpop.eup %5662 }
 0x496   :  { %v6502_v12 = vmul.f32 %v5663_v56, %v1405_v9 }
 0x498   :  { %1547 = vmatmul.mubr.f32.vlgmr.msra.gmra.mrb[8].mxu0 %v6502_v12  ;;  %1618 = vmatmul.mubr.f32.vlgmr.msra.gmra.mrb[8].mxu1 %v6502_v12 }
 0x499   :  { %4691 = vmatpush1.bf16.msra.mxu0 %v6354_v0  ;;  %4723 = vmatpush1.bf16.msra.mxu1 %v6357_v50 }
 0x49a   :  { %4693 = vmatprep.subr.bf16.mxu0 %v6362_v58  ;;  %4725 = vmatprep.subr.bf16.mxu1 %v6364_v6 }
 0x49b   :  { %1781 = vmatprep.mubr.f32.mxu0 %v5958_v1  ;;  %1852 = vmatprep.mubr.f32.mxu1 %v5958_v1 }
 0x49d   :  { %4695 = vmatpush1.bf16.msra.mxu0 %v6366_v8  ;;  %4727 = vmatpush1.bf16.msra.mxu1 %v6369_v16 }
 0x49e   :  { %4697 = vmatprep.subr.bf16.mxu0 %v6420_v22  ;;  %4729 = vmatprep.subr.bf16.mxu1 %v6422_v57 }
 0x4a1   :  { %4699 = vmatpush1.bf16.msra.mxu0 %v6424_v44  ;;  %4731 = vmatpush1.bf16.msra.mxu1 %v6427_v53 }
 0x4a2   :  { %4701 = vmatprep.subr.bf16.mxu0 %v6432_v3  ;;  %4733 = vmatprep.subr.bf16.mxu1 %v6434_v7 }
 0x4a5   :  { %4703 = vmatpush1.bf16.msra.mxu0 %v6436_v11  ;;  %4735 = vmatpush1.bf16.msra.mxu1 %v6439_v20 }
 0x4a6   :  { %4705 = vmatprep.subr.bf16.mxu0 %v6444_v33  ;;  %4737 = vmatprep.subr.bf16.mxu1 %v6446_v49 }
 0x4a9   :  { %4707 = vmatpush1.bf16.msra.mxu0 %v6448_v55  ;;  %4739 = vmatpush1.bf16.msra.mxu1 %v6451_v5 }
 0x4aa   :  { %4709 = vmatprep.subr.bf16.mxu0 %v6456_v26  ;;  %4741 = vmatprep.subr.bf16.mxu1 %v6458_v25 }
 0x4ad   :  { %4711 = vmatpush1.bf16.msra.mxu0 %v6460_v34  ;;  %4743 = vmatpush1.bf16.msra.mxu1 %v6463_v54 }
 0x4ae   :  { %4713 = vmatprep.subr.bf16.mxu0 %v6468_v62  ;;  %4745 = vmatprep.subr.bf16.mxu1 %v6470_v4 }
 0x4b1   :  { %4715 = vmatpush1.bf16.msra.mxu0 %v6472_v14  ;;  %4747 = vmatpush1.bf16.msra.mxu1 %v6475_v27 }
 0x4b2   :  { %4717 = vmatprep.subr.bf16.mxu0 %v6480_v45  ;;  %4749 = vmatprep.subr.bf16.mxu1 %v6482_v15 }
 0x4b5   :  { %4719 = vmatpush1.bf16.msra.mxu0 %v6484_v23  ;;  %4751 = vmatpush1.bf16.msra.mxu1 %v6487_v13 }
 0x4b6   :  { %4753 = vmatprep.subr.bf16.mxu0 %v6350_v48  ;;  %4785 = vmatprep.subr.bf16.mxu1 %v6352_v61 }
 0x56b   :  { %v1548_v19 = vpop.f32.mrb[8].mxu0  ;;  %v1619_v17 = vpop.f32.mrb[8].mxu1 }
 0x56c   :  { %v5488_v24 = vadd.f32 %v1548_v19, %v6277_v36  ;;  %v1550_v30 = vpop.f32.mrb[9].mxu0  ;;  %v1621_v37 = vpop.f32.mrb[9].mxu1  ;;  %v5504_v10 = vadd.f32 %v1619_v17, %v6287_v43 }
 0x56d   :  { %v5489_v41 = vadd.f32 %v1550_v30, %v6282_v39  ;;  %v5505_v28 = vadd.f32 %v1621_v37, %v6294_v60 }
 0x56e   :  { %v1628_v59 = vmul.f32 0.5, %v5488_v24 }
 0x56f   :  { %v1632_v63 = vmul.f32 0.5, %v5489_v41  ;;  %v1637_v48 = vmul.f32 0.5, %v5505_v28 }
 0x570   :  { %5664 = vtanh.f32 %v1628_v59 }
 0x571   :  { %5666 = vtanh.f32 %v1632_v63 }
 0x572   :  { %5668 = vtanh.f32 %v5504_v10 }
 0x573   :  { %5670 = vtanh.f32 %v1637_v48 }
 0x57a   :  { %v5665_v18 = vpop.eup %5664 }
 0x57b   :  { %v5667_v61 = vpop.eup %5666  ;;  %v1630_v42 = vmul.f32 0.5, %v5665_v18 }
 0x57c   :  { %v1634_v46 = vmul.f32 0.5, %v5667_v61  ;;  %v5669_v2 = vpop.eup %5668 }
 0x57d   :  { %v1631_v51 = vadd.f32 0.5, %v1630_v42  ;;  %v5671_v17 = vpop.eup %5670 }
 0x57e   :  { %v1635_v9 = vadd.f32 0.5, %v1634_v46  ;;  %v1639_v30 = vmul.f32 0.5, %v5671_v17 }
 0x57f   :  { %v1642_v56 = vmul.f32 %v5669_v2, %v1631_v51 }
 0x580   :  { %v1641_v19 = vmul.f32 %v1635_v9, %v6499_v52  ;;  %v1640_v41 = vadd.f32 0.5, %v1639_v30 }
 0x582   :  { %v6545_v24 = vadd.f32 %v1642_v56, %v1641_v19 }
 0x584   :  { %5672 = vtanh.f32 %v6545_v24 }
 0x58e   :  { %v5673_v37 = vpop.eup %5672 }
 0x58f   :  { %v6548_v59 = vmul.f32 %v5673_v37, %v1640_v41 }
 0x591   :  { %1782 = vmatmul.mubr.f32.vlgmr.msra.gmra.mrb[10].mxu0 %v6548_v59  ;;  %1853 = vmatmul.mubr.f32.vlgmr.msra.gmra.mrb[10].mxu1 %v6548_v59 }
 0x592   :  { %4755 = vmatpush1.bf16.msra.mxu0 %v6354_v0  ;;  %4787 = vmatpush1.bf16.msra.mxu1 %v6357_v50 }
 0x593   :  { %4757 = vmatprep.subr.bf16.mxu0 %v6362_v58  ;;  %4789 = vmatprep.subr.bf16.mxu1 %v6364_v6 }
 0x594   :  { %2016 = vmatprep.mubr.f32.mxu0 %v5958_v1  ;;  %2087 = vmatprep.mubr.f32.mxu1 %v5958_v1 }
 0x596   :  { %4759 = vmatpush1.bf16.msra.mxu0 %v6366_v8  ;;  %4791 = vmatpush1.bf16.msra.mxu1 %v6369_v16 }
 0x597   :  { %4761 = vmatprep.subr.bf16.mxu0 %v6420_v22  ;;  %4793 = vmatprep.subr.bf16.mxu1 %v6422_v57 }
 0x59a   :  { %4763 = vmatpush1.bf16.msra.mxu0 %v6424_v44  ;;  %4795 = vmatpush1.bf16.msra.mxu1 %v6427_v53 }
 0x59b   :  { %4765 = vmatprep.subr.bf16.mxu0 %v6432_v3  ;;  %4797 = vmatprep.subr.bf16.mxu1 %v6434_v7 }
 0x59e   :  { %4767 = vmatpush1.bf16.msra.mxu0 %v6436_v11  ;;  %4799 = vmatpush1.bf16.msra.mxu1 %v6439_v20 }
 0x59f   :  { %4769 = vmatprep.subr.bf16.mxu0 %v6444_v33  ;;  %4801 = vmatprep.subr.bf16.mxu1 %v6446_v49 }
 0x5a2   :  { %4771 = vmatpush1.bf16.msra.mxu0 %v6448_v55  ;;  %4803 = vmatpush1.bf16.msra.mxu1 %v6451_v5 }
 0x5a3   :  { %4773 = vmatprep.subr.bf16.mxu0 %v6456_v26  ;;  %4805 = vmatprep.subr.bf16.mxu1 %v6458_v25 }
 0x5a6   :  { %4775 = vmatpush1.bf16.msra.mxu0 %v6460_v34  ;;  %4807 = vmatpush1.bf16.msra.mxu1 %v6463_v54 }
 0x5a7   :  { %4777 = vmatprep.subr.bf16.mxu0 %v6468_v62  ;;  %4809 = vmatprep.subr.bf16.mxu1 %v6470_v4 }
 0x5aa   :  { %4779 = vmatpush1.bf16.msra.mxu0 %v6472_v14  ;;  %4811 = vmatpush1.bf16.msra.mxu1 %v6475_v27 }
 0x5ab   :  { %4781 = vmatprep.subr.bf16.mxu0 %v6480_v45  ;;  %4813 = vmatprep.subr.bf16.mxu1 %v6482_v15 }
 0x5ae   :  { %4783 = vmatpush1.bf16.msra.mxu0 %v6484_v23  ;;  %4815 = vmatpush1.bf16.msra.mxu1 %v6487_v13 }
 0x664   :  { %v1783_v0 = vpop.f32.mrb[10].mxu0  ;;  %v1854_v50 = vpop.f32.mrb[10].mxu1 }
 0x665   :  { %v5490_v58 = vadd.f32 %v1783_v0, %v6277_v36  ;;  %v1785_v6 = vpop.f32.mrb[11].mxu0  ;;  %v1856_v8 = vpop.f32.mrb[11].mxu1  ;;  %v5506_v10 = vadd.f32 %v1854_v50, %v6287_v43 }
 0x666   :  { %v5491_v16 = vadd.f32 %v1785_v6, %v6282_v39  ;;  %v5507_v28 = vadd.f32 %v1856_v8, %v6294_v60  ;;  %v2126_v6 = vld [vmem:[#allocation10 + $0x18] sm:$0xff] }
 0x667   :  { %v1863_v52 = vmul.f32 0.5, %v5490_v58  ;;  %v2124_v58 = vld [vmem:[#allocation10 + $0x8] sm:$0xff] }
 0x668   :  { %v1867_v63 = vmul.f32 0.5, %v5491_v16  ;;  %v1872_v48 = vmul.f32 0.5, %v5507_v28  ;;  %v2130_v16 = vld [vmem:[#allocation10 + $0x38] sm:$0xff] }
 0x669   :  { %5674 = vtanh.f32 %v1863_v52  ;;  %v2123_v52 = vld [vmem:[#allocation10] sm:$0xff] }
 0x66a   :  { %5676 = vtanh.f32 %v1867_v63  ;;  %v2127_v63 = vld [vmem:[#allocation10 + $0x20] sm:$0xff] }
 0x66b   :  { %5678 = vtanh.f32 %v5506_v10  ;;  %v4848_v10 = vpack.c.bf16 %v2130_v16, %v2126_v6  ;;  %v4818_v28 = vpack.c.bf16 %v2127_v63, %v2123_v52  ;;  %v2361_v63 = vld [vmem:[#allocation11] sm:$0xff] }
 0x66c   :  { %5680 = vtanh.f32 %v1872_v48  ;;  %v2125_v48 = vld [vmem:[#allocation10 + $0x10] sm:$0xff] }
 0x66d   :  { %4849 = vmatprep.subr.bf16.mxu1 %v4848_v10  ;;  %v2365_v10 = vld [vmem:[#allocation11 + $0x20] sm:$0xff] }
 0x673   :  { %v5675_v18 = vpop.eup %5674 }
 0x674   :  { %v5677_v61 = vpop.eup %5676  ;;  %v1865_v42 = vmul.f32 0.5, %v5675_v18  ;;  %v2129_v18 = vld [vmem:[#allocation10 + $0x30] sm:$0xff] }
 0x675   :  { %v1869_v46 = vmul.f32 0.5, %v5677_v61  ;;  %v5679_v2 = vpop.eup %5678  ;;  %v4850_v61 = vpack.c.bf16 %v2129_v18, %v2125_v48  ;;  %v2367_v48 = vld [vmem:[#allocation11 + $0x30] sm:$0xff]  ;;  %v2370_v18 = vld [vmem:[#allocation11 + $0x48] sm:$0xff] }
 0x676   :  { %v1866_v51 = vadd.f32 0.5, %v1865_v42  ;;  %v5681_v30 = vpop.eup %5680  ;;  %v2132_v42 = vld [vmem:[#allocation10 + $0x48] sm:$0xff] }
 0x677   :  { %v1870_v9 = vadd.f32 0.5, %v1869_v46  ;;  %v1874_v41 = vmul.f32 0.5, %v5681_v30  ;;  %v2136_v46 = vld [vmem:[#allocation10 + $0x68] sm:$0xff] }
 0x678   :  { %v1877_v56 = vmul.f32 %v5679_v2, %v1866_v51  ;;  %v2134_v51 = vld [vmem:[#allocation10 + $0x58] sm:$0xff]  ;;  %v4820_v2 = vpack.c.bf16 %v2136_v46, %v2132_v42 }
 0x679   :  { %v1876_v19 = vmul.f32 %v1870_v9, %v6545_v24  ;;  %v1875_v37 = vadd.f32 0.5, %v1874_v41  ;;  %v2128_v24 = vld [vmem:[#allocation10 + $0x28] sm:$0xff]  ;;  %v2138_v9 = vld [vmem:[#allocation10 + $0x78] sm:$0xff] }
 0x67a   :  { %v4816_v8 = vpack.c.bf16 %v2128_v24, %v2124_v58  ;;  %v4852_v30 = vpack.c.bf16 %v2138_v9, %v2134_v51  ;;  %v2372_v42 = vld [vmem:[#allocation11 + $0x58] sm:$0xff]  ;;  %v4882_v9 = vpack.c.bf16 %v2365_v10, %v2361_v63 }
 0x67b   :  { %v6589_v17 = vadd.f32 %v1877_v56, %v1876_v19  ;;  %v2131_v56 = vld [vmem:[#allocation10 + $0x40] sm:$0xff]  ;;  %v2376_v46 = vld [vmem:[#allocation11 + $0x78] sm:$0xff] }
 0x67c   :  { %4817 = vmatprep.subr.bf16.mxu0 %v4816_v8  ;;  %v2135_v19 = vld [vmem:[#allocation10 + $0x60] sm:$0xff] }
 0x67d   :  { %5682 = vtanh.f32 %v6589_v17  ;;  %v4822_v41 = vpack.c.bf16 %v2135_v19, %v2131_v56  ;;  %v2369_v19 = vld [vmem:[#allocation11 + $0x40] sm:$0xff] }
 0x687   :  { %v5683_v0 = vpop.eup %5682 }
 0x688   :  { %v6592_v50 = vmul.f32 %v5683_v0, %v1875_v37  ;;  %v2133_v37 = vld [vmem:[#allocation10 + $0x50] sm:$0xff] }
 0x689   :  { %v2137_v0 = vld [vmem:[#allocation10 + $0x70] sm:$0xff] }
 0x68a   :  { %2017 = vmatmul.mubr.f32.vlgmr.msra.gmra.mrb[12].mxu0 %v6592_v50  ;;  %2088 = vmatmul.mubr.f32.vlgmr.msra.gmra.mrb[12].mxu1 %v6592_v50  ;;  %v4854_v58 = vpack.c.bf16 %v2137_v0, %v2133_v37  ;;  %v4916_v37 = vpack.c.bf16 %v2376_v46, %v2372_v42  ;;  %v2371_v0 = vld [vmem:[#allocation11 + $0x50] sm:$0xff] }
 0x68b   :  { %2251 = vmatprep.mubr.f32.mxu0 %v5958_v1  ;;  %2322 = vmatprep.mubr.f32.mxu1 %v5958_v1  ;;  %v2395_v42 = vld [vmem:[#allocation11 + $0x110] sm:$0xff] }
 0x68c   :  { %4819 = vmatpush1.bf16.msra.mxu0 %v4818_v28  ;;  %4851 = vmatpush1.bf16.msra.mxu1 %v4850_v61  ;;  %v2363_v28 = vld [vmem:[#allocation11 + $0x10] sm:$0xff]  ;;  %v2374_v61 = vld [vmem:[#allocation11 + $0x68] sm:$0xff] }
 0x68d   :  { %4821 = vmatprep.subr.bf16.mxu0 %v4820_v2  ;;  %4853 = vmatprep.subr.bf16.mxu1 %v4852_v30  ;;  %v4914_v56 = vpack.c.bf16 %v2367_v48, %v2363_v28  ;;  %v2393_v28 = vld [vmem:[#allocation11 + $0x100] sm:$0xff]  ;;  %v2399_v46 = vld [vmem:[#allocation11 + $0x130] sm:$0xff] }
 0x68e   :  { %v2397_v48 = vld [vmem:[#allocation11 + $0x120] sm:$0xff] }
 0x690   :  { %4823 = vmatpush1.bf16.msra.mxu0 %v4822_v41  ;;  %4855 = vmatpush1.bf16.msra.mxu1 %v4854_v58  ;;  %v4884_v41 = vpack.c.bf16 %v2374_v61, %v2370_v18  ;;  %v2375_v58 = vld [vmem:[#allocation11 + $0x70] sm:$0xff] }
 0x691   :  { %4825 = vmatprep.subr.bf16.mxu0 %v6420_v22  ;;  %4857 = vmatprep.subr.bf16.mxu1 %v6422_v57  ;;  %v2362_v22 = vld [vmem:[#allocation11 + $0x8] sm:$0xff] }
 0x692   :  { %v2366_v57 = vld [vmem:[#allocation11 + $0x28] sm:$0xff] }
 0x694   :  { %4827 = vmatpush1.bf16.msra.mxu0 %v6424_v44  ;;  %4859 = vmatpush1.bf16.msra.mxu1 %v6427_v53  ;;  %v2364_v44 = vld [vmem:[#allocation11 + $0x18] sm:$0xff]  ;;  %v4880_v53 = vpack.c.bf16 %v2366_v57, %v2362_v22  ;;  %v2378_v22 = vld [vmem:[#allocation11 + $0x88] sm:$0xff] }
 0x695   :  { %4829 = vmatprep.subr.bf16.mxu0 %v6432_v3  ;;  %4861 = vmatprep.subr.bf16.mxu1 %v6434_v7  ;;  %v2368_v3 = vld [vmem:[#allocation11 + $0x38] sm:$0xff]  ;;  %v2382_v57 = vld [vmem:[#allocation11 + $0xa8] sm:$0xff] }
 0x696   :  { %v4912_v7 = vpack.c.bf16 %v2368_v3, %v2364_v44  ;;  %v2380_v44 = vld [vmem:[#allocation11 + $0x98] sm:$0xff] }
 0x698   :  { %4831 = vmatpush1.bf16.msra.mxu0 %v6436_v11  ;;  %4863 = vmatpush1.bf16.msra.mxu1 %v6439_v20 }
 0x699   :  { %4833 = vmatprep.subr.bf16.mxu0 %v6444_v33  ;;  %4865 = vmatprep.subr.bf16.mxu1 %v6446_v49 }
 0x69c   :  { %4835 = vmatpush1.bf16.msra.mxu0 %v6448_v55  ;;  %4867 = vmatpush1.bf16.msra.mxu1 %v6451_v5 }
 0x69d   :  { %4837 = vmatprep.subr.bf16.mxu0 %v6456_v26  ;;  %4869 = vmatprep.subr.bf16.mxu1 %v6458_v25 }
 0x6a0   :  { %4839 = vmatpush1.bf16.msra.mxu0 %v6460_v34  ;;  %4871 = vmatpush1.bf16.msra.mxu1 %v6463_v54 }
 0x6a1   :  { %4841 = vmatprep.subr.bf16.mxu0 %v6468_v62  ;;  %4873 = vmatprep.subr.bf16.mxu1 %v6470_v4 }
 0x6a4   :  { %4843 = vmatpush1.bf16.msra.mxu0 %v6472_v14  ;;  %4875 = vmatpush1.bf16.msra.mxu1 %v6475_v27 }
 0x6a5   :  { %4845 = vmatprep.subr.bf16.mxu0 %v6480_v45  ;;  %4877 = vmatprep.subr.bf16.mxu1 %v6482_v15 }
 0x6a8   :  { %4847 = vmatpush1.bf16.msra.mxu0 %v6484_v23  ;;  %4879 = vmatpush1.bf16.msra.mxu1 %v6487_v13 }
 0x6a9   :  { %4881 = vmatprep.subr.bf16.mxu0 %v4880_v53  ;;  %4913 = vmatprep.subr.bf16.mxu1 %v4912_v7  ;;  %v2384_v53 = vld [vmem:[#allocation11 + $0xb8] sm:$0xff]  ;;  %v4918_v7 = vpack.c.bf16 %v2375_v58, %v2371_v0 }
 0x75d   :  { %v2018_v11 = vpop.f32.mrb[12].mxu0  ;;  %v2089_v20 = vpop.f32.mrb[12].mxu1 }
 0x75e   :  { %v5492_v33 = vadd.f32 %v2018_v11, %v6277_v36  ;;  %v2020_v49 = vpop.f32.mrb[13].mxu0  ;;  %v2091_v55 = vpop.f32.mrb[13].mxu1  ;;  %v5508_v34 = vadd.f32 %v2089_v20, %v6287_v43  ;;  %v2377_v11 = vld [vmem:[#allocation11 + $0x80] sm:$0xff] }
 0x75f   :  { %v5493_v5 = vadd.f32 %v2020_v49, %v6282_v39  ;;  %v5509_v54 = vadd.f32 %v2091_v55, %v6294_v60  ;;  %v2381_v20 = vld [vmem:[#allocation11 + $0xa0] sm:$0xff]  ;;  %v4920_v49 = vpack.c.bf16 %v2384_v53, %v2380_v44  ;;  %v2379_v55 = vld [vmem:[#allocation11 + $0x90] sm:$0xff]  ;;  %v2410_v44 = vld [vmem:[#allocation11 + $0x188] sm:$0xff] }
 0x760   :  { %v2098_v26 = vmul.f32 0.5, %v5492_v33  ;;  %v4888_v33 = vpack.c.bf16 %v2382_v57, %v2378_v22  ;;  %v2403_v22 = vld [vmem:[#allocation11 + $0x150] sm:$0xff]  ;;  %v2414_v53 = vld [vmem:[#allocation11 + $0x1a8] sm:$0xff] }
 0x761   :  { %v2102_v25 = vmul.f32 0.5, %v5493_v5  ;;  %v2107_v62 = vmul.f32 0.5, %v5509_v54  ;;  %v2383_v5 = vld [vmem:[#allocation11 + $0xb0] sm:$0xff]  ;;  %v2392_v54 = vld [vmem:[#allocation11 + $0xf8] sm:$0xff] }
 0x762   :  { %5684 = vtanh.f32 %v2098_v26  ;;  %v2386_v26 = vld [vmem:[#allocation11 + $0xc8] sm:$0xff]  ;;  %v2407_v57 = vld [vmem:[#allocation11 + $0x170] sm:$0xff] }
 0x763   :  { %5686 = vtanh.f32 %v2102_v25  ;;  %v2390_v25 = vld [vmem:[#allocation11 + $0xe8] sm:$0xff] }
 0x764   :  { %5688 = vtanh.f32 %v5508_v34  ;;  %v2388_v34 = vld [vmem:[#allocation11 + $0xd8] sm:$0xff] }
 0x765   :  { %5690 = vtanh.f32 %v2107_v62  ;;  %v4890_v62 = vpack.c.bf16 %v2381_v20, %v2377_v11  ;;  %v4934_v20 = vpack.c.bf16 %v2407_v57, %v2403_v22  ;;  %v2730_v22 = vld [vmem:[#allocation13 + $0xa8] sm:$0xff]  ;;  %v2728_v57 = vld [vmem:[#allocation13 + $0x98] sm:$0xff] }
 0x76c   :  { %v5685_v4 = vpop.eup %5684 }
 0x76d   :  { %v5687_v14 = vpop.eup %5686  ;;  %v2100_v27 = vmul.f32 0.5, %v5685_v4  ;;  %v4922_v4 = vpack.c.bf16 %v2383_v5, %v2379_v55  ;;  %v4904_v55 = vpack.c.bf16 %v2414_v53, %v2410_v44  ;;  %v2732_v53 = vld [vmem:[#allocation13 + $0xb8] sm:$0xff] }
 0x76e   :  { %v2104_v45 = vmul.f32 0.5, %v5687_v14  ;;  %v5689_v23 = vpop.eup %5688  ;;  %v2385_v14 = vld [vmem:[#allocation11 + $0xc0] sm:$0xff] }
 0x76f   :  { %v2101_v15 = vadd.f32 0.5, %v2100_v27  ;;  %v5691_v16 = vpop.eup %5690  ;;  %v2389_v27 = vld [vmem:[#allocation11 + $0xe0] sm:$0xff] }
 0x770   :  { %v2105_v13 = vadd.f32 0.5, %v2104_v45  ;;  %v2109_v52 = vmul.f32 0.5, %v5691_v16  ;;  %v4892_v45 = vpack.c.bf16 %v2390_v25, %v2386_v26  ;;  %v2396_v16 = vld [vmem:[#allocation11 + $0x118] sm:$0xff]  ;;  %v4894_v63 = vpack.c.bf16 %v2389_v27, %v2385_v14  ;;  %v2411_v26 = vld [vmem:[#allocation11 + $0x190] sm:$0xff] }
 0x771   :  { %v2112_v24 = vmul.f32 %v5689_v23, %v2101_v15  ;;  %v4924_v15 = vpack.c.bf16 %v2392_v54, %v2388_v34  ;;  %v2387_v23 = vld [vmem:[#allocation11 + $0xd0] sm:$0xff]  ;;  %v2418_v34 = vld [vmem:[#allocation11 + $0x1c8] sm:$0xff] }
 0x772   :  { %v2111_v6 = vmul.f32 %v2105_v13, %v6589_v17  ;;  %v2110_v51 = vadd.f32 0.5, %v2109_v52  ;;  %v2373_v17 = vld [vmem:[#allocation11 + $0x60] sm:$0xff]  ;;  %v2391_v13 = vld [vmem:[#allocation11 + $0xf0] sm:$0xff]  ;;  %v2400_v52 = vld [vmem:[#allocation11 + $0x138] sm:$0xff] }
 0x773   :  { %v4886_v3 = vpack.c.bf16 %v2373_v17, %v2369_v19  ;;  %v4926_v10 = vpack.c.bf16 %v2391_v13, %v2387_v23  ;;  %v4928_v61 = vpack.c.bf16 %v2400_v52, %v2396_v16  ;;  %v4898_v19 = vpack.c.bf16 %v2397_v48, %v2393_v28  ;;  %v2415_v25 = vld [vmem:[#allocation11 + $0x1b0] sm:$0xff]  ;;  %v2422_v54 = vld [vmem:[#allocation11 + $0x1e8] sm:$0xff]  ;;  %v2421_v13 = vld [vmem:[#allocation11 + $0x1e0] sm:$0xff] }
 0x774   :  { %v6627_v8 = vadd.f32 %v2112_v24, %v2111_v6  ;;  %v2394_v24 = vld [vmem:[#allocation11 + $0x108] sm:$0xff]  ;;  %v4930_v17 = vpack.c.bf16 %v2399_v46, %v2395_v42  ;;  %v4938_v27 = vpack.c.bf16 %v2415_v25, %v2411_v26  ;;  %v2711_v48 = vld [vmem:[#allocation13 + $0x10] sm:$0xff]  ;;  %v2720_v46 = vld [vmem:[#allocation13 + $0x58] sm:$0xff] }
 0x775   :  { %v2398_v6 = vld [vmem:[#allocation11 + $0x128] sm:$0xff]  ;;  %v2736_v25 = vld [vmem:[#allocation13 + $0xd8] sm:$0xff] }
 0x776   :  { %5692 = vtanh.f32 %v6627_v8  ;;  %v4896_v18 = vpack.c.bf16 %v2398_v6, %v2394_v24  ;;  %v2419_v24 = vld [vmem:[#allocation11 + $0x1d0] sm:$0xff]  ;;  %v2722_v42 = vld [vmem:[#allocation13 + $0x68] sm:$0xff] }
 0x777   :  { %v2423_v6 = vld [vmem:[#allocation11 + $0x1f0] sm:$0xff]  ;;  %v2738_v26 = vld [vmem:[#allocation13 + $0xe8] sm:$0xff] }
 0x778   :  { %v4942_v52 = vpack.c.bf16 %v2423_v6, %v2419_v24  ;;  %v2746_v24 = vld [vmem:[#allocation13 + $0x128] sm:$0xff]  ;;  %v2744_v6 = vld [vmem:[#allocation13 + $0x118] sm:$0xff] }
 0x780   :  { %v5693_v2 = vpop.eup %5692 }
 0x781   :  { %v6630_v30 = vmul.f32 %v5693_v2, %v2110_v51  ;;  %v2402_v51 = vld [vmem:[#allocation11 + $0x148] sm:$0xff] }
 0x782   :  { %v2406_v2 = vld [vmem:[#allocation11 + $0x168] sm:$0xff] }
 0x783   :  { %2252 = vmatmul.mubr.f32.vlgmr.msra.gmra.mrb[14].mxu0 %v6630_v30  ;;  %2323 = vmatmul.mubr.f32.vlgmr.msra.gmra.mrb[14].mxu1 %v6630_v30  ;;  %v4900_v0 = vpack.c.bf16 %v2406_v2, %v2402_v51  ;;  %v2724_v2 = vld [vmem:[#allocation13 + $0x78] sm:$0xff] }
 0x784   :  { %4883 = vmatpush1.bf16.msra.mxu0 %v4882_v9  ;;  %4915 = vmatpush1.bf16.msra.mxu1 %v4914_v56  ;;  %v2404_v9 = vld [vmem:[#allocation11 + $0x158] sm:$0xff] }
 0x785   :  { %4885 = vmatprep.subr.bf16.mxu0 %v4884_v41  ;;  %4917 = vmatprep.subr.bf16.mxu1 %v4916_v37  ;;  %v2408_v56 = vld [vmem:[#allocation11 + $0x178] sm:$0xff]  ;;  %v2401_v41 = vld [vmem:[#allocation11 + $0x140] sm:$0xff] }
 0x786   :  { %2511 = vmatprep.mubr.f32.mxu0 %v5958_v1  ;;  %2624 = vmatprep.mubr.f32.mxu1 %v5958_v1  ;;  %v2405_v37 = vld [vmem:[#allocation11 + $0x160] sm:$0xff]  ;;  %v4932_v58 = vpack.c.bf16 %v2408_v56, %v2404_v9 }
 0x787   :  { %v4902_v11 = vpack.c.bf16 %v2405_v37, %v2401_v41  ;;  %v2717_v9 = vld [vmem:[#allocation13 + $0x40] sm:$0xff]  ;;  %v2719_v41 = vld [vmem:[#allocation13 + $0x50] sm:$0xff] }
 0x788   :  { %4887 = vmatpush1.bf16.msra.mxu0 %v4886_v3  ;;  %4919 = vmatpush1.bf16.msra.mxu1 %v4918_v7  ;;  %v2412_v3 = vld [vmem:[#allocation11 + $0x198] sm:$0xff]  ;;  %v2721_v56 = vld [vmem:[#allocation13 + $0x60] sm:$0xff]  ;;  %v2723_v37 = vld [vmem:[#allocation13 + $0x70] sm:$0xff] }
 0x789   :  { %4889 = vmatprep.subr.bf16.mxu0 %v4888_v33  ;;  %4921 = vmatprep.subr.bf16.mxu1 %v4920_v49  ;;  %v2416_v7 = vld [vmem:[#allocation11 + $0x1b8] sm:$0xff]  ;;  %v2409_v33 = vld [vmem:[#allocation11 + $0x180] sm:$0xff] }
 0x78a   :  { %v2413_v49 = vld [vmem:[#allocation11 + $0x1a0] sm:$0xff]  ;;  %v4936_v5 = vpack.c.bf16 %v2416_v7, %v2412_v3 }
 0x78b   :  { %v4906_v14 = vpack.c.bf16 %v2413_v49, %v2409_v33  ;;  %v2725_v3 = vld [vmem:[#allocation13 + $0x80] sm:$0xff]  ;;  %v2727_v33 = vld [vmem:[#allocation13 + $0x90] sm:$0xff] }
 0x78c   :  { %4891 = vmatpush1.bf16.msra.mxu0 %v4890_v62  ;;  %4923 = vmatpush1.bf16.msra.mxu1 %v4922_v4  ;;  %v2420_v62 = vld [vmem:[#allocation11 + $0x1d8] sm:$0xff]  ;;  %v2729_v7 = vld [vmem:[#allocation13 + $0xa0] sm:$0xff]  ;;  %v2731_v49 = vld [vmem:[#allocation13 + $0xb0] sm:$0xff] }
 0x78d   :  { %4893 = vmatprep.subr.bf16.mxu0 %v4892_v45  ;;  %4925 = vmatprep.subr.bf16.mxu1 %v4924_v15  ;;  %v2424_v4 = vld [vmem:[#allocation11 + $0x1f8] sm:$0xff]  ;;  %v2417_v45 = vld [vmem:[#allocation11 + $0x1c0] sm:$0xff]  ;;  %v4908_v15 = vpack.c.bf16 %v2422_v54, %v2418_v34 }
 0x78e   :  { %v4940_v23 = vpack.c.bf16 %v2424_v4, %v2420_v62  ;;  %v4910_v16 = vpack.c.bf16 %v2421_v13, %v2417_v45  ;;  %v2740_v54 = vld [vmem:[#allocation13 + $0xf8] sm:$0xff]  ;;  %v2733_v62 = vld [vmem:[#allocation13 + $0xc0] sm:$0xff]  ;;  %v2735_v45 = vld [vmem:[#allocation13 + $0xd0] sm:$0xff] }
 0x78f   :  { %v2737_v4 = vld [vmem:[#allocation13 + $0xe0] sm:$0xff]  ;;  %v2742_v13 = vld [vmem:[#allocation13 + $0x108] sm:$0xff] }
 0x790   :  { %4895 = vmatpush1.bf16.msra.mxu0 %v4894_v63  ;;  %4927 = vmatpush1.bf16.msra.mxu1 %v4926_v10  ;;  %v2709_v63 = vld [vmem:[#allocation13] sm:$0xff] }
 0x791   :  { %4897 = vmatprep.subr.bf16.mxu0 %v4896_v18  ;;  %4929 = vmatprep.subr.bf16.mxu1 %v4928_v61  ;;  %v2715_v18 = vld [vmem:[#allocation13 + $0x30] sm:$0xff]  ;;  %v2718_v61 = vld [vmem:[#allocation13 + $0x48] sm:$0xff] }
 0x792   :  { %v6676_v51 = vpack.c.bf16 %v2722_v42, %v2718_v61  ;;  %v2754_v61 = vld [vmem:[#allocation13 + $0x168] sm:$0xff]  ;;  %v2752_v42 = vld [vmem:[#allocation13 + $0x158] sm:$0xff] }
 0x794   :  { %4899 = vmatpush1.bf16.msra.mxu0 %v4898_v19  ;;  %4931 = vmatpush1.bf16.msra.mxu1 %v4930_v17  ;;  %v6678_v19 = vpack.c.bf16 %v2724_v2, %v2720_v46  ;;  %v6680_v17 = vpack.c.bf16 %v2721_v56, %v2717_v9  ;;  %v2756_v46 = vld [vmem:[#allocation13 + $0x178] sm:$0xff]  ;;  %v2749_v56 = vld [vmem:[#allocation13 + $0x140] sm:$0xff] }
 0x795   :  { %4901 = vmatprep.subr.bf16.mxu0 %v4900_v0  ;;  %4933 = vmatprep.subr.bf16.mxu1 %v4932_v58  ;;  %v6683_v0 = vpack.c.bf16 %v2723_v37, %v2719_v41  ;;  %v2726_v58 = vld [vmem:[#allocation13 + $0x88] sm:$0xff]  ;;  %v6725_v9 = vpack.c.bf16 %v2756_v46, %v2752_v42  ;;  %v2753_v41 = vld [vmem:[#allocation13 + $0x160] sm:$0xff]  ;;  %v2751_v37 = vld [vmem:[#allocation13 + $0x150] sm:$0xff] }
 0x796   :  { %v6688_v44 = vpack.c.bf16 %v2730_v22, %v2726_v58  ;;  %v6728_v58 = vpack.c.bf16 %v2753_v41, %v2749_v56  ;;  %v2755_v22 = vld [vmem:[#allocation13 + $0x170] sm:$0xff] }
 0x798   :  { %4903 = vmatpush1.bf16.msra.mxu0 %v4902_v11  ;;  %4935 = vmatpush1.bf16.msra.mxu1 %v4934_v20  ;;  %v6690_v11 = vpack.c.bf16 %v2732_v53, %v2728_v57  ;;  %v6692_v20 = vpack.c.bf16 %v2729_v7, %v2725_v3  ;;  %v2758_v57 = vld [vmem:[#allocation13 + $0x188] sm:$0xff]  ;;  %v6732_v3 = vpack.c.bf16 %v2755_v22, %v2751_v37 }
 0x799   :  { %4905 = vmatprep.subr.bf16.mxu0 %v4904_v55  ;;  %4937 = vmatprep.subr.bf16.mxu1 %v4936_v5  ;;  %v6695_v55 = vpack.c.bf16 %v2731_v49, %v2727_v33  ;;  %v2734_v5 = vld [vmem:[#allocation13 + $0xc8] sm:$0xff]  ;;  %v2760_v33 = vld [vmem:[#allocation13 + $0x198] sm:$0xff] }
 0x79a   :  { %v6700_v34 = vpack.c.bf16 %v2738_v26, %v2734_v5  ;;  %v2762_v53 = vld [vmem:[#allocation13 + $0x1a8] sm:$0xff]  ;;  %v2764_v49 = vld [vmem:[#allocation13 + $0x1b8] sm:$0xff]  ;;  %v2757_v5 = vld [vmem:[#allocation13 + $0x180] sm:$0xff] }
 0x79b   :  { %v6734_v7 = vpack.c.bf16 %v2762_v53, %v2758_v57  ;;  %v6736_v26 = vpack.c.bf16 %v2764_v49, %v2760_v33 }
 0x79c   :  { %4907 = vmatpush1.bf16.msra.mxu0 %v4906_v14  ;;  %4939 = vmatpush1.bf16.msra.mxu1 %v4938_v27  ;;  %v6702_v14 = vpack.c.bf16 %v2740_v54, %v2736_v25  ;;  %v6704_v27 = vpack.c.bf16 %v2737_v4, %v2733_v62  ;;  %v2761_v25 = vld [vmem:[#allocation13 + $0x1a0] sm:$0xff]  ;;  %v2759_v54 = vld [vmem:[#allocation13 + $0x190] sm:$0xff] }
 0x79d   :  { %4909 = vmatprep.subr.bf16.mxu0 %v4908_v15  ;;  %4941 = vmatprep.subr.bf16.mxu1 %v4940_v23  ;;  %v2739_v15 = vld [vmem:[#allocation13 + $0xf0] sm:$0xff]  ;;  %v6739_v4 = vpack.c.bf16 %v2761_v25, %v2757_v5 }
 0x79e   :  { %v6707_v23 = vpack.c.bf16 %v2739_v15, %v2735_v45  ;;  %v2763_v62 = vld [vmem:[#allocation13 + $0x1b0] sm:$0xff]  ;;  %v2766_v15 = vld [vmem:[#allocation13 + $0x1c8] sm:$0xff] }
 0x79f   :  { %v6743_v45 = vpack.c.bf16 %v2763_v62, %v2759_v54 }
 0x7a0   :  { %4911 = vmatpush1.bf16.msra.mxu0 %v4910_v16  ;;  %4943 = vmatpush1.bf16.msra.mxu1 %v4942_v52  ;;  %v6712_v16 = vpack.c.bf16 %v2746_v24, %v2742_v13  ;;  %v2748_v52 = vld [vmem:[#allocation13 + $0x138] sm:$0xff]  ;;  %v2770_v13 = vld [vmem:[#allocation13 + $0x1e8] sm:$0xff] }
 0x7a1   :  { %v2768_v24 = vld [vmem:[#allocation13 + $0x1d8] sm:$0xff] }
 0x7a3   :  { %2512 = vmatmul.mubr.f32.vlgmr.msra.gmra.mrb[16].mxu0 %v6300_v40  ;;  %2625 = vmatmul.mubr.f32.vlgmr.msra.gmra.mrb[16].mxu1 %v6300_v40  ;;  %v2710_v40 = vld [vmem:[#allocation13 + $0x8] sm:$0xff] }
 0x7a4   :  { %2517 = vmatprep.mubr.f32.mxu0 %v5958_v1  ;;  %2630 = vmatprep.mubr.f32.mxu1 %v5958_v1 }
 0x7a7   :  { %2518 = vmatmul.mubr.f32.gmra.mrb[18].mxu0 %v6344_v29  ;;  %2631 = vmatmul.mubr.f32.gmra.mrb[18].mxu1 %v6344_v29  ;;  %v2714_v29 = vld [vmem:[#allocation13 + $0x28] sm:$0xff] }
 0x7a8   :  { %2523 = vmatprep.mubr.f32.mxu0 %v5958_v1  ;;  %2636 = vmatprep.mubr.f32.mxu1 %v5958_v1 }
 0x7ab   :  { %2524 = vmatmul.mubr.f32.gmra.mrb[20].mxu0 %v6408_v21  ;;  %2637 = vmatmul.mubr.f32.gmra.mrb[20].mxu1 %v6408_v21  ;;  %v2712_v21 = vld [vmem:[#allocation13 + $0x18] sm:$0xff] }
 0x7ac   :  { %2529 = vmatprep.mubr.f32.mxu0 %v5958_v1  ;;  %2642 = vmatprep.mubr.f32.mxu1 %v5958_v1 }
 0x7af   :  { %2530 = vmatmul.mubr.f32.gmra.mrb[22].mxu0 %v6502_v12  ;;  %2643 = vmatmul.mubr.f32.gmra.mrb[22].mxu1 %v6502_v12  ;;  %v6664_v12 = vpack.c.bf16 %v2714_v29, %v2710_v40  ;;  %v2741_v40 = vld [vmem:[#allocation13 + $0x100] sm:$0xff] }
 0x7b0   :  { %2535 = vmatprep.mubr.f32.mxu0 %v5958_v1  ;;  %2648 = vmatprep.mubr.f32.mxu1 %v5958_v1  ;;  %v2745_v29 = vld [vmem:[#allocation13 + $0x120] sm:$0xff] }
 0x7b1   :  { %4945 = vmatprep.subr.bf16.mxu0 %v6664_v12 }
 0x7b3   :  { %2536 = vmatmul.mubr.f32.gmra.mrb[24].mxu0 %v6548_v59  ;;  %2649 = vmatmul.mubr.f32.gmra.mrb[24].mxu1 %v6548_v59  ;;  %v2716_v59 = vld [vmem:[#allocation13 + $0x38] sm:$0xff] }
 0x7b4   :  { %2541 = vmatprep.mubr.f32.mxu0 %v5958_v1  ;;  %2654 = vmatprep.mubr.f32.mxu1 %v5958_v1  ;;  %v6666_v10 = vpack.c.bf16 %v2716_v59, %v2712_v21  ;;  %v6714_v21 = vpack.c.bf16 %v2748_v52, %v2744_v6  ;;  %v6716_v59 = vpack.c.bf16 %v2745_v29, %v2741_v40  ;;  %v2772_v52 = vld [vmem:[#allocation13 + $0x1f8] sm:$0xff]  ;;  %v2765_v40 = vld [vmem:[#allocation13 + $0x1c0] sm:$0xff] }
 0x7b5   :  { %v6748_v6 = vpack.c.bf16 %v2770_v13, %v2766_v15  ;;  %v2769_v29 = vld [vmem:[#allocation13 + $0x1e0] sm:$0xff] }
 0x7b6   :  { %4977 = vmatprep.subr.bf16.mxu1 %v6666_v10 }
 0x7b7   :  { %2542 = vmatmul.mubr.f32.gmra.mrb[26].mxu0 %v6592_v50  ;;  %2655 = vmatmul.mubr.f32.gmra.mrb[26].mxu1 %v6592_v50  ;;  %v2713_v50 = vld [vmem:[#allocation13 + $0x20] sm:$0xff] }
 0x7b8   :  { %2547 = vmatprep.mubr.f32.mxu0 %v5958_v1  ;;  %2660 = vmatprep.mubr.f32.mxu1 %v5958_v1  ;;  %v6668_v28 = vpack.c.bf16 %v2713_v50, %v2709_v63  ;;  %v2743_v63 = vld [vmem:[#allocation13 + $0x110] sm:$0xff] }
 0x7b9   :  { %v2747_v50 = vld [vmem:[#allocation13 + $0x130] sm:$0xff] }
 0x7ba   :  { %4947 = vmatpush1.bf16.msra.mxu0 %v6668_v28 }
 0x7bb   :  { %2548 = vmatmul.mubr.f32.gmra.mrb[28].mxu0 %v6630_v30  ;;  %2661 = vmatmul.mubr.f32.gmra.mrb[28].mxu1 %v6630_v30  ;;  %v6671_v30 = vpack.c.bf16 %v2715_v18, %v2711_v48  ;;  %v2750_v48 = vld [vmem:[#allocation13 + $0x148] sm:$0xff]  ;;  %v6719_v18 = vpack.c.bf16 %v2747_v50, %v2743_v63  ;;  %v6750_v63 = vpack.c.bf16 %v2772_v52, %v2768_v24 }
 0x7bc   :  { %2553 = vmatprep.mubr.f32.mxu0 %v5958_v1  ;;  %2666 = vmatprep.mubr.f32.mxu1 %v5958_v1  ;;  %v6723_v2 = vpack.c.bf16 %v2754_v61, %v2750_v48  ;;  %v6752_v50 = vpack.c.bf16 %v2769_v29, %v2765_v40  ;;  %v2767_v48 = vld [vmem:[#allocation13 + $0x1d0] sm:$0xff] }
 0x7bd   :  { %4979 = vmatpush1.bf16.msra.mxu1 %v6671_v30  ;;  %4949 = vmatprep.subr.bf16.mxu0 %v6676_v51  ;;  %v2771_v61 = vld [vmem:[#allocation13 + $0x1f0] sm:$0xff] }
 0x7be   :  { %4981 = vmatprep.subr.bf16.mxu1 %v6678_v19  ;;  %4951 = vmatpush1.bf16.msra.mxu0 %v6680_v17  ;;  %v6755_v42 = vpack.c.bf16 %v2771_v61, %v2767_v48 }
 0x7bf   :  { %4953 = vmatprep.subr.bf16.mxu0 %v6688_v44 }
 0x7c1   :  { %4983 = vmatpush1.bf16.msra.mxu1 %v6683_v0 }
 0x7c2   :  { %4985 = vmatprep.subr.bf16.mxu1 %v6690_v11  ;;  %4955 = vmatpush1.bf16.msra.mxu0 %v6692_v20 }
 0x7c3   :  { %4957 = vmatprep.subr.bf16.mxu0 %v6700_v34 }
 0x7c5   :  { %4987 = vmatpush1.bf16.msra.mxu1 %v6695_v55 }
 0x7c6   :  { %4989 = vmatprep.subr.bf16.mxu1 %v6702_v14  ;;  %4959 = vmatpush1.bf16.msra.mxu0 %v6704_v27 }
 0x7c7   :  { %4961 = vmatprep.subr.bf16.mxu0 %v6712_v16 }
 0x7c9   :  { %4991 = vmatpush1.bf16.msra.mxu1 %v6707_v23 }
 0x7ca   :  { %4993 = vmatprep.subr.bf16.mxu1 %v6714_v21  ;;  %4963 = vmatpush1.bf16.msra.mxu0 %v6716_v59 }
 0x7cb   :  { %4965 = vmatprep.subr.bf16.mxu0 %v6723_v2 }
 0x7cd   :  { %4995 = vmatpush1.bf16.msra.mxu1 %v6719_v18 }
 0x7ce   :  { %4997 = vmatprep.subr.bf16.mxu1 %v6725_v9  ;;  %4967 = vmatpush1.bf16.msra.mxu0 %v6728_v58 }
 0x7cf   :  { %4969 = vmatprep.subr.bf16.mxu0 %v6734_v7 }
 0x7d1   :  { %4999 = vmatpush1.bf16.msra.mxu1 %v6732_v3 }
 0x7d2   :  { %5001 = vmatprep.subr.bf16.mxu1 %v6736_v26  ;;  %4971 = vmatpush1.bf16.msra.mxu0 %v6739_v4 }
 0x7d3   :  { %4973 = vmatprep.subr.bf16.mxu0 %v6748_v6 }
 0x7d5   :  { %5003 = vmatpush1.bf16.msra.mxu1 %v6743_v45 }
 0x7d6   :  { %5005 = vmatprep.subr.bf16.mxu1 %v6750_v63  ;;  %4975 = vmatpush1.bf16.msra.mxu0 %v6752_v50 }
 0x7d7   :  { %5009 = vmatprep.subr.bf16.mxu0 %v6664_v12 }
 0x7d9   :  { %5007 = vmatpush1.bf16.msra.mxu1 %v6755_v42 }
 0x7da   :  { %5041 = vmatprep.subr.bf16.mxu1 %v6666_v10 }
 0x856   :  { %v2253_v46 = vpop.f32.mrb[14].mxu0  ;;  %v2324_v56 = vpop.f32.mrb[14].mxu1 }
 0x857   :  { %v5494_v41 = vadd.f32 %v2253_v46, %v6277_v36  ;;  %v2255_v37 = vpop.f32.mrb[15].mxu0  ;;  %v2326_v22 = vpop.f32.mrb[15].mxu1  ;;  %v5510_v49 = vadd.f32 %v2324_v56, %v6287_v43 }
 0x858   :  { %v5495_v57 = vadd.f32 %v2255_v37, %v6282_v39  ;;  %v5511_v5 = vadd.f32 %v2326_v22, %v6294_v60  ;;  %v2425_v60 = vld [vmem:[%s7111_s6] sm:$0xf] }
 0x859   :  { %v2333_v53 = vmul.f32 0.5, %v5494_v41  ;;  %v6814_v41 = vrot.slane %v2425_v60, %v203_v35  ;;  %v6825_v35 = vrot.slane %v2425_v60, %v211_v47 }
 0x85a   :  { %v2337_v33 = vmul.f32 0.5, %v5495_v57  ;;  %v2342_v25 = vmul.f32 0.5, %v5511_v5 }
 0x85b   :  { %5694 = vtanh.f32 %v2333_v53  ;;  %v6819_v53 = vrot.slane %v2425_v60, %v207_v38 }
 0x85c   :  { %5696 = vtanh.f32 %v2337_v33 }
 0x85d   :  { %5698 = vtanh.f32 %v5510_v49 }
 0x85e   :  { %5700 = vtanh.f32 %v2342_v25 }
 0x865   :  { %v5695_v54 = vpop.eup %5694 }
 0x866   :  { %v5697_v62 = vpop.eup %5696  ;;  %v2335_v15 = vmul.f32 0.5, %v5695_v54 }
 0x867   :  { %v2339_v13 = vmul.f32 0.5, %v5697_v62  ;;  %v5699_v24 = vpop.eup %5698 }
 0x868   :  { %v2336_v36 = vadd.f32 0.5, %v2335_v15  ;;  %v5701_v48 = vpop.eup %5700 }
 0x869   :  { %v2340_v52 = vadd.f32 0.5, %v2339_v13  ;;  %v2344_v43 = vmul.f32 0.5, %v5701_v48 }
 0x86a   :  { %v2347_v40 = vmul.f32 %v5699_v24, %v2336_v36 }
 0x86b   :  { %v2346_v39 = vmul.f32 %v2340_v52, %v6627_v8  ;;  %v2345_v61 = vadd.f32 0.5, %v2344_v43  ;;  %v6810_v8 = vrot.slane %v2425_v60, %v199_v32 }
 0x86d   :  { %v2348_v29 = vadd.f32 %v2347_v40, %v2346_v39 }
 0x86f   :  { %5702 = vtanh.f32 %v2348_v29 }
 0x879   :  { %v5703_v46 = vpop.eup %5702 }
 0x87a   :  { %v2350_v56 = vmul.f32 %v5703_v46, %v2345_v61 }
 0x87c   :  { %2554 = vmatmul.mubr.f32.gmra.mrb[30].mxu0 %v2350_v56  ;;  %2667 = vmatmul.mubr.f32.gmra.mrb[30].mxu1 %v2350_v56 }
 0x87d   :  { %2837 = vmatprep.mubr.f32.mxu0 %v5958_v1  ;;  %2908 = vmatprep.mubr.f32.mxu1 %v5958_v1 }
 0x880   :  { %2838 = vmatmul.mubr.f32.vlgmr.msra.gmra.mrb[16].mxu0 %v5958_v1  ;;  %2909 = vmatmul.mubr.f32.vlgmr.msra.gmra.mrb[16].mxu1 %v5958_v1 }
 0x881   :  { %5011 = vmatpush1.bf16.msra.mxu0 %v6668_v28  ;;  %5043 = vmatpush1.bf16.msra.mxu1 %v6671_v30 }
 0x882   :  { %5013 = vmatprep.subr.bf16.mxu0 %v6676_v51  ;;  %5045 = vmatprep.subr.bf16.mxu1 %v6678_v19 }
 0x883   :  { %3005 = vmatprep.mubr.f32.mxu0 %v5958_v1  ;;  %3076 = vmatprep.mubr.f32.mxu1 %v5958_v1 }
 0x885   :  { %5015 = vmatpush1.bf16.msra.mxu0 %v6680_v17  ;;  %5047 = vmatpush1.bf16.msra.mxu1 %v6683_v0 }
 0x886   :  { %5017 = vmatprep.subr.bf16.mxu0 %v6688_v44  ;;  %5049 = vmatprep.subr.bf16.mxu1 %v6690_v11 }
 0x889   :  { %5019 = vmatpush1.bf16.msra.mxu0 %v6692_v20  ;;  %5051 = vmatpush1.bf16.msra.mxu1 %v6695_v55 }
 0x88a   :  { %5021 = vmatprep.subr.bf16.mxu0 %v6700_v34  ;;  %5053 = vmatprep.subr.bf16.mxu1 %v6702_v14 }
 0x88d   :  { %5023 = vmatpush1.bf16.msra.mxu0 %v6704_v27  ;;  %5055 = vmatpush1.bf16.msra.mxu1 %v6707_v23 }
 0x88e   :  { %5025 = vmatprep.subr.bf16.mxu0 %v6712_v16  ;;  %5057 = vmatprep.subr.bf16.mxu1 %v6714_v21 }
 0x891   :  { %5027 = vmatpush1.bf16.msra.mxu0 %v6716_v59  ;;  %5059 = vmatpush1.bf16.msra.mxu1 %v6719_v18 }
 0x892   :  { %5029 = vmatprep.subr.bf16.mxu0 %v6723_v2  ;;  %5061 = vmatprep.subr.bf16.mxu1 %v6725_v9 }
 0x895   :  { %5031 = vmatpush1.bf16.msra.mxu0 %v6728_v58  ;;  %5063 = vmatpush1.bf16.msra.mxu1 %v6732_v3 }
 0x896   :  { %5033 = vmatprep.subr.bf16.mxu0 %v6734_v7  ;;  %5065 = vmatprep.subr.bf16.mxu1 %v6736_v26 }
 0x899   :  { %5035 = vmatpush1.bf16.msra.mxu0 %v6739_v4  ;;  %5067 = vmatpush1.bf16.msra.mxu1 %v6743_v45 }
 0x89a   :  { %5037 = vmatprep.subr.bf16.mxu0 %v6748_v6  ;;  %5069 = vmatprep.subr.bf16.mxu1 %v6750_v63 }
 0x89d   :  { %5039 = vmatpush1.bf16.msra.mxu0 %v6752_v50  ;;  %5071 = vmatpush1.bf16.msra.mxu1 %v6755_v42 }
 0x89e   :  { %5073 = vmatprep.subr.bf16.mxu0 %v6664_v12  ;;  %5105 = vmatprep.subr.bf16.mxu1 %v6666_v10 }
 0x953   :  { %v2839_v37 = vpop.f32.mrb[16].mxu0  ;;  %v2910_v22 = vpop.f32.mrb[16].mxu1 }
 0x954   :  { %v5512_v57 = vadd.f32 %v2839_v37, %v6810_v8  ;;  %v2841_v33 = vpop.f32.mrb[17].mxu0  ;;  %v2912_v49 = vpop.f32.mrb[17].mxu1  ;;  %v5528_v32 = vadd.f32 %v2910_v22, %v6819_v53 }
 0x955   :  { %v5513_v5 = vadd.f32 %v2841_v33, %v6814_v41  ;;  %v5529_v62 = vadd.f32 %v2912_v49, %v6825_v35 }
 0x956   :  { %v2919_v25 = vmul.f32 0.5, %v5512_v57 }
 0x957   :  { %v2923_v54 = vmul.f32 0.5, %v5513_v5  ;;  %v2928_v15 = vmul.f32 0.5, %v5529_v62 }
 0x958   :  { %5704 = vtanh.f32 %v2919_v25 }
 0x959   :  { %5706 = vtanh.f32 %v2923_v54 }
 0x95a   :  { %5708 = vtanh.f32 %v5528_v32 }
 0x95b   :  { %5710 = vtanh.f32 %v2928_v15 }
 0x962   :  { %v5705_v38 = vpop.eup %5704 }
 0x963   :  { %v5707_v13 = vpop.eup %5706  ;;  %v2921_v36 = vmul.f32 0.5, %v5705_v38 }
 0x964   :  { %v2925_v24 = vmul.f32 0.5, %v5707_v13  ;;  %v5709_v40 = vpop.eup %5708 }
 0x965   :  { %v2922_v52 = vadd.f32 0.5, %v2921_v36  ;;  %v5711_v31 = vpop.eup %5710 }
 0x966   :  { %v2926_v39 = vadd.f32 0.5, %v2925_v24  ;;  %v2930_v47 = vmul.f32 0.5, %v5711_v31 }
 0x967   :  { %v2933_v29 = vmul.f32 %v5709_v40, %v2922_v52 }
 0x968   :  { %v2932_v48 = vmul.f32 0.0, %v2926_v39  ;;  %v2931_v61 = vadd.f32 0.5, %v2930_v47 }
 0x96a   :  { %v6828_v43 = vadd.f32 %v2933_v29, %v2932_v48 }
 0x96c   :  { %5712 = vtanh.f32 %v6828_v43 }
 0x976   :  { %v5713_v46 = vpop.eup %5712 }
 0x977   :  { %v2936_v56 = vmul.f32 %v5713_v46, %v2931_v61 }
 0x979   :  { %3006 = vmatmul.mubr.f32.vlgmr.msra.gmra.mrb[18].mxu0 %v2936_v56  ;;  %3077 = vmatmul.mubr.f32.vlgmr.msra.gmra.mrb[18].mxu1 %v2936_v56 }
 0x97a   :  { %5075 = vmatpush1.bf16.msra.mxu0 %v6668_v28  ;;  %5107 = vmatpush1.bf16.msra.mxu1 %v6671_v30 }
 0x97b   :  { %5077 = vmatprep.subr.bf16.mxu0 %v6676_v51  ;;  %5109 = vmatprep.subr.bf16.mxu1 %v6678_v19 }
 0x97c   :  { %3173 = vmatprep.mubr.f32.mxu0 %v5958_v1  ;;  %3244 = vmatprep.mubr.f32.mxu1 %v5958_v1 }
 0x97e   :  { %5079 = vmatpush1.bf16.msra.mxu0 %v6680_v17  ;;  %5111 = vmatpush1.bf16.msra.mxu1 %v6683_v0 }
 0x97f   :  { %5081 = vmatprep.subr.bf16.mxu0 %v6688_v44  ;;  %5113 = vmatprep.subr.bf16.mxu1 %v6690_v11 }
 0x982   :  { %5083 = vmatpush1.bf16.msra.mxu0 %v6692_v20  ;;  %5115 = vmatpush1.bf16.msra.mxu1 %v6695_v55 }
 0x983   :  { %5085 = vmatprep.subr.bf16.mxu0 %v6700_v34  ;;  %5117 = vmatprep.subr.bf16.mxu1 %v6702_v14 }
 0x986   :  { %5087 = vmatpush1.bf16.msra.mxu0 %v6704_v27  ;;  %5119 = vmatpush1.bf16.msra.mxu1 %v6707_v23 }
 0x987   :  { %5089 = vmatprep.subr.bf16.mxu0 %v6712_v16  ;;  %5121 = vmatprep.subr.bf16.mxu1 %v6714_v21 }
 0x98a   :  { %5091 = vmatpush1.bf16.msra.mxu0 %v6716_v59  ;;  %5123 = vmatpush1.bf16.msra.mxu1 %v6719_v18 }
 0x98b   :  { %5093 = vmatprep.subr.bf16.mxu0 %v6723_v2  ;;  %5125 = vmatprep.subr.bf16.mxu1 %v6725_v9 }
 0x98e   :  { %5095 = vmatpush1.bf16.msra.mxu0 %v6728_v58  ;;  %5127 = vmatpush1.bf16.msra.mxu1 %v6732_v3 }
 0x98f   :  { %5097 = vmatprep.subr.bf16.mxu0 %v6734_v7  ;;  %5129 = vmatprep.subr.bf16.mxu1 %v6736_v26 }
 0x992   :  { %5099 = vmatpush1.bf16.msra.mxu0 %v6739_v4  ;;  %5131 = vmatpush1.bf16.msra.mxu1 %v6743_v45 }
 0x993   :  { %5101 = vmatprep.subr.bf16.mxu0 %v6748_v6  ;;  %5133 = vmatprep.subr.bf16.mxu1 %v6750_v63 }
 0x996   :  { %5103 = vmatpush1.bf16.msra.mxu0 %v6752_v50  ;;  %5135 = vmatpush1.bf16.msra.mxu1 %v6755_v42 }
 0x997   :  { %5137 = vmatprep.subr.bf16.mxu0 %v6664_v12  ;;  %5169 = vmatprep.subr.bf16.mxu1 %v6666_v10 }
 0xa4c   :  { %v3007_v60 = vpop.f32.mrb[18].mxu0  ;;  %v3078_v37 = vpop.f32.mrb[18].mxu1 }
 0xa4d   :  { %v5514_v22 = vadd.f32 %v3007_v60, %v6810_v8  ;;  %v3009_v57 = vpop.f32.mrb[19].mxu0  ;;  %v3080_v33 = vpop.f32.mrb[19].mxu1  ;;  %v5530_v54 = vadd.f32 %v3078_v37, %v6819_v53 }
 0xa4e   :  { %v5515_v49 = vadd.f32 %v3009_v57, %v6814_v41  ;;  %v5531_v32 = vadd.f32 %v3080_v33, %v6825_v35 }
 0xa4f   :  { %v3087_v5 = vmul.f32 0.5, %v5514_v22 }
 0xa50   :  { %v3091_v25 = vmul.f32 0.5, %v5515_v49  ;;  %v3096_v62 = vmul.f32 0.5, %v5531_v32 }
 0xa51   :  { %5714 = vtanh.f32 %v3087_v5 }
 0xa52   :  { %5716 = vtanh.f32 %v3091_v25 }
 0xa53   :  { %5718 = vtanh.f32 %v5530_v54 }
 0xa54   :  { %5720 = vtanh.f32 %v3096_v62 }
 0xa5b   :  { %v5715_v15 = vpop.eup %5714 }
 0xa5c   :  { %v5717_v38 = vpop.eup %5716  ;;  %v3089_v13 = vmul.f32 0.5, %v5715_v15 }
 0xa5d   :  { %v3093_v36 = vmul.f32 0.5, %v5717_v38  ;;  %v5719_v52 = vpop.eup %5718 }
 0xa5e   :  { %v3090_v24 = vadd.f32 0.5, %v3089_v13  ;;  %v5721_v31 = vpop.eup %5720 }
 0xa5f   :  { %v3094_v40 = vadd.f32 0.5, %v3093_v36  ;;  %v3098_v47 = vmul.f32 0.5, %v5721_v31 }
 0xa60   :  { %v3101_v39 = vmul.f32 %v5719_v52, %v3090_v24 }
 0xa61   :  { %v3100_v29 = vmul.f32 %v3094_v40, %v6828_v43  ;;  %v3099_v61 = vadd.f32 0.5, %v3098_v47 }
 0xa63   :  { %v6870_v48 = vadd.f32 %v3101_v39, %v3100_v29 }
 0xa65   :  { %5722 = vtanh.f32 %v6870_v48 }
 0xa6f   :  { %v5723_v46 = vpop.eup %5722 }
 0xa70   :  { %v3104_v56 = vmul.f32 %v5723_v46, %v3099_v61 }
 0xa72   :  { %3174 = vmatmul.mubr.f32.vlgmr.msra.gmra.mrb[20].mxu0 %v3104_v56  ;;  %3245 = vmatmul.mubr.f32.vlgmr.msra.gmra.mrb[20].mxu1 %v3104_v56 }
 0xa73   :  { %5139 = vmatpush1.bf16.msra.mxu0 %v6668_v28  ;;  %5171 = vmatpush1.bf16.msra.mxu1 %v6671_v30 }
 0xa74   :  { %5141 = vmatprep.subr.bf16.mxu0 %v6676_v51  ;;  %5173 = vmatprep.subr.bf16.mxu1 %v6678_v19 }
 0xa75   :  { %3341 = vmatprep.mubr.f32.mxu0 %v5958_v1  ;;  %3412 = vmatprep.mubr.f32.mxu1 %v5958_v1 }
 0xa77   :  { %5143 = vmatpush1.bf16.msra.mxu0 %v6680_v17  ;;  %5175 = vmatpush1.bf16.msra.mxu1 %v6683_v0 }
 0xa78   :  { %5145 = vmatprep.subr.bf16.mxu0 %v6688_v44  ;;  %5177 = vmatprep.subr.bf16.mxu1 %v6690_v11 }
 0xa7b   :  { %5147 = vmatpush1.bf16.msra.mxu0 %v6692_v20  ;;  %5179 = vmatpush1.bf16.msra.mxu1 %v6695_v55 }
 0xa7c   :  { %5149 = vmatprep.subr.bf16.mxu0 %v6700_v34  ;;  %5181 = vmatprep.subr.bf16.mxu1 %v6702_v14 }
 0xa7f   :  { %5151 = vmatpush1.bf16.msra.mxu0 %v6704_v27  ;;  %5183 = vmatpush1.bf16.msra.mxu1 %v6707_v23 }
 0xa80   :  { %5153 = vmatprep.subr.bf16.mxu0 %v6712_v16  ;;  %5185 = vmatprep.subr.bf16.mxu1 %v6714_v21 }
 0xa83   :  { %5155 = vmatpush1.bf16.msra.mxu0 %v6716_v59  ;;  %5187 = vmatpush1.bf16.msra.mxu1 %v6719_v18 }
 0xa84   :  { %5157 = vmatprep.subr.bf16.mxu0 %v6723_v2  ;;  %5189 = vmatprep.subr.bf16.mxu1 %v6725_v9 }
 0xa87   :  { %5159 = vmatpush1.bf16.msra.mxu0 %v6728_v58  ;;  %5191 = vmatpush1.bf16.msra.mxu1 %v6732_v3 }
 0xa88   :  { %5161 = vmatprep.subr.bf16.mxu0 %v6734_v7  ;;  %5193 = vmatprep.subr.bf16.mxu1 %v6736_v26 }
 0xa8b   :  { %5163 = vmatpush1.bf16.msra.mxu0 %v6739_v4  ;;  %5195 = vmatpush1.bf16.msra.mxu1 %v6743_v45 }
 0xa8c   :  { %5165 = vmatprep.subr.bf16.mxu0 %v6748_v6  ;;  %5197 = vmatprep.subr.bf16.mxu1 %v6750_v63 }
 0xa8f   :  { %5167 = vmatpush1.bf16.msra.mxu0 %v6752_v50  ;;  %5199 = vmatpush1.bf16.msra.mxu1 %v6755_v42 }
 0xa90   :  { %5201 = vmatprep.subr.bf16.mxu0 %v6664_v12  ;;  %5233 = vmatprep.subr.bf16.mxu1 %v6666_v10 }
 0xb45   :  { %v3175_v43 = vpop.f32.mrb[20].mxu0  ;;  %v3246_v60 = vpop.f32.mrb[20].mxu1 }
 0xb46   :  { %v5516_v37 = vadd.f32 %v3175_v43, %v6810_v8  ;;  %v3177_v22 = vpop.f32.mrb[21].mxu0  ;;  %v3248_v57 = vpop.f32.mrb[21].mxu1  ;;  %v5532_v25 = vadd.f32 %v3246_v60, %v6819_v53 }
 0xb47   :  { %v5517_v33 = vadd.f32 %v3177_v22, %v6814_v41  ;;  %v5533_v54 = vadd.f32 %v3248_v57, %v6825_v35 }
 0xb48   :  { %v3255_v49 = vmul.f32 0.5, %v5516_v37 }
 0xb49   :  { %v3259_v5 = vmul.f32 0.5, %v5517_v33  ;;  %v3264_v32 = vmul.f32 0.5, %v5533_v54 }
 0xb4a   :  { %5724 = vtanh.f32 %v3255_v49 }
 0xb4b   :  { %5726 = vtanh.f32 %v3259_v5 }
 0xb4c   :  { %5728 = vtanh.f32 %v5532_v25 }
 0xb4d   :  { %5730 = vtanh.f32 %v3264_v32 }
 0xb54   :  { %v5725_v62 = vpop.eup %5724 }
 0xb55   :  { %v5727_v15 = vpop.eup %5726  ;;  %v3257_v38 = vmul.f32 0.5, %v5725_v62 }
 0xb56   :  { %v3261_v13 = vmul.f32 0.5, %v5727_v15  ;;  %v5729_v24 = vpop.eup %5728 }
 0xb57   :  { %v3258_v36 = vadd.f32 0.5, %v3257_v38  ;;  %v5731_v31 = vpop.eup %5730 }
 0xb58   :  { %v3262_v52 = vadd.f32 0.5, %v3261_v13  ;;  %v3266_v47 = vmul.f32 0.5, %v5731_v31 }
 0xb59   :  { %v3269_v40 = vmul.f32 %v5729_v24, %v3258_v36 }
 0xb5a   :  { %v3268_v39 = vmul.f32 %v3262_v52, %v6870_v48  ;;  %v3267_v61 = vadd.f32 0.5, %v3266_v47 }
 0xb5c   :  { %v6912_v29 = vadd.f32 %v3269_v40, %v3268_v39 }
 0xb5e   :  { %5732 = vtanh.f32 %v6912_v29 }
 0xb68   :  { %v5733_v46 = vpop.eup %5732 }
 0xb69   :  { %v3272_v56 = vmul.f32 %v5733_v46, %v3267_v61 }
 0xb6b   :  { %3342 = vmatmul.mubr.f32.vlgmr.msra.gmra.mrb[22].mxu0 %v3272_v56  ;;  %3413 = vmatmul.mubr.f32.vlgmr.msra.gmra.mrb[22].mxu1 %v3272_v56 }
 0xb6c   :  { %5203 = vmatpush1.bf16.msra.mxu0 %v6668_v28  ;;  %5235 = vmatpush1.bf16.msra.mxu1 %v6671_v30 }
 0xb6d   :  { %5205 = vmatprep.subr.bf16.mxu0 %v6676_v51  ;;  %5237 = vmatprep.subr.bf16.mxu1 %v6678_v19 }
 0xb6e   :  { %3509 = vmatprep.mubr.f32.mxu0 %v5958_v1  ;;  %3580 = vmatprep.mubr.f32.mxu1 %v5958_v1 }
 0xb70   :  { %5207 = vmatpush1.bf16.msra.mxu0 %v6680_v17  ;;  %5239 = vmatpush1.bf16.msra.mxu1 %v6683_v0 }
 0xb71   :  { %5209 = vmatprep.subr.bf16.mxu0 %v6688_v44  ;;  %5241 = vmatprep.subr.bf16.mxu1 %v6690_v11 }
 0xb74   :  { %5211 = vmatpush1.bf16.msra.mxu0 %v6692_v20  ;;  %5243 = vmatpush1.bf16.msra.mxu1 %v6695_v55 }
 0xb75   :  { %5213 = vmatprep.subr.bf16.mxu0 %v6700_v34  ;;  %5245 = vmatprep.subr.bf16.mxu1 %v6702_v14 }
 0xb78   :  { %5215 = vmatpush1.bf16.msra.mxu0 %v6704_v27  ;;  %5247 = vmatpush1.bf16.msra.mxu1 %v6707_v23 }
 0xb79   :  { %5217 = vmatprep.subr.bf16.mxu0 %v6712_v16  ;;  %5249 = vmatprep.subr.bf16.mxu1 %v6714_v21 }
 0xb7c   :  { %5219 = vmatpush1.bf16.msra.mxu0 %v6716_v59  ;;  %5251 = vmatpush1.bf16.msra.mxu1 %v6719_v18 }
 0xb7d   :  { %5221 = vmatprep.subr.bf16.mxu0 %v6723_v2  ;;  %5253 = vmatprep.subr.bf16.mxu1 %v6725_v9 }
 0xb80   :  { %5223 = vmatpush1.bf16.msra.mxu0 %v6728_v58  ;;  %5255 = vmatpush1.bf16.msra.mxu1 %v6732_v3 }
 0xb81   :  { %5225 = vmatprep.subr.bf16.mxu0 %v6734_v7  ;;  %5257 = vmatprep.subr.bf16.mxu1 %v6736_v26 }
 0xb84   :  { %5227 = vmatpush1.bf16.msra.mxu0 %v6739_v4  ;;  %5259 = vmatpush1.bf16.msra.mxu1 %v6743_v45 }
 0xb85   :  { %5229 = vmatprep.subr.bf16.mxu0 %v6748_v6  ;;  %5261 = vmatprep.subr.bf16.mxu1 %v6750_v63 }
 0xb88   :  { %5231 = vmatpush1.bf16.msra.mxu0 %v6752_v50  ;;  %5263 = vmatpush1.bf16.msra.mxu1 %v6755_v42 }
 0xb89   :  { %5265 = vmatprep.subr.bf16.mxu0 %v6664_v12  ;;  %5297 = vmatprep.subr.bf16.mxu1 %v6666_v10 }
 0xc3e   :  { %v3343_v48 = vpop.f32.mrb[22].mxu0  ;;  %v3414_v43 = vpop.f32.mrb[22].mxu1 }
 0xc3f   :  { %v5518_v60 = vadd.f32 %v3343_v48, %v6810_v8  ;;  %v3345_v37 = vpop.f32.mrb[23].mxu0  ;;  %v3416_v22 = vpop.f32.mrb[23].mxu1  ;;  %v5534_v5 = vadd.f32 %v3414_v43, %v6819_v53 }
 0xc40   :  { %v5519_v57 = vadd.f32 %v3345_v37, %v6814_v41  ;;  %v5535_v25 = vadd.f32 %v3416_v22, %v6825_v35 }
 0xc41   :  { %v3423_v33 = vmul.f32 0.5, %v5518_v60 }
 0xc42   :  { %v3427_v49 = vmul.f32 0.5, %v5519_v57  ;;  %v3432_v54 = vmul.f32 0.5, %v5535_v25 }
 0xc43   :  { %5734 = vtanh.f32 %v3423_v33 }
 0xc44   :  { %5736 = vtanh.f32 %v3427_v49 }
 0xc45   :  { %5738 = vtanh.f32 %v5534_v5 }
 0xc46   :  { %5740 = vtanh.f32 %v3432_v54 }
 0xc4d   :  { %v5735_v32 = vpop.eup %5734 }
 0xc4e   :  { %v5737_v62 = vpop.eup %5736  ;;  %v3425_v15 = vmul.f32 0.5, %v5735_v32 }
 0xc4f   :  { %v3429_v38 = vmul.f32 0.5, %v5737_v62  ;;  %v5739_v36 = vpop.eup %5738 }
 0xc50   :  { %v3426_v13 = vadd.f32 0.5, %v3425_v15  ;;  %v5741_v31 = vpop.eup %5740 }
 0xc51   :  { %v3430_v24 = vadd.f32 0.5, %v3429_v38  ;;  %v3434_v47 = vmul.f32 0.5, %v5741_v31 }
 0xc52   :  { %v3437_v52 = vmul.f32 %v5739_v36, %v3426_v13 }
 0xc53   :  { %v3436_v40 = vmul.f32 %v3430_v24, %v6912_v29  ;;  %v3435_v61 = vadd.f32 0.5, %v3434_v47 }
 0xc55   :  { %v6954_v39 = vadd.f32 %v3437_v52, %v3436_v40 }
 0xc57   :  { %5742 = vtanh.f32 %v6954_v39 }
 0xc61   :  { %v5743_v46 = vpop.eup %5742 }
 0xc62   :  { %v3440_v56 = vmul.f32 %v5743_v46, %v3435_v61 }
 0xc64   :  { %3510 = vmatmul.mubr.f32.vlgmr.msra.gmra.mrb[24].mxu0 %v3440_v56  ;;  %3581 = vmatmul.mubr.f32.vlgmr.msra.gmra.mrb[24].mxu1 %v3440_v56 }
 0xc65   :  { %5267 = vmatpush1.bf16.msra.mxu0 %v6668_v28  ;;  %5299 = vmatpush1.bf16.msra.mxu1 %v6671_v30 }
 0xc66   :  { %5269 = vmatprep.subr.bf16.mxu0 %v6676_v51  ;;  %5301 = vmatprep.subr.bf16.mxu1 %v6678_v19 }
 0xc67   :  { %3677 = vmatprep.mubr.f32.mxu0 %v5958_v1  ;;  %3748 = vmatprep.mubr.f32.mxu1 %v5958_v1 }
 0xc69   :  { %5271 = vmatpush1.bf16.msra.mxu0 %v6680_v17  ;;  %5303 = vmatpush1.bf16.msra.mxu1 %v6683_v0 }
 0xc6a   :  { %5273 = vmatprep.subr.bf16.mxu0 %v6688_v44  ;;  %5305 = vmatprep.subr.bf16.mxu1 %v6690_v11 }
 0xc6d   :  { %5275 = vmatpush1.bf16.msra.mxu0 %v6692_v20  ;;  %5307 = vmatpush1.bf16.msra.mxu1 %v6695_v55 }
 0xc6e   :  { %5277 = vmatprep.subr.bf16.mxu0 %v6700_v34  ;;  %5309 = vmatprep.subr.bf16.mxu1 %v6702_v14 }
 0xc71   :  { %5279 = vmatpush1.bf16.msra.mxu0 %v6704_v27  ;;  %5311 = vmatpush1.bf16.msra.mxu1 %v6707_v23 }
 0xc72   :  { %5281 = vmatprep.subr.bf16.mxu0 %v6712_v16  ;;  %5313 = vmatprep.subr.bf16.mxu1 %v6714_v21 }
 0xc75   :  { %5283 = vmatpush1.bf16.msra.mxu0 %v6716_v59  ;;  %5315 = vmatpush1.bf16.msra.mxu1 %v6719_v18 }
 0xc76   :  { %5285 = vmatprep.subr.bf16.mxu0 %v6723_v2  ;;  %5317 = vmatprep.subr.bf16.mxu1 %v6725_v9 }
 0xc79   :  { %5287 = vmatpush1.bf16.msra.mxu0 %v6728_v58  ;;  %5319 = vmatpush1.bf16.msra.mxu1 %v6732_v3 }
 0xc7a   :  { %5289 = vmatprep.subr.bf16.mxu0 %v6734_v7  ;;  %5321 = vmatprep.subr.bf16.mxu1 %v6736_v26 }
 0xc7d   :  { %5291 = vmatpush1.bf16.msra.mxu0 %v6739_v4  ;;  %5323 = vmatpush1.bf16.msra.mxu1 %v6743_v45 }
 0xc7e   :  { %5293 = vmatprep.subr.bf16.mxu0 %v6748_v6  ;;  %5325 = vmatprep.subr.bf16.mxu1 %v6750_v63 }
 0xc81   :  { %5295 = vmatpush1.bf16.msra.mxu0 %v6752_v50  ;;  %5327 = vmatpush1.bf16.msra.mxu1 %v6755_v42 }
 0xc82   :  { %5329 = vmatprep.subr.bf16.mxu0 %v6664_v12  ;;  %5361 = vmatprep.subr.bf16.mxu1 %v6666_v10 }
 0xd37   :  { %v3511_v29 = vpop.f32.mrb[24].mxu0  ;;  %v3582_v48 = vpop.f32.mrb[24].mxu1 }
 0xd38   :  { %v5520_v43 = vadd.f32 %v3511_v29, %v6810_v8  ;;  %v3513_v60 = vpop.f32.mrb[25].mxu0  ;;  %v3584_v37 = vpop.f32.mrb[25].mxu1  ;;  %v5536_v49 = vadd.f32 %v3582_v48, %v6819_v53 }
 0xd39   :  { %v5521_v22 = vadd.f32 %v3513_v60, %v6814_v41  ;;  %v5537_v5 = vadd.f32 %v3584_v37, %v6825_v35 }
 0xd3a   :  { %v3591_v57 = vmul.f32 0.5, %v5520_v43 }
 0xd3b   :  { %v3595_v33 = vmul.f32 0.5, %v5521_v22  ;;  %v3600_v25 = vmul.f32 0.5, %v5537_v5 }
 0xd3c   :  { %5744 = vtanh.f32 %v3591_v57 }
 0xd3d   :  { %5746 = vtanh.f32 %v3595_v33 }
 0xd3e   :  { %5748 = vtanh.f32 %v5536_v49 }
 0xd3f   :  { %5750 = vtanh.f32 %v3600_v25 }
 0xd46   :  { %v5745_v54 = vpop.eup %5744 }
 0xd47   :  { %v5747_v32 = vpop.eup %5746  ;;  %v3593_v62 = vmul.f32 0.5, %v5745_v54 }
 0xd48   :  { %v3597_v15 = vmul.f32 0.5, %v5747_v32  ;;  %v5749_v13 = vpop.eup %5748 }
 0xd49   :  { %v3594_v38 = vadd.f32 0.5, %v3593_v62  ;;  %v5751_v31 = vpop.eup %5750 }
 0xd4a   :  { %v3598_v36 = vadd.f32 0.5, %v3597_v15  ;;  %v3602_v47 = vmul.f32 0.5, %v5751_v31 }
 0xd4b   :  { %v3605_v24 = vmul.f32 %v5749_v13, %v3594_v38 }
 0xd4c   :  { %v3604_v52 = vmul.f32 %v3598_v36, %v6954_v39  ;;  %v3603_v61 = vadd.f32 0.5, %v3602_v47 }
 0xd4e   :  { %v6996_v40 = vadd.f32 %v3605_v24, %v3604_v52 }
 0xd50   :  { %5752 = vtanh.f32 %v6996_v40 }
 0xd5a   :  { %v5753_v46 = vpop.eup %5752 }
 0xd5b   :  { %v3608_v56 = vmul.f32 %v5753_v46, %v3603_v61  ;;  %v4116_v46 = vld [vmem:[#allocation14 + $0x18] sm:$0xff] }
 0xd5d   :  { %3678 = vmatmul.mubr.f32.vlgmr.msra.gmra.mrb[26].mxu0 %v3608_v56  ;;  %3749 = vmatmul.mubr.f32.vlgmr.msra.gmra.mrb[26].mxu1 %v3608_v56 }
 0xd5e   :  { %5331 = vmatpush1.bf16.msra.mxu0 %v6668_v28  ;;  %5363 = vmatpush1.bf16.msra.mxu1 %v6671_v30 }
 0xd5f   :  { %5333 = vmatprep.subr.bf16.mxu0 %v6676_v51  ;;  %5365 = vmatprep.subr.bf16.mxu1 %v6678_v19 }
 0xd60   :  { %3845 = vmatprep.mubr.f32.mxu0 %v5958_v1  ;;  %3916 = vmatprep.mubr.f32.mxu1 %v5958_v1 }
 0xd62   :  { %5335 = vmatpush1.bf16.msra.mxu0 %v6680_v17  ;;  %5367 = vmatpush1.bf16.msra.mxu1 %v6683_v0 }
 0xd63   :  { %5337 = vmatprep.subr.bf16.mxu0 %v6688_v44  ;;  %5369 = vmatprep.subr.bf16.mxu1 %v6690_v11 }
 0xd66   :  { %5339 = vmatpush1.bf16.msra.mxu0 %v6692_v20  ;;  %5371 = vmatpush1.bf16.msra.mxu1 %v6695_v55 }
 0xd67   :  { %5341 = vmatprep.subr.bf16.mxu0 %v6700_v34  ;;  %5373 = vmatprep.subr.bf16.mxu1 %v6702_v14 }
 0xd6a   :  { %5343 = vmatpush1.bf16.msra.mxu0 %v6704_v27  ;;  %5375 = vmatpush1.bf16.msra.mxu1 %v6707_v23 }
 0xd6b   :  { %5345 = vmatprep.subr.bf16.mxu0 %v6712_v16  ;;  %5377 = vmatprep.subr.bf16.mxu1 %v6714_v21 }
 0xd6e   :  { %5347 = vmatpush1.bf16.msra.mxu0 %v6716_v59  ;;  %5379 = vmatpush1.bf16.msra.mxu1 %v6719_v18 }
 0xd6f   :  { %5349 = vmatprep.subr.bf16.mxu0 %v6723_v2  ;;  %5381 = vmatprep.subr.bf16.mxu1 %v6725_v9 }
 0xd72   :  { %5351 = vmatpush1.bf16.msra.mxu0 %v6728_v58  ;;  %5383 = vmatpush1.bf16.msra.mxu1 %v6732_v3 }
 0xd73   :  { %5353 = vmatprep.subr.bf16.mxu0 %v6734_v7  ;;  %5385 = vmatprep.subr.bf16.mxu1 %v6736_v26 }
 0xd76   :  { %5355 = vmatpush1.bf16.msra.mxu0 %v6739_v4  ;;  %5387 = vmatpush1.bf16.msra.mxu1 %v6743_v45 }
 0xd77   :  { %5357 = vmatprep.subr.bf16.mxu0 %v6748_v6  ;;  %5389 = vmatprep.subr.bf16.mxu1 %v6750_v63 }
 0xd7a   :  { %5359 = vmatpush1.bf16.msra.mxu0 %v6752_v50  ;;  %5391 = vmatpush1.bf16.msra.mxu1 %v6755_v42 }
 0xd7b   :  { %5393 = vmatprep.subr.bf16.mxu0 %v6664_v12  ;;  %5425 = vmatprep.subr.bf16.mxu1 %v6666_v10 }
 0xe30   :  { %v3679_v39 = vpop.f32.mrb[26].mxu0  ;;  %v3750_v29 = vpop.f32.mrb[26].mxu1 }
 0xe31   :  { %v5522_v48 = vadd.f32 %v3679_v39, %v6810_v8  ;;  %v3681_v43 = vpop.f32.mrb[27].mxu0  ;;  %v3752_v60 = vpop.f32.mrb[27].mxu1  ;;  %v5538_v33 = vadd.f32 %v3750_v29, %v6819_v53  ;;  %v4117_v39 = vld [vmem:[#allocation14 + $0x20] sm:$0xff]  ;;  %v4118_v29 = vld [vmem:[#allocation14 + $0x28] sm:$0xff] }
 0xe32   :  { %v5523_v37 = vadd.f32 %v3681_v43, %v6814_v41  ;;  %v5539_v49 = vadd.f32 %v3752_v60, %v6825_v35  ;;  %v4119_v43 = vld [vmem:[#allocation14 + $0x30] sm:$0xff]  ;;  %v4120_v60 = vld [vmem:[#allocation14 + $0x38] sm:$0xff] }
 0xe33   :  { %v3759_v22 = vmul.f32 0.5, %v5522_v48  ;;  %v5463_v48 = vpack.c.bf16 %v4118_v29, %v4117_v39 }
 0xe34   :  { %v3763_v57 = vmul.f32 0.5, %v5523_v37  ;;  %v3768_v12 = vmul.f32 0.5, %v5539_v49  ;;  %v5466_v37 = vpack.c.bf16 %v4120_v60, %v4119_v43  ;;  %v4123_v49 = vld [vmem:[#allocation14 + $0x50] sm:$0xff] }
 0xe35   :  { %5754 = vtanh.f32 %v3759_v22  ;;  %v4121_v22 = vld [vmem:[#allocation14 + $0x40] sm:$0xff] }
 0xe36   :  { %5756 = vtanh.f32 %v3763_v57  ;;  %v4122_v57 = vld [vmem:[#allocation14 + $0x48] sm:$0xff] }
 0xe37   :  { %5758 = vtanh.f32 %v5538_v33  ;;  %v5469_v33 = vpack.c.bf16 %v4122_v57, %v4121_v22 }
 0xe38   :  { %5760 = vtanh.f32 %v3768_v12  ;;  %v4124_v12 = vld [vmem:[#allocation14 + $0x58] sm:$0xff] }
 0xe3f   :  { %v5755_v5 = vpop.eup %5754 }
 0xe40   :  { %v5757_v10 = vpop.eup %5756  ;;  %v3761_v25 = vmul.f32 0.5, %v5755_v5  ;;  %v5472_v5 = vpack.c.bf16 %v4124_v12, %v4123_v49 }
 0xe41   :  { %v3765_v54 = vmul.f32 0.5, %v5757_v10  ;;  %v5759_v62 = vpop.eup %5758  ;;  %v4125_v10 = vld [vmem:[#allocation14 + $0x60] sm:$0xff] }
 0xe42   :  { %v3762_v32 = vadd.f32 0.5, %v3761_v25  ;;  %v5761_v24 = vpop.eup %5760  ;;  %v4126_v25 = vld [vmem:[#allocation14 + $0x68] sm:$0xff] }
 0xe43   :  { %v3766_v15 = vadd.f32 0.5, %v3765_v54  ;;  %v3770_v52 = vmul.f32 0.5, %v5761_v24  ;;  %v5475_v54 = vpack.c.bf16 %v4126_v25, %v4125_v10 }
 0xe44   :  { %v3773_v38 = vmul.f32 %v5759_v62, %v3762_v32  ;;  %v4127_v32 = vld [vmem:[#allocation14 + $0x70] sm:$0xff]  ;;  %v4128_v62 = vld [vmem:[#allocation14 + $0x78] sm:$0xff] }
 0xe45   :  { %v3772_v13 = vmul.f32 %v3766_v15, %v6996_v40  ;;  %v3771_v31 = vadd.f32 0.5, %v3770_v52  ;;  %v4115_v40 = vld [vmem:[#allocation14 + $0x10] sm:$0xff]  ;;  %v5478_v15 = vpack.c.bf16 %v4128_v62, %v4127_v32 }
 0xe46   :  { %v5460_v56 = vpack.c.bf16 %v4116_v46, %v4115_v40 }
 0xe47   :  { %v7038_v36 = vadd.f32 %v3773_v38, %v3772_v13 }
 0xe49   :  { %5762 = vtanh.f32 %v7038_v36 }
 0xe53   :  { %v5763_v47 = vpop.eup %5762 }
 0xe54   :  { %v3776_v61 = vmul.f32 %v5763_v47, %v3771_v31 }
 0xe56   :  { %3846 = vmatmul.mubr.f32.vlgmr.msra.gmra.mrb[28].mxu0 %v3776_v61  ;;  %3917 = vmatmul.mubr.f32.vlgmr.msra.gmra.mrb[28].mxu1 %v3776_v61 }
 0xe57   :  { %5395 = vmatpush1.bf16.msra.mxu0 %v6668_v28  ;;  %5427 = vmatpush1.bf16.msra.mxu1 %v6671_v30 }
 0xe58   :  { %5397 = vmatprep.subr.bf16.mxu0 %v6676_v51  ;;  %5429 = vmatprep.subr.bf16.mxu1 %v6678_v19 }
 0xe59   :  { %4013 = vmatprep.mubr.f32.mxu0 %v5958_v1  ;;  %4084 = vmatprep.mubr.f32.mxu1 %v5958_v1 }
 0xe5b   :  { %5399 = vmatpush1.bf16.msra.mxu0 %v6680_v17  ;;  %5431 = vmatpush1.bf16.msra.mxu1 %v6683_v0 }
 0xe5c   :  { %5401 = vmatprep.subr.bf16.mxu0 %v6688_v44  ;;  %5433 = vmatprep.subr.bf16.mxu1 %v6690_v11 }
 0xe5f   :  { %5403 = vmatpush1.bf16.msra.mxu0 %v6692_v20  ;;  %5435 = vmatpush1.bf16.msra.mxu1 %v6695_v55 }
 0xe60   :  { %5405 = vmatprep.subr.bf16.mxu0 %v6700_v34  ;;  %5437 = vmatprep.subr.bf16.mxu1 %v6702_v14 }
 0xe63   :  { %5407 = vmatpush1.bf16.msra.mxu0 %v6704_v27  ;;  %5439 = vmatpush1.bf16.msra.mxu1 %v6707_v23 }
 0xe64   :  { %5409 = vmatprep.subr.bf16.mxu0 %v6712_v16  ;;  %5441 = vmatprep.subr.bf16.mxu1 %v6714_v21 }
 0xe67   :  { %5411 = vmatpush1.bf16.msra.mxu0 %v6716_v59  ;;  %5443 = vmatpush1.bf16.msra.mxu1 %v6719_v18 }
 0xe68   :  { %5413 = vmatprep.subr.bf16.mxu0 %v6723_v2  ;;  %5445 = vmatprep.subr.bf16.mxu1 %v6725_v9 }
 0xe6b   :  { %5415 = vmatpush1.bf16.msra.mxu0 %v6728_v58  ;;  %5447 = vmatpush1.bf16.msra.mxu1 %v6732_v3 }
 0xe6c   :  { %5417 = vmatprep.subr.bf16.mxu0 %v6734_v7  ;;  %5449 = vmatprep.subr.bf16.mxu1 %v6736_v26 }
 0xe6f   :  { %5419 = vmatpush1.bf16.msra.mxu0 %v6739_v4  ;;  %5451 = vmatpush1.bf16.msra.mxu1 %v6743_v45 }
 0xe70   :  { %5421 = vmatprep.subr.bf16.mxu0 %v6748_v6  ;;  %5453 = vmatprep.subr.bf16.mxu1 %v6750_v63  ;;  %v4113_v6 = vld [vmem:[#allocation14] sm:$0xff]  ;;  %v4114_v63 = vld [vmem:[#allocation14 + $0x8] sm:$0xff] }
 0xe73   :  { %5423 = vmatpush1.bf16.msra.mxu0 %v6752_v50  ;;  %5455 = vmatpush1.bf16.msra.mxu1 %v6755_v42  ;;  %v5457_v50 = vpack.c.bf16 %v4114_v63, %v4113_v6  ;;  %v5959_v42 = vmov 0.0|0.0  }
 0xe74   :  { %5456 = vmatprep.subr.bf16.mxu0 %v5959_v42 }
 0xf29   :  { %v3847_v28 = vpop.f32.mrb[28].mxu0  ;;  %v3918_v30 = vpop.f32.mrb[28].mxu1 }
 0xf2a   :  { %v5524_v51 = vadd.f32 %v3847_v28, %v6810_v8  ;;  %v3849_v19 = vpop.f32.mrb[29].mxu0  ;;  %v3920_v17 = vpop.f32.mrb[29].mxu1  ;;  %v5540_v20 = vadd.f32 %v3918_v30, %v6819_v53 }
 0xf2b   :  { %v5525_v0 = vadd.f32 %v3849_v19, %v6814_v41  ;;  %v5541_v55 = vadd.f32 %v3920_v17, %v6825_v35 }
 0xf2c   :  { %v3927_v44 = vmul.f32 0.5, %v5524_v51 }
 0xf2d   :  { %v3931_v11 = vmul.f32 0.5, %v5525_v0  ;;  %v3936_v34 = vmul.f32 0.5, %v5541_v55 }
 0xf2e   :  { %5764 = vtanh.f32 %v3927_v44 }
 0xf2f   :  { %5766 = vtanh.f32 %v3931_v11 }
 0xf30   :  { %5768 = vtanh.f32 %v5540_v20 }
 0xf31   :  { %5770 = vtanh.f32 %v3936_v34 }
 0xf38   :  { %v5765_v14 = vpop.eup %5764 }
 0xf39   :  { %v5767_v27 = vpop.eup %5766  ;;  %v3929_v23 = vmul.f32 0.5, %v5765_v14 }
 0xf3a   :  { %v3933_v16 = vmul.f32 0.5, %v5767_v27  ;;  %v5769_v59 = vpop.eup %5768 }
 0xf3b   :  { %v3930_v21 = vadd.f32 0.5, %v3929_v23  ;;  %v5771_v3 = vpop.eup %5770 }
 0xf3c   :  { %v3934_v18 = vadd.f32 0.5, %v3933_v16  ;;  %v3938_v7 = vmul.f32 0.5, %v5771_v3  ;;  %v4251_v3 = vld [vmem:[#allocation4] ss:$0 sm:$0xff] }
 0xf3d   :  { %v3941_v2 = vmul.f32 %v5769_v59, %v3930_v21 }
 0xf3e   :  { %v3940_v9 = vmul.f32 %v3934_v18, %v7038_v36  ;;  %v3939_v26 = vadd.f32 0.5, %v3938_v7  ;;  %v4250_v18 = vld [vmem:[%s7114_s9] ss:$0 sm:$0xff] }
 0xf40   :  { %v7078_v58 = vadd.f32 %v3941_v2, %v3940_v9 }
 0xf42   :  { %5772 = vtanh.f32 %v7078_v58 }
 0xf4c   :  { %v5773_v4 = vpop.eup %5772 }
 0xf4d   :  { %v3944_v45 = vmul.f32 %v5773_v4, %v3939_v26 }
 0xf4f   :  { %4014 = vmatmul.mubr.f32.vlgmr.msra.gmra.mrb[30].mxu0 %v3944_v45  ;;  %4085 = vmatmul.mubr.f32.vlgmr.msra.gmra.mrb[30].mxu1 %v3944_v45 }
 0xf50   :  { %5458 = vmatpush3.bf16.msra.mxu0 %v5457_v50  ;;  %4301 = vmatprep.mubr.msk.f32.mxu0 %vm5960_vm0, %v5958_v1 }
 0xf51   :  { %5459 = vmatprep.subr.bf16.mxu0 %v5959_v42 }
 0xf54   :  { %5461 = vmatpush3.bf16.msra.mxu0 %v5460_v56 }
 0xf55   :  { %5462 = vmatprep.subr.bf16.mxu0 %v5959_v42 }
 0xf58   :  { %5464 = vmatpush3.bf16.msra.mxu0 %v5463_v48 }
 0xf59   :  { %5465 = vmatprep.subr.bf16.mxu0 %v5959_v42 }
 0xf5c   :  { %5467 = vmatpush3.bf16.msra.mxu0 %v5466_v37 }
 0xf5d   :  { %5468 = vmatprep.subr.bf16.mxu0 %v5959_v42 }
 0xf60   :  { %5470 = vmatpush3.bf16.msra.mxu0 %v5469_v33 }
 0xf61   :  { %5471 = vmatprep.subr.bf16.mxu0 %v5959_v42 }
 0xf64   :  { %5473 = vmatpush3.bf16.msra.mxu0 %v5472_v5 }
 0xf65   :  { %5474 = vmatprep.subr.bf16.mxu0 %v5959_v42 }
 0xf68   :  { %5476 = vmatpush3.bf16.msra.mxu0 %v5475_v54 }
 0xf69   :  { %5477 = vmatprep.subr.bf16.mxu0 %v5959_v42 }
 0xf6c   :  { %5479 = vmatpush3.bf16.msra.mxu0 %v5478_v15 }
0x1022   :  { %v4015_v38 = vpop.f32.mrb[30].mxu0  ;;  %v4086_v13 = vpop.f32.mrb[30].mxu1 }
0x1023   :  { %v5526_v36 = vadd.f32 %v4015_v38, %v6810_v8  ;;  %v4017_v24 = vpop.f32.mrb[31].mxu0  ;;  %v4088_v52 = vpop.f32.mrb[31].mxu1  ;;  %v5542_v28 = vadd.f32 %v4086_v13, %v6819_v53 }
0x1024   :  { %v5527_v31 = vadd.f32 %v4017_v24, %v6814_v41  ;;  %v5543_v30 = vadd.f32 %v4088_v52, %v6825_v35  ;;  %v4249_v35 = vld [vmem:[%s7113_s8] ss:$0 sm:$0xff]  ;;  %s5916_s8 = scalar_lea.vmem %s4238_s18, 128 }
0x1025   :  { %v4095_v47 = vmul.f32 0.5, %v5526_v36  ;;  %p5917_p6 = scmp.ne.s32.totalorder %s4238_s18, %s5916_s8  ;;  %p5922_p8 = scmp.lt.s32.totalorder %s5916_s8, %s5916_s8 }
0x1026   :  { %v4099_v61 = vmul.f32 0.5, %v5527_v31  ;;  %v4104_v51 = vmul.f32 0.5, %v5543_v30 }
0x1027   :  { %5774 = vtanh.f32 %v4095_v47  ;;  %p5923_p9 = por %p5922_p8, %p5921_p7 }
0x1028   :  { %5776 = vtanh.f32 %v4099_v61 }
0x1029   :  { %5778 = vtanh.f32 %v5542_v28  ;;  %p5924_p10 = pnand %p5923_p9, %p5917_p6 }
0x102a   :  { %5780 = vtanh.f32 %v4104_v51 }
0x1031   :  { %v5775_v19 = vpop.eup %5774 }
0x1032   :  { %v5777_v1 = vpop.eup %5776  ;;  %v4097_v17 = vmul.f32 0.5, %v5775_v19 }
0x1033   :  { %v4101_v0 = vmul.f32 0.5, %v5777_v1  ;;  %v5779_v44 = vpop.eup %5778 }
0x1034   :  { %v4098_v8 = vadd.f32 0.5, %v4097_v17  ;;  %v5781_v34 = vpop.eup %5780 }
0x1035   :  { %v4102_v11 = vadd.f32 0.5, %v4101_v0  ;;  %v4106_v53 = vmul.f32 0.5, %v5781_v34 }
0x1036   :  { %v4109_v20 = vmul.f32 %v5779_v44, %v4098_v8 }
0x1037   :  { %v4108_v41 = vmul.f32 %v4102_v11, %v7078_v58  ;;  %v4107_v14 = vadd.f32 0.5, %v4106_v53  ;;  %v5961_v58 = vmov 0  }
0x1038   :  { %5623 = vset.pattern.permute.xlu0 %v5961_v58 }
0x1039   :  { %v4110_v55 = vadd.f32 %v4109_v20, %v4108_v41 }
0x103b   :  { %5782 = vtanh.f32 %v4110_v55 }
0x1045   :  { %v5783_v27 = vpop.eup %5782 }
0x1046   :  { %v4112_v23 = vmul.f32 %v5783_v27, %v4107_v14 }
0x1048   :  { %4302 = vmatmul.mubr.f32.vlgmr.msra.gmra.mrb[32].mxu0 %v4112_v23 }
0x111b   :  { %v4202_v16 = vpop.f32.mrb[32].mxu0 }
0x111c   :  { %v4203_v21 = vadd.f32 %v4249_v35, %v4202_v16  ;;  %v4303_v59 = vpop.f32.mrb[33].mxu0 }
0x111e   :  { %v4206_v2 = vmax.f32 %v4203_v21, 0.0 }
0x1120   :  { %v4214_v9 = vmul.f32 %v4250_v18, %v4206_v2 }
0x1122   :  { %4215 = vadd.xlane.f32.xlu0 %v4214_v9 }
0x11af   :  { %v4216_v7 = vpop.xlane.xlu0 %4215 }
0x11b0   :  { %v4224_v26 = vadd.f32 %v4251_v3, %v4216_v7 }
0x11b2   :  { %4227 = vperm.xlu0 %5623, %v4224_v26  }
0x1231   :  { %v4228_v4 = vpop.permute.xlu0 %4227 }
0x1232   :  { %4230 = vst [vmem:[#allocation16] sm:$0xff] %v4228_v4 }
0x1233   :  { %5927 = shalt.err (!%p5924_p10)
}
0x1234   :  { %s5928_s21 = scalar_lea.hbm %s7116_s11, 128 }
0x1235   :  { %p5929_p11 = scmp.ne.s32.totalorder %s7116_s11, %s5928_s21  ;;  %p5932_p12 = scmp.lt.u32.totalorder %s5928_s21, %s7116_s11 }
0x1237   :  { %p5934_p13 = pnand %p5932_p12, %p5929_p11 }
0x1239   :  { %5937 = shalt.err (!%p5934_p13)
}
0x123a   :  { %4240 = dma.vmem_to_hbm [thread:$0]  %s4238_s18, 128, %s7116_s11, [#allocation7]  }
0x123b   :  { %5946 = dma.done.wait [#allocation7], 128  }
0x123c   :  { %5947 = vsyncadd [#allocation7], 4294967168 }
0x123d   :  { %4244 = vsyncpa [#allocation6], 1 }
0x123e   :  { %4245 = vsyncpa [#allocation9], 1 }
0x123f   :  { %4246 = vsyncpa [#allocation12], 1 }
0x1240   :  { %4247 = vsyncpa [#allocation15], 1 }
0x1241   :  { %4248 = vsyncpa [#allocation7], 1 }

</bundles_post_ra>
